<compile_context>
chip_gen: v5e
topology: v5e:2x2
jax: 0.10.0
libtpu: 0.0.40
codegen_flags: <defaults>
</compile_context>

<pallas_src>
import jax
import jax.numpy as jnp
from jax.experimental import pallas as pl
from jax.experimental.pallas import tpu as pltpu


# ----------------------------- fused forward kernel -----------------------------
def _make_fused_kernel(T, B, H, n_layers, out_rows, out_cols):
    HS = 2 * H      # bidirectional feature size
    G4 = 4 * H      # gates of one direction
    G8 = 8 * H      # gates of both directions
    B2 = 2 * B      # direction-stacked batch

    def kernel(*refs):
        x_ref = refs[0]
        idx = 1
        lstm = []
        for _ in range(n_layers):
            lstm.append(refs[idx:idx + 3])          # (wcat, bcat, whhcat)
            idx += 3
        wq_ref, bq_ref, wk_ref, bk_ref, v_ref, fcw_ref, fcb_ref = refs[idx:idx + 7]
        out_ref = refs[idx + 7]

        # loop-invariant masks (hoisted; JAX does not CSE broadcasts inside loops)
        # sublane mask: rows [0, B) of the stacked batch are the forward direction
        row_is_fwd = jax.lax.broadcasted_iota(jnp.int32, (B2, 1), 0) < B
        # lane mask: the g-gate block [2H, 3H) uses tanh, the rest sigmoid
        lane = jax.lax.broadcasted_iota(jnp.int32, (1, G4), 1)
        is_g_lane = jnp.logical_and(lane >= 2 * H, lane < 3 * H)

        # --------------------------- stacked bidirectional LSTM ---------------------------
        src = x_ref[...]                            # (T*B, Din), time-major flattened
        hall_blocks = None
        for l in range(n_layers):
            wcat_ref, bcat_ref, whh_ref = lstm[l]

            # hoisted input projection (both directions, all timesteps) in one GEMM + bias
            pboth = (jnp.dot(src, wcat_ref[...],
                             preferred_element_type=jnp.float32) + bcat_ref[...])  # (T*B, 8H)
            whh = whh_ref[...]                      # (H, 8H) = [Whh_f^T | Whh_r^T]

            h = jnp.zeros((B2, H), jnp.float32)     # stacked state lives in registers
            c = jnp.zeros((B2, H), jnp.float32)
            fwd_steps, rev_steps = [], []           # register-resident layer output
            for s in range(T):                      # static -> fully unrolled
                rf = s * B                          # forward direction works on time s
                rr = (T - 1 - s) * B                # reverse direction works on time T-1-s
                gx = jnp.concatenate([pboth[rf:rf + B, 0:G4],
                                      pboth[rr:rr + B, G4:G8]], axis=0)             # (2B, 4H)
                hw = jnp.dot(h, whh, preferred_element_type=jnp.float32)            # (2B, 8H)
                gates = gx + jnp.where(row_is_fwd, hw[:, 0:G4], hw[:, G4:G8])       # (2B, 4H)
                # 2 full-vreg transcendentals + 1 select instead of 4 quarter-width ones
                act = jnp.where(is_g_lane, jnp.tanh(gates), jax.nn.sigmoid(gates))
                i_g = act[:, 0 * H:1 * H]
                f_g = act[:, 1 * H:2 * H]
                g_g = act[:, 2 * H:3 * H]
                o_g = act[:, 3 * H:4 * H]
                c = f_g * c + i_g * g_g
                h = o_g * jnp.tanh(c)
                fwd_steps.append(h[0:B, :])         # fwd output for time s
                rev_steps.append(h[B:B2, :])        # rev output for time T-1-s

            # time-major layer output assembled once, in registers:
            #   block t = [h_fwd[t] | h_rev[t]]  (rev step s produced time T-1-s)
            hall_blocks = [jnp.concatenate([fwd_steps[t], rev_steps[T - 1 - t]], axis=1)
                           for t in range(T)]
            src = jnp.concatenate(hall_blocks, axis=0)                       # (T*B, 2H)

        # --------------------------- temporal attention epilogue ---------------------------
        hall = src                                                           # (T*B, HS)
        h_last = hall_blocks[T - 1]                                          # (B, HS)
        q = jnp.dot(h_last, wq_ref[...],
                    preferred_element_type=jnp.float32) + bq_ref[...]        # (B, HS)
        k = jnp.dot(hall, wk_ref[...],
                    preferred_element_type=jnp.float32) + bk_ref[...]        # (T*B, HS)
        v = v_ref[...]                                                       # (1, HS)

        # single EUP pass over all rows, single cross-lane reduction
        q_full = jnp.concatenate([q] * T, axis=0)                            # (T*B, HS)
        e = jnp.tanh(k + q_full)                                             # (T*B, HS)
        scores_col = jnp.sum(e * v, axis=1, keepdims=True)                   # (T*B, 1)
        scores = jnp.concatenate([scores_col[t * B:(t + 1) * B, :]
                                  for t in range(T)], axis=1)                # (B, T)

        m = jnp.max(scores, axis=1, keepdims=True)
        p = jnp.exp(scores - m)
        denom = jnp.sum(p, axis=1, keepdims=True)
        alpha = p * pl.reciprocal(denom, approx=False)                       # (B, T)

        ctx = jnp.zeros((B, HS), jnp.float32)
        for t in range(T):
            ctx = ctx + alpha[:, t:t + 1] * hall_blocks[t]                   # (B, HS)
        pred = jnp.sum(ctx * fcw_ref[...], axis=1, keepdims=True) + fcb_ref[...]   # (B, 1)

        # assemble the lane-padded output slab in registers -> one unmasked full store
        pad_cols = out_cols - (T + 1)
        top = jnp.concatenate([alpha, pred,
                               jnp.zeros((B, pad_cols), jnp.float32)], axis=1)      # (B, 128)
        if out_rows > B:
            slab = jnp.concatenate(
                [top, jnp.zeros((out_rows - B, out_cols), jnp.float32)], axis=0)
        else:
            slab = top
        out_ref[...] = slab

    return kernel


# ----------------------------- wrapper glue -----------------------------
def pack_params(params):
    """Re-layout canonical (PyTorch-style) parameters for the fused kernel."""
    packed_lstm = []
    for layer in params["lstm"]:
        pf, pr = layer
        packed_lstm.append(dict(
            wcat=jnp.concatenate([pf["wih_t"], pr["wih_t"]], axis=1),    # (Din, 8H)
            bcat=jnp.concatenate([pf["b"], pr["b"]], axis=1),            # (1, 8H)
            whhcat=jnp.concatenate([pf["whh_t"], pr["whh_t"]], axis=1),  # (H, 8H)
        ))
    return dict(lstm=packed_lstm, attn=dict(params["attn"]))


def bitalstm_forward(x, packed):
    B, T, din = x.shape
    n_layers = len(packed["lstm"])
    H = packed["lstm"][0]["whhcat"].shape[0]

    out_rows = max(8, ((B + 7) // 8) * 8)
    out_cols = 128
    assert T + 1 <= out_cols, "output slab packs alpha (T lanes) + pred (1 lane)"

    # time-major, flattened input: row t*B + b  <->  (batch b, time t)
    x2d = jnp.transpose(x, (1, 0, 2)).reshape(T * B, din)

    inputs = [x2d]
    for lp in packed["lstm"]:
        inputs += [lp["wcat"], lp["bcat"], lp["whhcat"]]
    a = packed["attn"]
    inputs += [a["wq_t"], a["bq"], a["wk_t"], a["bk"],
               a["v_row"], a["fcw_row"], a["fcb"]]

    slab = pl.pallas_call(
        _make_fused_kernel(T, B, H, n_layers, out_rows, out_cols),
        out_shape=jax.ShapeDtypeStruct((out_rows, out_cols), jnp.float32),
        in_specs=[pl.BlockSpec(memory_space=pltpu.MemorySpace.VMEM)] * len(inputs),
        out_specs=pl.BlockSpec(memory_space=pltpu.MemorySpace.VMEM),
    )(*inputs)
    return slab[:B, T], slab[:B, :T]                 # pred (B,), alpha (B, T)


# ----------------------------- deterministic parameter init -----------------------------
def init_params(key, input_dim, hidden_dim, n_layers):
    hs = 2 * hidden_dim
    keys = iter(jax.random.split(key, 8 * n_layers + 16))

    def u(shape, s):
        return jax.random.uniform(next(keys), shape, jnp.float32, -s, s)

    lstm_scale = 1.0 / (hidden_dim ** 0.5)
    lstm = []
    for l in range(n_layers):
        din = input_dim if l == 0 else hs
        layer = []
        for _d in range(2):                          # forward / reverse direction
            wih = u((4 * hidden_dim, din), lstm_scale)
            whh = u((4 * hidden_dim, hidden_dim), lstm_scale)
            bih = u((4 * hidden_dim,), lstm_scale)
            bhh = u((4 * hidden_dim,), lstm_scale)
            layer.append(dict(wih_t=wih.T, whh_t=whh.T,
                              b=(bih + bhh).reshape(1, 4 * hidden_dim)))
        lstm.append(layer)

    lin_scale = 1.0 / (hs ** 0.5)
    attn = dict(
        wq_t=u((hs, hs), lin_scale).T,
        bq=u((hs,), lin_scale).reshape(1, hs),
        wk_t=u((hs, hs), lin_scale).T,
        bk=u((hs,), lin_scale).reshape(1, hs),
        v_row=u((1, hs), lin_scale),                 # v.weight (1, hs), no bias
        fcw_row=u((1, hs), lin_scale),               # fc.weight (1, hs)
        fcb=u((1,), lin_scale).reshape(1, 1),
    )
    return dict(lstm=lstm, attn=attn)


# ----------------------------- pure-JAX reference (sanity check) -----------------------------
def bitalstm_ref(x, params, hidden_dim):
    Hd = hidden_dim

    def lstm_dir(xi, p):
        B = xi.shape[0]

        def step(carry, x_t):
            h, c = carry
            g = x_t @ p["wih_t"] + h @ p["whh_t"] + p["b"][0]
            i = jax.nn.sigmoid(g[:, :Hd]); f = jax.nn.sigmoid(g[:, Hd:2 * Hd])
            gg = jnp.tanh(g[:, 2 * Hd:3 * Hd]); o = jax.nn.sigmoid(g[:, 3 * Hd:])
            c = f * c + i * gg
            h = o * jnp.tanh(c)
            return (h, c), h

        init = (jnp.zeros((B, Hd), jnp.float32), jnp.zeros((B, Hd), jnp.float32))
        _, hs = jax.lax.scan(step, init, jnp.transpose(xi, (1, 0, 2)))
        return jnp.transpose(hs, (1, 0, 2))

    layer_in = x
    for layer_params in params["lstm"]:
        outs = []
        for d, p in enumerate(layer_params):
            xi = layer_in if d == 0 else layer_in[:, ::-1, :]
            h = lstm_dir(xi, p)
            if d == 1:
                h = h[:, ::-1, :]
            outs.append(h)
        layer_in = jnp.concatenate(outs, axis=-1)
    Hall = layer_in
    a = params["attn"]
    q = Hall[:, -1] @ a["wq_t"] + a["bq"][0]
    k = Hall @ a["wk_t"] + a["bk"][0]
    e = jnp.tanh(k + q[:, None, :])
    scores = jnp.sum(e * a["v_row"], axis=-1)
    alpha = jax.nn.softmax(scores, axis=1)
    ctx = jnp.sum(alpha[:, :, None] * Hall, axis=1)
    pred = ctx @ a["fcw_row"].T + a["fcb"]
    return pred[:, 0], alpha


if __name__ == "__main__":
    INPUT_DIM, HIDDEN_DIM, N_LAYERS, DROPOUT = 8, 32, 2, 0.1   # dropout is identity in eval
    B, T = 4, 8

    key = jax.random.PRNGKey(0)
    kx, kp = jax.random.split(key)
    x = jax.random.normal(kx, (B, T, INPUT_DIM), jnp.float32)
    params = init_params(kp, INPUT_DIM, HIDDEN_DIM, N_LAYERS)
    packed = pack_params(params)

    pred, alpha = jax.jit(bitalstm_forward)(x, packed)
    pred = jax.block_until_ready(pred)
    alpha = jax.block_until_ready(alpha)

    pred_ref, alpha_ref = bitalstm_ref(x, params, HIDDEN_DIM)
    assert pred.shape == (B,) and alpha.shape == (B, T)
    assert jnp.allclose(pred, pred_ref, atol=1e-4, rtol=1e-4)
    assert jnp.allclose(alpha, alpha_ref, atol=1e-4, rtol=1e-4)

    print("KERNEL_OK")
</pallas_src>

<mosaic_0001>
module attributes {stable_mosaic.version = 11 : i64} {
  func.func @kernel(%arg0: memref<32x8xf32, #tpu.memory_space<vmem>>, %arg1: memref<8x256xf32, #tpu.memory_space<vmem>>, %arg2: memref<1x256xf32, #tpu.memory_space<vmem>>, %arg3: memref<32x256xf32, #tpu.memory_space<vmem>>, %arg4: memref<64x256xf32, #tpu.memory_space<vmem>>, %arg5: memref<1x256xf32, #tpu.memory_space<vmem>>, %arg6: memref<32x256xf32, #tpu.memory_space<vmem>>, %arg7: memref<64x64xf32, #tpu.memory_space<vmem>>, %arg8: memref<1x64xf32, #tpu.memory_space<vmem>>, %arg9: memref<64x64xf32, #tpu.memory_space<vmem>>, %arg10: memref<1x64xf32, #tpu.memory_space<vmem>>, %arg11: memref<1x64xf32, #tpu.memory_space<vmem>>, %arg12: memref<1x64xf32, #tpu.memory_space<vmem>>, %arg13: memref<1x1xf32, #tpu.memory_space<vmem>>, %arg14: memref<8x128xf32, #tpu.memory_space<vmem>>) attributes {dimension_semantics = [], scalar_prefetch = 0 : i64, scratch_operands = 0 : i64, tpu.core_type = #tpu.core_type<tc>} {
    %0 = tpu.iota {dimensions = array<i32: 0>} : vector<8x1xi32>
    %c4_i32 = arith.constant 4 : i32
    %1 = vector.broadcast %c4_i32 : i32 to vector<8x1xi32>
    %2 = arith.cmpi slt, %0, %1 : vector<8x1xi32>
    %3 = tpu.iota {dimensions = array<i32: 1>} : vector<1x128xi32>
    %c64_i32 = arith.constant 64 : i32
    %4 = vector.broadcast %c64_i32 : i32 to vector<1x128xi32>
    %5 = arith.cmpi sge, %3, %4 : vector<1x128xi32>
    %c96_i32 = arith.constant 96 : i32
    %6 = vector.broadcast %c96_i32 : i32 to vector<1x128xi32>
    %7 = arith.cmpi slt, %3, %6 : vector<1x128xi32>
    %8 = arith.andi %5, %7 : vector<1x128xi1>
    %c0 = arith.constant 0 : index
    %c0_0 = arith.constant 0 : index
    %9 = vector.load %arg0[%c0, %c0_0] : memref<32x8xf32, #tpu.memory_space<vmem>>, vector<32x8xf32>
    %c0_1 = arith.constant 0 : index
    %c0_2 = arith.constant 0 : index
    %10 = vector.load %arg1[%c0_1, %c0_2] : memref<8x256xf32, #tpu.memory_space<vmem>>, vector<8x256xf32>
    %cst = arith.constant dense<0.000000e+00> : vector<32x256xf32>
    %11 = tpu.matmul %9, %10, %cst {dimension_numbers = #tpu.dot_dimension_numbers<[1], [0], [0], [1], [0, 0, 1, 1], [], []>} : vector<32x8xf32>, vector<8x256xf32>, vector<32x256xf32> -> vector<32x256xf32>
    %c0_3 = arith.constant 0 : index
    %c0_4 = arith.constant 0 : index
    %12 = vector.load %arg2[%c0_3, %c0_4] : memref<1x256xf32, #tpu.memory_space<vmem>>, vector<1x256xf32>
    %13 = vector.broadcast %12 : vector<1x256xf32> to vector<32x256xf32>
    %14 = arith.addf %11, %13 : vector<32x256xf32>
    %c0_5 = arith.constant 0 : index
    %c0_6 = arith.constant 0 : index
    %15 = vector.load %arg3[%c0_5, %c0_6] : memref<32x256xf32, #tpu.memory_space<vmem>>, vector<32x256xf32>
    %cst_7 = arith.constant 0.000000e+00 : f32
    %16 = vector.broadcast %cst_7 : f32 to vector<8x32xf32>
    %cst_8 = arith.constant 0.000000e+00 : f32
    %17 = vector.broadcast %cst_8 : f32 to vector<8x32xf32>
    %18 = vector.extract_strided_slice %14 {offsets = [0, 0], sizes = [4, 128], strides = [1, 1]} : vector<32x256xf32> to vector<4x128xf32>
    %19 = vector.extract_strided_slice %14 {offsets = [28, 128], sizes = [4, 128], strides = [1, 1]} : vector<32x256xf32> to vector<4x128xf32>
    %20 = tpu.concatenate %18, %19 in 0 : vector<4x128xf32>, vector<4x128xf32> -> vector<8x128xf32>
    %cst_9 = arith.constant dense<0.000000e+00> : vector<8x256xf32>
    %21 = tpu.matmul %16, %15, %cst_9 {dimension_numbers = #tpu.dot_dimension_numbers<[1], [0], [0], [1], [0, 0, 1, 1], [], []>} : vector<8x32xf32>, vector<32x256xf32>, vector<8x256xf32> -> vector<8x256xf32>
    %22 = vector.extract_strided_slice %21 {offsets = [0, 0], sizes = [8, 128], strides = [1, 1]} : vector<8x256xf32> to vector<8x128xf32>
    %23 = vector.extract_strided_slice %21 {offsets = [0, 128], sizes = [8, 128], strides = [1, 1]} : vector<8x256xf32> to vector<8x128xf32>
    %24 = vector.shape_cast %2 : vector<8x1xi1> to vector<8x1xi1>
    %25 = vector.broadcast %24 : vector<8x1xi1> to vector<8x128xi1>
    %26 = arith.select %25, %22, %23 : vector<8x128xi1>, vector<8x128xf32>
    %27 = arith.addf %20, %26 : vector<8x128xf32>
    %28 = math.tanh %27 : vector<8x128xf32>
    %29 = arith.negf %27 : vector<8x128xf32>
    %30 = math.exp %29 : vector<8x128xf32>
    %cst_10 = arith.constant 1.000000e+00 : f32
    %31 = vector.broadcast %cst_10 : f32 to vector<8x128xf32>
    %32 = arith.addf %31, %30 : vector<8x128xf32>
    %33 = arith.divf %31, %32 : vector<8x128xf32>
    %34 = vector.shape_cast %8 : vector<1x128xi1> to vector<1x128xi1>
    %35 = vector.broadcast %34 : vector<1x128xi1> to vector<8x128xi1>
    %36 = arith.select %35, %28, %33 : vector<8x128xi1>, vector<8x128xf32>
    %37 = vector.extract_strided_slice %36 {offsets = [0, 0], sizes = [8, 32], strides = [1, 1]} : vector<8x128xf32> to vector<8x32xf32>
    %38 = vector.extract_strided_slice %36 {offsets = [0, 32], sizes = [8, 32], strides = [1, 1]} : vector<8x128xf32> to vector<8x32xf32>
    %39 = vector.extract_strided_slice %36 {offsets = [0, 64], sizes = [8, 32], strides = [1, 1]} : vector<8x128xf32> to vector<8x32xf32>
    %40 = vector.extract_strided_slice %36 {offsets = [0, 96], sizes = [8, 32], strides = [1, 1]} : vector<8x128xf32> to vector<8x32xf32>
    %41 = arith.mulf %38, %17 : vector<8x32xf32>
    %42 = arith.mulf %37, %39 : vector<8x32xf32>
    %43 = arith.addf %41, %42 : vector<8x32xf32>
    %44 = math.tanh %43 : vector<8x32xf32>
    %45 = arith.mulf %40, %44 : vector<8x32xf32>
    %46 = vector.extract_strided_slice %45 {offsets = [0, 0], sizes = [4, 32], strides = [1, 1]} : vector<8x32xf32> to vector<4x32xf32>
    %47 = vector.extract_strided_slice %45 {offsets = [4, 0], sizes = [4, 32], strides = [1, 1]} : vector<8x32xf32> to vector<4x32xf32>
    %48 = vector.extract_strided_slice %14 {offsets = [4, 0], sizes = [4, 128], strides = [1, 1]} : vector<32x256xf32> to vector<4x128xf32>
    %49 = vector.extract_strided_slice %14 {offsets = [24, 128], sizes = [4, 128], strides = [1, 1]} : vector<32x256xf32> to vector<4x128xf32>
    %50 = tpu.concatenate %48, %49 in 0 : vector<4x128xf32>, vector<4x128xf32> -> vector<8x128xf32>
    %cst_11 = arith.constant dense<0.000000e+00> : vector<8x256xf32>
    %51 = tpu.matmul %45, %15, %cst_11 {dimension_numbers = #tpu.dot_dimension_numbers<[1], [0], [0], [1], [0, 0, 1, 1], [], []>} : vector<8x32xf32>, vector<32x256xf32>, vector<8x256xf32> -> vector<8x256xf32>
    %52 = vector.extract_strided_slice %51 {offsets = [0, 0], sizes = [8, 128], strides = [1, 1]} : vector<8x256xf32> to vector<8x128xf32>
    %53 = vector.extract_strided_slice %51 {offsets = [0, 128], sizes = [8, 128], strides = [1, 1]} : vector<8x256xf32> to vector<8x128xf32>
    %54 = vector.shape_cast %2 : vector<8x1xi1> to vector<8x1xi1>
    %55 = vector.broadcast %54 : vector<8x1xi1> to vector<8x128xi1>
    %56 = arith.select %55, %52, %53 : vector<8x128xi1>, vector<8x128xf32>
    %57 = arith.addf %50, %56 : vector<8x128xf32>
    %58 = math.tanh %57 : vector<8x128xf32>
    %59 = arith.negf %57 : vector<8x128xf32>
    %60 = math.exp %59 : vector<8x128xf32>
    %cst_12 = arith.constant 1.000000e+00 : f32
    %61 = vector.broadcast %cst_12 : f32 to vector<8x128xf32>
    %62 = arith.addf %61, %60 : vector<8x128xf32>
    %63 = arith.divf %61, %62 : vector<8x128xf32>
    %64 = vector.shape_cast %8 : vector<1x128xi1> to vector<1x128xi1>
    %65 = vector.broadcast %64 : vector<1x128xi1> to vector<8x128xi1>
    %66 = arith.select %65, %58, %63 : vector<8x128xi1>, vector<8x128xf32>
    %67 = vector.extract_strided_slice %66 {offsets = [0, 0], sizes = [8, 32], strides = [1, 1]} : vector<8x128xf32> to vector<8x32xf32>
    %68 = vector.extract_strided_slice %66 {offsets = [0, 32], sizes = [8, 32], strides = [1, 1]} : vector<8x128xf32> to vector<8x32xf32>
    %69 = vector.extract_strided_slice %66 {offsets = [0, 64], sizes = [8, 32], strides = [1, 1]} : vector<8x128xf32> to vector<8x32xf32>
    %70 = vector.extract_strided_slice %66 {offsets = [0, 96], sizes = [8, 32], strides = [1, 1]} : vector<8x128xf32> to vector<8x32xf32>
    %71 = arith.mulf %68, %43 : vector<8x32xf32>
    %72 = arith.mulf %67, %69 : vector<8x32xf32>
    %73 = arith.addf %71, %72 : vector<8x32xf32>
    %74 = math.tanh %73 : vector<8x32xf32>
    %75 = arith.mulf %70, %74 : vector<8x32xf32>
    %76 = vector.extract_strided_slice %75 {offsets = [0, 0], sizes = [4, 32], strides = [1, 1]} : vector<8x32xf32> to vector<4x32xf32>
    %77 = vector.extract_strided_slice %75 {offsets = [4, 0], sizes = [4, 32], strides = [1, 1]} : vector<8x32xf32> to vector<4x32xf32>
    %78 = vector.extract_strided_slice %14 {offsets = [8, 0], sizes = [4, 128], strides = [1, 1]} : vector<32x256xf32> to vector<4x128xf32>
    %79 = vector.extract_strided_slice %14 {offsets = [20, 128], sizes = [4, 128], strides = [1, 1]} : vector<32x256xf32> to vector<4x128xf32>
    %80 = tpu.concatenate %78, %79 in 0 : vector<4x128xf32>, vector<4x128xf32> -> vector<8x128xf32>
    %cst_13 = arith.constant dense<0.000000e+00> : vector<8x256xf32>
    %81 = tpu.matmul %75, %15, %cst_13 {dimension_numbers = #tpu.dot_dimension_numbers<[1], [0], [0], [1], [0, 0, 1, 1], [], []>} : vector<8x32xf32>, vector<32x256xf32>, vector<8x256xf32> -> vector<8x256xf32>
    %82 = vector.extract_strided_slice %81 {offsets = [0, 0], sizes = [8, 128], strides = [1, 1]} : vector<8x256xf32> to vector<8x128xf32>
    %83 = vector.extract_strided_slice %81 {offsets = [0, 128], sizes = [8, 128], strides = [1, 1]} : vector<8x256xf32> to vector<8x128xf32>
    %84 = vector.shape_cast %2 : vector<8x1xi1> to vector<8x1xi1>
    %85 = vector.broadcast %84 : vector<8x1xi1> to vector<8x128xi1>
    %86 = arith.select %85, %82, %83 : vector<8x128xi1>, vector<8x128xf32>
    %87 = arith.addf %80, %86 : vector<8x128xf32>
    %88 = math.tanh %87 : vector<8x128xf32>
    %89 = arith.negf %87 : vector<8x128xf32>
    %90 = math.exp %89 : vector<8x128xf32>
    %cst_14 = arith.constant 1.000000e+00 : f32
    %91 = vector.broadcast %cst_14 : f32 to vector<8x128xf32>
    %92 = arith.addf %91, %90 : vector<8x128xf32>
    %93 = arith.divf %91, %92 : vector<8x128xf32>
    %94 = vector.shape_cast %8 : vector<1x128xi1> to vector<1x128xi1>
    %95 = vector.broadcast %94 : vector<1x128xi1> to vector<8x128xi1>
    %96 = arith.select %95, %88, %93 : vector<8x128xi1>, vector<8x128xf32>
    %97 = vector.extract_strided_slice %96 {offsets = [0, 0], sizes = [8, 32], strides = [1, 1]} : vector<8x128xf32> to vector<8x32xf32>
    %98 = vector.extract_strided_slice %96 {offsets = [0, 32], sizes = [8, 32], strides = [1, 1]} : vector<8x128xf32> to vector<8x32xf32>
    %99 = vector.extract_strided_slice %96 {offsets = [0, 64], sizes = [8, 32], strides = [1, 1]} : vector<8x128xf32> to vector<8x32xf32>
    %100 = vector.extract_strided_slice %96 {offsets = [0, 96], sizes = [8, 32], strides = [1, 1]} : vector<8x128xf32> to vector<8x32xf32>
    %101 = arith.mulf %98, %73 : vector<8x32xf32>
    %102 = arith.mulf %97, %99 : vector<8x32xf32>
    %103 = arith.addf %101, %102 : vector<8x32xf32>
    %104 = math.tanh %103 : vector<8x32xf32>
    %105 = arith.mulf %100, %104 : vector<8x32xf32>
    %106 = vector.extract_strided_slice %105 {offsets = [0, 0], sizes = [4, 32], strides = [1, 1]} : vector<8x32xf32> to vector<4x32xf32>
    %107 = vector.extract_strided_slice %105 {offsets = [4, 0], sizes = [4, 32], strides = [1, 1]} : vector<8x32xf32> to vector<4x32xf32>
    %108 = vector.extract_strided_slice %14 {offsets = [12, 0], sizes = [4, 128], strides = [1, 1]} : vector<32x256xf32> to vector<4x128xf32>
    %109 = vector.extract_strided_slice %14 {offsets = [16, 128], sizes = [4, 128], strides = [1, 1]} : vector<32x256xf32> to vector<4x128xf32>
    %110 = tpu.concatenate %108, %109 in 0 : vector<4x128xf32>, vector<4x128xf32> -> vector<8x128xf32>
    %cst_15 = arith.constant dense<0.000000e+00> : vector<8x256xf32>
    %111 = tpu.matmul %105, %15, %cst_15 {dimension_numbers = #tpu.dot_dimension_numbers<[1], [0], [0], [1], [0, 0, 1, 1], [], []>} : vector<8x32xf32>, vector<32x256xf32>, vector<8x256xf32> -> vector<8x256xf32>
    %112 = vector.extract_strided_slice %111 {offsets = [0, 0], sizes = [8, 128], strides = [1, 1]} : vector<8x256xf32> to vector<8x128xf32>
    %113 = vector.extract_strided_slice %111 {offsets = [0, 128], sizes = [8, 128], strides = [1, 1]} : vector<8x256xf32> to vector<8x128xf32>
    %114 = vector.shape_cast %2 : vector<8x1xi1> to vector<8x1xi1>
    %115 = vector.broadcast %114 : vector<8x1xi1> to vector<8x128xi1>
    %116 = arith.select %115, %112, %113 : vector<8x128xi1>, vector<8x128xf32>
    %117 = arith.addf %110, %116 : vector<8x128xf32>
    %118 = math.tanh %117 : vector<8x128xf32>
    %119 = arith.negf %117 : vector<8x128xf32>
    %120 = math.exp %119 : vector<8x128xf32>
    %cst_16 = arith.constant 1.000000e+00 : f32
    %121 = vector.broadcast %cst_16 : f32 to vector<8x128xf32>
    %122 = arith.addf %121, %120 : vector<8x128xf32>
    %123 = arith.divf %121, %122 : vector<8x128xf32>
    %124 = vector.shape_cast %8 : vector<1x128xi1> to vector<1x128xi1>
    %125 = vector.broadcast %124 : vector<1x128xi1> to vector<8x128xi1>
    %126 = arith.select %125, %118, %123 : vector<8x128xi1>, vector<8x128xf32>
    %127 = vector.extract_strided_slice %126 {offsets = [0, 0], sizes = [8, 32], strides = [1, 1]} : vector<8x128xf32> to vector<8x32xf32>
    %128 = vector.extract_strided_slice %126 {offsets = [0, 32], sizes = [8, 32], strides = [1, 1]} : vector<8x128xf32> to vector<8x32xf32>
    %129 = vector.extract_strided_slice %126 {offsets = [0, 64], sizes = [8, 32], strides = [1, 1]} : vector<8x128xf32> to vector<8x32xf32>
    %130 = vector.extract_strided_slice %126 {offsets = [0, 96], sizes = [8, 32], strides = [1, 1]} : vector<8x128xf32> to vector<8x32xf32>
    %131 = arith.mulf %128, %103 : vector<8x32xf32>
    %132 = arith.mulf %127, %129 : vector<8x32xf32>
    %133 = arith.addf %131, %132 : vector<8x32xf32>
    %134 = math.tanh %133 : vector<8x32xf32>
    %135 = arith.mulf %130, %134 : vector<8x32xf32>
    %136 = vector.extract_strided_slice %135 {offsets = [0, 0], sizes = [4, 32], strides = [1, 1]} : vector<8x32xf32> to vector<4x32xf32>
    %137 = vector.extract_strided_slice %135 {offsets = [4, 0], sizes = [4, 32], strides = [1, 1]} : vector<8x32xf32> to vector<4x32xf32>
    %138 = vector.extract_strided_slice %14 {offsets = [16, 0], sizes = [4, 128], strides = [1, 1]} : vector<32x256xf32> to vector<4x128xf32>
    %139 = vector.extract_strided_slice %14 {offsets = [12, 128], sizes = [4, 128], strides = [1, 1]} : vector<32x256xf32> to vector<4x128xf32>
    %140 = tpu.concatenate %138, %139 in 0 : vector<4x128xf32>, vector<4x128xf32> -> vector<8x128xf32>
    %cst_17 = arith.constant dense<0.000000e+00> : vector<8x256xf32>
    %141 = tpu.matmul %135, %15, %cst_17 {dimension_numbers = #tpu.dot_dimension_numbers<[1], [0], [0], [1], [0, 0, 1, 1], [], []>} : vector<8x32xf32>, vector<32x256xf32>, vector<8x256xf32> -> vector<8x256xf32>
    %142 = vector.extract_strided_slice %141 {offsets = [0, 0], sizes = [8, 128], strides = [1, 1]} : vector<8x256xf32> to vector<8x128xf32>
    %143 = vector.extract_strided_slice %141 {offsets = [0, 128], sizes = [8, 128], strides = [1, 1]} : vector<8x256xf32> to vector<8x128xf32>
    %144 = vector.shape_cast %2 : vector<8x1xi1> to vector<8x1xi1>
    %145 = vector.broadcast %144 : vector<8x1xi1> to vector<8x128xi1>
    %146 = arith.select %145, %142, %143 : vector<8x128xi1>, vector<8x128xf32>
    %147 = arith.addf %140, %146 : vector<8x128xf32>
    %148 = math.tanh %147 : vector<8x128xf32>
    %149 = arith.negf %147 : vector<8x128xf32>
    %150 = math.exp %149 : vector<8x128xf32>
    %cst_18 = arith.constant 1.000000e+00 : f32
    %151 = vector.broadcast %cst_18 : f32 to vector<8x128xf32>
    %152 = arith.addf %151, %150 : vector<8x128xf32>
    %153 = arith.divf %151, %152 : vector<8x128xf32>
    %154 = vector.shape_cast %8 : vector<1x128xi1> to vector<1x128xi1>
    %155 = vector.broadcast %154 : vector<1x128xi1> to vector<8x128xi1>
    %156 = arith.select %155, %148, %153 : vector<8x128xi1>, vector<8x128xf32>
    %157 = vector.extract_strided_slice %156 {offsets = [0, 0], sizes = [8, 32], strides = [1, 1]} : vector<8x128xf32> to vector<8x32xf32>
    %158 = vector.extract_strided_slice %156 {offsets = [0, 32], sizes = [8, 32], strides = [1, 1]} : vector<8x128xf32> to vector<8x32xf32>
    %159 = vector.extract_strided_slice %156 {offsets = [0, 64], sizes = [8, 32], strides = [1, 1]} : vector<8x128xf32> to vector<8x32xf32>
    %160 = vector.extract_strided_slice %156 {offsets = [0, 96], sizes = [8, 32], strides = [1, 1]} : vector<8x128xf32> to vector<8x32xf32>
    %161 = arith.mulf %158, %133 : vector<8x32xf32>
    %162 = arith.mulf %157, %159 : vector<8x32xf32>
    %163 = arith.addf %161, %162 : vector<8x32xf32>
    %164 = math.tanh %163 : vector<8x32xf32>
    %165 = arith.mulf %160, %164 : vector<8x32xf32>
    %166 = vector.extract_strided_slice %165 {offsets = [0, 0], sizes = [4, 32], strides = [1, 1]} : vector<8x32xf32> to vector<4x32xf32>
    %167 = vector.extract_strided_slice %165 {offsets = [4, 0], sizes = [4, 32], strides = [1, 1]} : vector<8x32xf32> to vector<4x32xf32>
    %168 = vector.extract_strided_slice %14 {offsets = [20, 0], sizes = [4, 128], strides = [1, 1]} : vector<32x256xf32> to vector<4x128xf32>
    %169 = vector.extract_strided_slice %14 {offsets = [8, 128], sizes = [4, 128], strides = [1, 1]} : vector<32x256xf32> to vector<4x128xf32>
    %170 = tpu.concatenate %168, %169 in 0 : vector<4x128xf32>, vector<4x128xf32> -> vector<8x128xf32>
    %cst_19 = arith.constant dense<0.000000e+00> : vector<8x256xf32>
    %171 = tpu.matmul %165, %15, %cst_19 {dimension_numbers = #tpu.dot_dimension_numbers<[1], [0], [0], [1], [0, 0, 1, 1], [], []>} : vector<8x32xf32>, vector<32x256xf32>, vector<8x256xf32> -> vector<8x256xf32>
    %172 = vector.extract_strided_slice %171 {offsets = [0, 0], sizes = [8, 128], strides = [1, 1]} : vector<8x256xf32> to vector<8x128xf32>
    %173 = vector.extract_strided_slice %171 {offsets = [0, 128], sizes = [8, 128], strides = [1, 1]} : vector<8x256xf32> to vector<8x128xf32>
    %174 = vector.shape_cast %2 : vector<8x1xi1> to vector<8x1xi1>
    %175 = vector.broadcast %174 : vector<8x1xi1> to vector<8x128xi1>
    %176 = arith.select %175, %172, %173 : vector<8x128xi1>, vector<8x128xf32>
    %177 = arith.addf %170, %176 : vector<8x128xf32>
    %178 = math.tanh %177 : vector<8x128xf32>
    %179 = arith.negf %177 : vector<8x128xf32>
    %180 = math.exp %179 : vector<8x128xf32>
    %cst_20 = arith.constant 1.000000e+00 : f32
    %181 = vector.broadcast %cst_20 : f32 to vector<8x128xf32>
    %182 = arith.addf %181, %180 : vector<8x128xf32>
    %183 = arith.divf %181, %182 : vector<8x128xf32>
    %184 = vector.shape_cast %8 : vector<1x128xi1> to vector<1x128xi1>
    %185 = vector.broadcast %184 : vector<1x128xi1> to vector<8x128xi1>
    %186 = arith.select %185, %178, %183 : vector<8x128xi1>, vector<8x128xf32>
    %187 = vector.extract_strided_slice %186 {offsets = [0, 0], sizes = [8, 32], strides = [1, 1]} : vector<8x128xf32> to vector<8x32xf32>
    %188 = vector.extract_strided_slice %186 {offsets = [0, 32], sizes = [8, 32], strides = [1, 1]} : vector<8x128xf32> to vector<8x32xf32>
    %189 = vector.extract_strided_slice %186 {offsets = [0, 64], sizes = [8, 32], strides = [1, 1]} : vector<8x128xf32> to vector<8x32xf32>
    %190 = vector.extract_strided_slice %186 {offsets = [0, 96], sizes = [8, 32], strides = [1, 1]} : vector<8x128xf32> to vector<8x32xf32>
    %191 = arith.mulf %188, %163 : vector<8x32xf32>
    %192 = arith.mulf %187, %189 : vector<8x32xf32>
    %193 = arith.addf %191, %192 : vector<8x32xf32>
    %194 = math.tanh %193 : vector<8x32xf32>
    %195 = arith.mulf %190, %194 : vector<8x32xf32>
    %196 = vector.extract_strided_slice %195 {offsets = [0, 0], sizes = [4, 32], strides = [1, 1]} : vector<8x32xf32> to vector<4x32xf32>
    %197 = vector.extract_strided_slice %195 {offsets = [4, 0], sizes = [4, 32], strides = [1, 1]} : vector<8x32xf32> to vector<4x32xf32>
    %198 = vector.extract_strided_slice %14 {offsets = [24, 0], sizes = [4, 128], strides = [1, 1]} : vector<32x256xf32> to vector<4x128xf32>
    %199 = vector.extract_strided_slice %14 {offsets = [4, 128], sizes = [4, 128], strides = [1, 1]} : vector<32x256xf32> to vector<4x128xf32>
    %200 = tpu.concatenate %198, %199 in 0 : vector<4x128xf32>, vector<4x128xf32> -> vector<8x128xf32>
    %cst_21 = arith.constant dense<0.000000e+00> : vector<8x256xf32>
    %201 = tpu.matmul %195, %15, %cst_21 {dimension_numbers = #tpu.dot_dimension_numbers<[1], [0], [0], [1], [0, 0, 1, 1], [], []>} : vector<8x32xf32>, vector<32x256xf32>, vector<8x256xf32> -> vector<8x256xf32>
    %202 = vector.extract_strided_slice %201 {offsets = [0, 0], sizes = [8, 128], strides = [1, 1]} : vector<8x256xf32> to vector<8x128xf32>
    %203 = vector.extract_strided_slice %201 {offsets = [0, 128], sizes = [8, 128], strides = [1, 1]} : vector<8x256xf32> to vector<8x128xf32>
    %204 = vector.shape_cast %2 : vector<8x1xi1> to vector<8x1xi1>
    %205 = vector.broadcast %204 : vector<8x1xi1> to vector<8x128xi1>
    %206 = arith.select %205, %202, %203 : vector<8x128xi1>, vector<8x128xf32>
    %207 = arith.addf %200, %206 : vector<8x128xf32>
    %208 = math.tanh %207 : vector<8x128xf32>
    %209 = arith.negf %207 : vector<8x128xf32>
    %210 = math.exp %209 : vector<8x128xf32>
    %cst_22 = arith.constant 1.000000e+00 : f32
    %211 = vector.broadcast %cst_22 : f32 to vector<8x128xf32>
    %212 = arith.addf %211, %210 : vector<8x128xf32>
    %213 = arith.divf %211, %212 : vector<8x128xf32>
    %214 = vector.shape_cast %8 : vector<1x128xi1> to vector<1x128xi1>
    %215 = vector.broadcast %214 : vector<1x128xi1> to vector<8x128xi1>
    %216 = arith.select %215, %208, %213 : vector<8x128xi1>, vector<8x128xf32>
    %217 = vector.extract_strided_slice %216 {offsets = [0, 0], sizes = [8, 32], strides = [1, 1]} : vector<8x128xf32> to vector<8x32xf32>
    %218 = vector.extract_strided_slice %216 {offsets = [0, 32], sizes = [8, 32], strides = [1, 1]} : vector<8x128xf32> to vector<8x32xf32>
    %219 = vector.extract_strided_slice %216 {offsets = [0, 64], sizes = [8, 32], strides = [1, 1]} : vector<8x128xf32> to vector<8x32xf32>
    %220 = vector.extract_strided_slice %216 {offsets = [0, 96], sizes = [8, 32], strides = [1, 1]} : vector<8x128xf32> to vector<8x32xf32>
    %221 = arith.mulf %218, %193 : vector<8x32xf32>
    %222 = arith.mulf %217, %219 : vector<8x32xf32>
    %223 = arith.addf %221, %222 : vector<8x32xf32>
    %224 = math.tanh %223 : vector<8x32xf32>
    %225 = arith.mulf %220, %224 : vector<8x32xf32>
    %226 = vector.extract_strided_slice %225 {offsets = [0, 0], sizes = [4, 32], strides = [1, 1]} : vector<8x32xf32> to vector<4x32xf32>
    %227 = vector.extract_strided_slice %225 {offsets = [4, 0], sizes = [4, 32], strides = [1, 1]} : vector<8x32xf32> to vector<4x32xf32>
    %228 = vector.extract_strided_slice %14 {offsets = [28, 0], sizes = [4, 128], strides = [1, 1]} : vector<32x256xf32> to vector<4x128xf32>
    %229 = vector.extract_strided_slice %14 {offsets = [0, 128], sizes = [4, 128], strides = [1, 1]} : vector<32x256xf32> to vector<4x128xf32>
    %230 = tpu.concatenate %228, %229 in 0 : vector<4x128xf32>, vector<4x128xf32> -> vector<8x128xf32>
    %cst_23 = arith.constant dense<0.000000e+00> : vector<8x256xf32>
    %231 = tpu.matmul %225, %15, %cst_23 {dimension_numbers = #tpu.dot_dimension_numbers<[1], [0], [0], [1], [0, 0, 1, 1], [], []>} : vector<8x32xf32>, vector<32x256xf32>, vector<8x256xf32> -> vector<8x256xf32>
    %232 = vector.extract_strided_slice %231 {offsets = [0, 0], sizes = [8, 128], strides = [1, 1]} : vector<8x256xf32> to vector<8x128xf32>
    %233 = vector.extract_strided_slice %231 {offsets = [0, 128], sizes = [8, 128], strides = [1, 1]} : vector<8x256xf32> to vector<8x128xf32>
    %234 = vector.shape_cast %2 : vector<8x1xi1> to vector<8x1xi1>
    %235 = vector.broadcast %234 : vector<8x1xi1> to vector<8x128xi1>
    %236 = arith.select %235, %232, %233 : vector<8x128xi1>, vector<8x128xf32>
    %237 = arith.addf %230, %236 : vector<8x128xf32>
    %238 = math.tanh %237 : vector<8x128xf32>
    %239 = arith.negf %237 : vector<8x128xf32>
    %240 = math.exp %239 : vector<8x128xf32>
    %cst_24 = arith.constant 1.000000e+00 : f32
    %241 = vector.broadcast %cst_24 : f32 to vector<8x128xf32>
    %242 = arith.addf %241, %240 : vector<8x128xf32>
    %243 = arith.divf %241, %242 : vector<8x128xf32>
    %244 = vector.shape_cast %8 : vector<1x128xi1> to vector<1x128xi1>
    %245 = vector.broadcast %244 : vector<1x128xi1> to vector<8x128xi1>
    %246 = arith.select %245, %238, %243 : vector<8x128xi1>, vector<8x128xf32>
    %247 = vector.extract_strided_slice %246 {offsets = [0, 0], sizes = [8, 32], strides = [1, 1]} : vector<8x128xf32> to vector<8x32xf32>
    %248 = vector.extract_strided_slice %246 {offsets = [0, 32], sizes = [8, 32], strides = [1, 1]} : vector<8x128xf32> to vector<8x32xf32>
    %249 = vector.extract_strided_slice %246 {offsets = [0, 64], sizes = [8, 32], strides = [1, 1]} : vector<8x128xf32> to vector<8x32xf32>
    %250 = vector.extract_strided_slice %246 {offsets = [0, 96], sizes = [8, 32], strides = [1, 1]} : vector<8x128xf32> to vector<8x32xf32>
    %251 = arith.mulf %248, %223 : vector<8x32xf32>
    %252 = arith.mulf %247, %249 : vector<8x32xf32>
    %253 = arith.addf %251, %252 : vector<8x32xf32>
    %254 = math.tanh %253 : vector<8x32xf32>
    %255 = arith.mulf %250, %254 : vector<8x32xf32>
    %256 = vector.extract_strided_slice %255 {offsets = [0, 0], sizes = [4, 32], strides = [1, 1]} : vector<8x32xf32> to vector<4x32xf32>
    %257 = vector.extract_strided_slice %255 {offsets = [4, 0], sizes = [4, 32], strides = [1, 1]} : vector<8x32xf32> to vector<4x32xf32>
    %258 = tpu.concatenate %46, %257 in 1 : vector<4x32xf32>, vector<4x32xf32> -> vector<4x64xf32>
    %259 = tpu.concatenate %76, %227 in 1 : vector<4x32xf32>, vector<4x32xf32> -> vector<4x64xf32>
    %260 = tpu.concatenate %106, %197 in 1 : vector<4x32xf32>, vector<4x32xf32> -> vector<4x64xf32>
    %261 = tpu.concatenate %136, %167 in 1 : vector<4x32xf32>, vector<4x32xf32> -> vector<4x64xf32>
    %262 = tpu.concatenate %166, %137 in 1 : vector<4x32xf32>, vector<4x32xf32> -> vector<4x64xf32>
    %263 = tpu.concatenate %196, %107 in 1 : vector<4x32xf32>, vector<4x32xf32> -> vector<4x64xf32>
    %264 = tpu.concatenate %226, %77 in 1 : vector<4x32xf32>, vector<4x32xf32> -> vector<4x64xf32>
    %265 = tpu.concatenate %256, %47 in 1 : vector<4x32xf32>, vector<4x32xf32> -> vector<4x64xf32>
    %266 = tpu.concatenate %258, %259, %260, %261, %262, %263, %264, %265 in 0 : vector<4x64xf32>, vector<4x64xf32>, vector<4x64xf32>, vector<4x64xf32>, vector<4x64xf32>, vector<4x64xf32>, vector<4x64xf32>, vector<4x64xf32> -> vector<32x64xf32>
    %c0_25 = arith.constant 0 : index
    %c0_26 = arith.constant 0 : index
    %267 = vector.load %arg4[%c0_25, %c0_26] : memref<64x256xf32, #tpu.memory_space<vmem>>, vector<64x256xf32>
    %cst_27 = arith.constant dense<0.000000e+00> : vector<32x256xf32>
    %268 = tpu.matmul %266, %267, %cst_27 {dimension_numbers = #tpu.dot_dimension_numbers<[1], [0], [0], [1], [0, 0, 1, 1], [], []>} : vector<32x64xf32>, vector<64x256xf32>, vector<32x256xf32> -> vector<32x256xf32>
    %c0_28 = arith.constant 0 : index
    %c0_29 = arith.constant 0 : index
    %269 = vector.load %arg5[%c0_28, %c0_29] : memref<1x256xf32, #tpu.memory_space<vmem>>, vector<1x256xf32>
    %270 = vector.broadcast %269 : vector<1x256xf32> to vector<32x256xf32>
    %271 = arith.addf %268, %270 : vector<32x256xf32>
    %c0_30 = arith.constant 0 : index
    %c0_31 = arith.constant 0 : index
    %272 = vector.load %arg6[%c0_30, %c0_31] : memref<32x256xf32, #tpu.memory_space<vmem>>, vector<32x256xf32>
    %cst_32 = arith.constant 0.000000e+00 : f32
    %273 = vector.broadcast %cst_32 : f32 to vector<8x32xf32>
    %cst_33 = arith.constant 0.000000e+00 : f32
    %274 = vector.broadcast %cst_33 : f32 to vector<8x32xf32>
    %275 = vector.extract_strided_slice %271 {offsets = [0, 0], sizes = [4, 128], strides = [1, 1]} : vector<32x256xf32> to vector<4x128xf32>
    %276 = vector.extract_strided_slice %271 {offsets = [28, 128], sizes = [4, 128], strides = [1, 1]} : vector<32x256xf32> to vector<4x128xf32>
    %277 = tpu.concatenate %275, %276 in 0 : vector<4x128xf32>, vector<4x128xf32> -> vector<8x128xf32>
    %cst_34 = arith.constant dense<0.000000e+00> : vector<8x256xf32>
    %278 = tpu.matmul %273, %272, %cst_34 {dimension_numbers = #tpu.dot_dimension_numbers<[1], [0], [0], [1], [0, 0, 1, 1], [], []>} : vector<8x32xf32>, vector<32x256xf32>, vector<8x256xf32> -> vector<8x256xf32>
    %279 = vector.extract_strided_slice %278 {offsets = [0, 0], sizes = [8, 128], strides = [1, 1]} : vector<8x256xf32> to vector<8x128xf32>
    %280 = vector.extract_strided_slice %278 {offsets = [0, 128], sizes = [8, 128], strides = [1, 1]} : vector<8x256xf32> to vector<8x128xf32>
    %281 = vector.shape_cast %2 : vector<8x1xi1> to vector<8x1xi1>
    %282 = vector.broadcast %281 : vector<8x1xi1> to vector<8x128xi1>
    %283 = arith.select %282, %279, %280 : vector<8x128xi1>, vector<8x128xf32>
    %284 = arith.addf %277, %283 : vector<8x128xf32>
    %285 = math.tanh %284 : vector<8x128xf32>
    %286 = arith.negf %284 : vector<8x128xf32>
    %287 = math.exp %286 : vector<8x128xf32>
    %cst_35 = arith.constant 1.000000e+00 : f32
    %288 = vector.broadcast %cst_35 : f32 to vector<8x128xf32>
    %289 = arith.addf %288, %287 : vector<8x128xf32>
    %290 = arith.divf %288, %289 : vector<8x128xf32>
    %291 = vector.shape_cast %8 : vector<1x128xi1> to vector<1x128xi1>
    %292 = vector.broadcast %291 : vector<1x128xi1> to vector<8x128xi1>
    %293 = arith.select %292, %285, %290 : vector<8x128xi1>, vector<8x128xf32>
    %294 = vector.extract_strided_slice %293 {offsets = [0, 0], sizes = [8, 32], strides = [1, 1]} : vector<8x128xf32> to vector<8x32xf32>
    %295 = vector.extract_strided_slice %293 {offsets = [0, 32], sizes = [8, 32], strides = [1, 1]} : vector<8x128xf32> to vector<8x32xf32>
    %296 = vector.extract_strided_slice %293 {offsets = [0, 64], sizes = [8, 32], strides = [1, 1]} : vector<8x128xf32> to vector<8x32xf32>
    %297 = vector.extract_strided_slice %293 {offsets = [0, 96], sizes = [8, 32], strides = [1, 1]} : vector<8x128xf32> to vector<8x32xf32>
    %298 = arith.mulf %295, %274 : vector<8x32xf32>
    %299 = arith.mulf %294, %296 : vector<8x32xf32>
    %300 = arith.addf %298, %299 : vector<8x32xf32>
    %301 = math.tanh %300 : vector<8x32xf32>
    %302 = arith.mulf %297, %301 : vector<8x32xf32>
    %303 = vector.extract_strided_slice %302 {offsets = [0, 0], sizes = [4, 32], strides = [1, 1]} : vector<8x32xf32> to vector<4x32xf32>
    %304 = vector.extract_strided_slice %302 {offsets = [4, 0], sizes = [4, 32], strides = [1, 1]} : vector<8x32xf32> to vector<4x32xf32>
    %305 = vector.extract_strided_slice %271 {offsets = [4, 0], sizes = [4, 128], strides = [1, 1]} : vector<32x256xf32> to vector<4x128xf32>
    %306 = vector.extract_strided_slice %271 {offsets = [24, 128], sizes = [4, 128], strides = [1, 1]} : vector<32x256xf32> to vector<4x128xf32>
    %307 = tpu.concatenate %305, %306 in 0 : vector<4x128xf32>, vector<4x128xf32> -> vector<8x128xf32>
    %cst_36 = arith.constant dense<0.000000e+00> : vector<8x256xf32>
    %308 = tpu.matmul %302, %272, %cst_36 {dimension_numbers = #tpu.dot_dimension_numbers<[1], [0], [0], [1], [0, 0, 1, 1], [], []>} : vector<8x32xf32>, vector<32x256xf32>, vector<8x256xf32> -> vector<8x256xf32>
    %309 = vector.extract_strided_slice %308 {offsets = [0, 0], sizes = [8, 128], strides = [1, 1]} : vector<8x256xf32> to vector<8x128xf32>
    %310 = vector.extract_strided_slice %308 {offsets = [0, 128], sizes = [8, 128], strides = [1, 1]} : vector<8x256xf32> to vector<8x128xf32>
    %311 = vector.shape_cast %2 : vector<8x1xi1> to vector<8x1xi1>
    %312 = vector.broadcast %311 : vector<8x1xi1> to vector<8x128xi1>
    %313 = arith.select %312, %309, %310 : vector<8x128xi1>, vector<8x128xf32>
    %314 = arith.addf %307, %313 : vector<8x128xf32>
    %315 = math.tanh %314 : vector<8x128xf32>
    %316 = arith.negf %314 : vector<8x128xf32>
    %317 = math.exp %316 : vector<8x128xf32>
    %cst_37 = arith.constant 1.000000e+00 : f32
    %318 = vector.broadcast %cst_37 : f32 to vector<8x128xf32>
    %319 = arith.addf %318, %317 : vector<8x128xf32>
    %320 = arith.divf %318, %319 : vector<8x128xf32>
    %321 = vector.shape_cast %8 : vector<1x128xi1> to vector<1x128xi1>
    %322 = vector.broadcast %321 : vector<1x128xi1> to vector<8x128xi1>
    %323 = arith.select %322, %315, %320 : vector<8x128xi1>, vector<8x128xf32>
    %324 = vector.extract_strided_slice %323 {offsets = [0, 0], sizes = [8, 32], strides = [1, 1]} : vector<8x128xf32> to vector<8x32xf32>
    %325 = vector.extract_strided_slice %323 {offsets = [0, 32], sizes = [8, 32], strides = [1, 1]} : vector<8x128xf32> to vector<8x32xf32>
    %326 = vector.extract_strided_slice %323 {offsets = [0, 64], sizes = [8, 32], strides = [1, 1]} : vector<8x128xf32> to vector<8x32xf32>
    %327 = vector.extract_strided_slice %323 {offsets = [0, 96], sizes = [8, 32], strides = [1, 1]} : vector<8x128xf32> to vector<8x32xf32>
    %328 = arith.mulf %325, %300 : vector<8x32xf32>
    %329 = arith.mulf %324, %326 : vector<8x32xf32>
    %330 = arith.addf %328, %329 : vector<8x32xf32>
    %331 = math.tanh %330 : vector<8x32xf32>
    %332 = arith.mulf %327, %331 : vector<8x32xf32>
    %333 = vector.extract_strided_slice %332 {offsets = [0, 0], sizes = [4, 32], strides = [1, 1]} : vector<8x32xf32> to vector<4x32xf32>
    %334 = vector.extract_strided_slice %332 {offsets = [4, 0], sizes = [4, 32], strides = [1, 1]} : vector<8x32xf32> to vector<4x32xf32>
    %335 = vector.extract_strided_slice %271 {offsets = [8, 0], sizes = [4, 128], strides = [1, 1]} : vector<32x256xf32> to vector<4x128xf32>
    %336 = vector.extract_strided_slice %271 {offsets = [20, 128], sizes = [4, 128], strides = [1, 1]} : vector<32x256xf32> to vector<4x128xf32>
    %337 = tpu.concatenate %335, %336 in 0 : vector<4x128xf32>, vector<4x128xf32> -> vector<8x128xf32>
    %cst_38 = arith.constant dense<0.000000e+00> : vector<8x256xf32>
    %338 = tpu.matmul %332, %272, %cst_38 {dimension_numbers = #tpu.dot_dimension_numbers<[1], [0], [0], [1], [0, 0, 1, 1], [], []>} : vector<8x32xf32>, vector<32x256xf32>, vector<8x256xf32> -> vector<8x256xf32>
    %339 = vector.extract_strided_slice %338 {offsets = [0, 0], sizes = [8, 128], strides = [1, 1]} : vector<8x256xf32> to vector<8x128xf32>
    %340 = vector.extract_strided_slice %338 {offsets = [0, 128], sizes = [8, 128], strides = [1, 1]} : vector<8x256xf32> to vector<8x128xf32>
    %341 = vector.shape_cast %2 : vector<8x1xi1> to vector<8x1xi1>
    %342 = vector.broadcast %341 : vector<8x1xi1> to vector<8x128xi1>
    %343 = arith.select %342, %339, %340 : vector<8x128xi1>, vector<8x128xf32>
    %344 = arith.addf %337, %343 : vector<8x128xf32>
    %345 = math.tanh %344 : vector<8x128xf32>
    %346 = arith.negf %344 : vector<8x128xf32>
    %347 = math.exp %346 : vector<8x128xf32>
    %cst_39 = arith.constant 1.000000e+00 : f32
    %348 = vector.broadcast %cst_39 : f32 to vector<8x128xf32>
    %349 = arith.addf %348, %347 : vector<8x128xf32>
    %350 = arith.divf %348, %349 : vector<8x128xf32>
    %351 = vector.shape_cast %8 : vector<1x128xi1> to vector<1x128xi1>
    %352 = vector.broadcast %351 : vector<1x128xi1> to vector<8x128xi1>
    %353 = arith.select %352, %345, %350 : vector<8x128xi1>, vector<8x128xf32>
    %354 = vector.extract_strided_slice %353 {offsets = [0, 0], sizes = [8, 32], strides = [1, 1]} : vector<8x128xf32> to vector<8x32xf32>
    %355 = vector.extract_strided_slice %353 {offsets = [0, 32], sizes = [8, 32], strides = [1, 1]} : vector<8x128xf32> to vector<8x32xf32>
    %356 = vector.extract_strided_slice %353 {offsets = [0, 64], sizes = [8, 32], strides = [1, 1]} : vector<8x128xf32> to vector<8x32xf32>
    %357 = vector.extract_strided_slice %353 {offsets = [0, 96], sizes = [8, 32], strides = [1, 1]} : vector<8x128xf32> to vector<8x32xf32>
    %358 = arith.mulf %355, %330 : vector<8x32xf32>
    %359 = arith.mulf %354, %356 : vector<8x32xf32>
    %360 = arith.addf %358, %359 : vector<8x32xf32>
    %361 = math.tanh %360 : vector<8x32xf32>
    %362 = arith.mulf %357, %361 : vector<8x32xf32>
    %363 = vector.extract_strided_slice %362 {offsets = [0, 0], sizes = [4, 32], strides = [1, 1]} : vector<8x32xf32> to vector<4x32xf32>
    %364 = vector.extract_strided_slice %362 {offsets = [4, 0], sizes = [4, 32], strides = [1, 1]} : vector<8x32xf32> to vector<4x32xf32>
    %365 = vector.extract_strided_slice %271 {offsets = [12, 0], sizes = [4, 128], strides = [1, 1]} : vector<32x256xf32> to vector<4x128xf32>
    %366 = vector.extract_strided_slice %271 {offsets = [16, 128], sizes = [4, 128], strides = [1, 1]} : vector<32x256xf32> to vector<4x128xf32>
    %367 = tpu.concatenate %365, %366 in 0 : vector<4x128xf32>, vector<4x128xf32> -> vector<8x128xf32>
    %cst_40 = arith.constant dense<0.000000e+00> : vector<8x256xf32>
    %368 = tpu.matmul %362, %272, %cst_40 {dimension_numbers = #tpu.dot_dimension_numbers<[1], [0], [0], [1], [0, 0, 1, 1], [], []>} : vector<8x32xf32>, vector<32x256xf32>, vector<8x256xf32> -> vector<8x256xf32>
    %369 = vector.extract_strided_slice %368 {offsets = [0, 0], sizes = [8, 128], strides = [1, 1]} : vector<8x256xf32> to vector<8x128xf32>
    %370 = vector.extract_strided_slice %368 {offsets = [0, 128], sizes = [8, 128], strides = [1, 1]} : vector<8x256xf32> to vector<8x128xf32>
    %371 = vector.shape_cast %2 : vector<8x1xi1> to vector<8x1xi1>
    %372 = vector.broadcast %371 : vector<8x1xi1> to vector<8x128xi1>
    %373 = arith.select %372, %369, %370 : vector<8x128xi1>, vector<8x128xf32>
    %374 = arith.addf %367, %373 : vector<8x128xf32>
    %375 = math.tanh %374 : vector<8x128xf32>
    %376 = arith.negf %374 : vector<8x128xf32>
    %377 = math.exp %376 : vector<8x128xf32>
    %cst_41 = arith.constant 1.000000e+00 : f32
    %378 = vector.broadcast %cst_41 : f32 to vector<8x128xf32>
    %379 = arith.addf %378, %377 : vector<8x128xf32>
    %380 = arith.divf %378, %379 : vector<8x128xf32>
    %381 = vector.shape_cast %8 : vector<1x128xi1> to vector<1x128xi1>
    %382 = vector.broadcast %381 : vector<1x128xi1> to vector<8x128xi1>
    %383 = arith.select %382, %375, %380 : vector<8x128xi1>, vector<8x128xf32>
    %384 = vector.extract_strided_slice %383 {offsets = [0, 0], sizes = [8, 32], strides = [1, 1]} : vector<8x128xf32> to vector<8x32xf32>
    %385 = vector.extract_strided_slice %383 {offsets = [0, 32], sizes = [8, 32], strides = [1, 1]} : vector<8x128xf32> to vector<8x32xf32>
    %386 = vector.extract_strided_slice %383 {offsets = [0, 64], sizes = [8, 32], strides = [1, 1]} : vector<8x128xf32> to vector<8x32xf32>
    %387 = vector.extract_strided_slice %383 {offsets = [0, 96], sizes = [8, 32], strides = [1, 1]} : vector<8x128xf32> to vector<8x32xf32>
    %388 = arith.mulf %385, %360 : vector<8x32xf32>
    %389 = arith.mulf %384, %386 : vector<8x32xf32>
    %390 = arith.addf %388, %389 : vector<8x32xf32>
    %391 = math.tanh %390 : vector<8x32xf32>
    %392 = arith.mulf %387, %391 : vector<8x32xf32>
    %393 = vector.extract_strided_slice %392 {offsets = [0, 0], sizes = [4, 32], strides = [1, 1]} : vector<8x32xf32> to vector<4x32xf32>
    %394 = vector.extract_strided_slice %392 {offsets = [4, 0], sizes = [4, 32], strides = [1, 1]} : vector<8x32xf32> to vector<4x32xf32>
    %395 = vector.extract_strided_slice %271 {offsets = [16, 0], sizes = [4, 128], strides = [1, 1]} : vector<32x256xf32> to vector<4x128xf32>
    %396 = vector.extract_strided_slice %271 {offsets = [12, 128], sizes = [4, 128], strides = [1, 1]} : vector<32x256xf32> to vector<4x128xf32>
    %397 = tpu.concatenate %395, %396 in 0 : vector<4x128xf32>, vector<4x128xf32> -> vector<8x128xf32>
    %cst_42 = arith.constant dense<0.000000e+00> : vector<8x256xf32>
    %398 = tpu.matmul %392, %272, %cst_42 {dimension_numbers = #tpu.dot_dimension_numbers<[1], [0], [0], [1], [0, 0, 1, 1], [], []>} : vector<8x32xf32>, vector<32x256xf32>, vector<8x256xf32> -> vector<8x256xf32>
    %399 = vector.extract_strided_slice %398 {offsets = [0, 0], sizes = [8, 128], strides = [1, 1]} : vector<8x256xf32> to vector<8x128xf32>
    %400 = vector.extract_strided_slice %398 {offsets = [0, 128], sizes = [8, 128], strides = [1, 1]} : vector<8x256xf32> to vector<8x128xf32>
    %401 = vector.shape_cast %2 : vector<8x1xi1> to vector<8x1xi1>
    %402 = vector.broadcast %401 : vector<8x1xi1> to vector<8x128xi1>
    %403 = arith.select %402, %399, %400 : vector<8x128xi1>, vector<8x128xf32>
    %404 = arith.addf %397, %403 : vector<8x128xf32>
    %405 = math.tanh %404 : vector<8x128xf32>
    %406 = arith.negf %404 : vector<8x128xf32>
    %407 = math.exp %406 : vector<8x128xf32>
    %cst_43 = arith.constant 1.000000e+00 : f32
    %408 = vector.broadcast %cst_43 : f32 to vector<8x128xf32>
    %409 = arith.addf %408, %407 : vector<8x128xf32>
    %410 = arith.divf %408, %409 : vector<8x128xf32>
    %411 = vector.shape_cast %8 : vector<1x128xi1> to vector<1x128xi1>
    %412 = vector.broadcast %411 : vector<1x128xi1> to vector<8x128xi1>
    %413 = arith.select %412, %405, %410 : vector<8x128xi1>, vector<8x128xf32>
    %414 = vector.extract_strided_slice %413 {offsets = [0, 0], sizes = [8, 32], strides = [1, 1]} : vector<8x128xf32> to vector<8x32xf32>
    %415 = vector.extract_strided_slice %413 {offsets = [0, 32], sizes = [8, 32], strides = [1, 1]} : vector<8x128xf32> to vector<8x32xf32>
    %416 = vector.extract_strided_slice %413 {offsets = [0, 64], sizes = [8, 32], strides = [1, 1]} : vector<8x128xf32> to vector<8x32xf32>
    %417 = vector.extract_strided_slice %413 {offsets = [0, 96], sizes = [8, 32], strides = [1, 1]} : vector<8x128xf32> to vector<8x32xf32>
    %418 = arith.mulf %415, %390 : vector<8x32xf32>
    %419 = arith.mulf %414, %416 : vector<8x32xf32>
    %420 = arith.addf %418, %419 : vector<8x32xf32>
    %421 = math.tanh %420 : vector<8x32xf32>
    %422 = arith.mulf %417, %421 : vector<8x32xf32>
    %423 = vector.extract_strided_slice %422 {offsets = [0, 0], sizes = [4, 32], strides = [1, 1]} : vector<8x32xf32> to vector<4x32xf32>
    %424 = vector.extract_strided_slice %422 {offsets = [4, 0], sizes = [4, 32], strides = [1, 1]} : vector<8x32xf32> to vector<4x32xf32>
    %425 = vector.extract_strided_slice %271 {offsets = [20, 0], sizes = [4, 128], strides = [1, 1]} : vector<32x256xf32> to vector<4x128xf32>
    %426 = vector.extract_strided_slice %271 {offsets = [8, 128], sizes = [4, 128], strides = [1, 1]} : vector<32x256xf32> to vector<4x128xf32>
    %427 = tpu.concatenate %425, %426 in 0 : vector<4x128xf32>, vector<4x128xf32> -> vector<8x128xf32>
    %cst_44 = arith.constant dense<0.000000e+00> : vector<8x256xf32>
    %428 = tpu.matmul %422, %272, %cst_44 {dimension_numbers = #tpu.dot_dimension_numbers<[1], [0], [0], [1], [0, 0, 1, 1], [], []>} : vector<8x32xf32>, vector<32x256xf32>, vector<8x256xf32> -> vector<8x256xf32>
    %429 = vector.extract_strided_slice %428 {offsets = [0, 0], sizes = [8, 128], strides = [1, 1]} : vector<8x256xf32> to vector<8x128xf32>
    %430 = vector.extract_strided_slice %428 {offsets = [0, 128], sizes = [8, 128], strides = [1, 1]} : vector<8x256xf32> to vector<8x128xf32>
    %431 = vector.shape_cast %2 : vector<8x1xi1> to vector<8x1xi1>
    %432 = vector.broadcast %431 : vector<8x1xi1> to vector<8x128xi1>
    %433 = arith.select %432, %429, %430 : vector<8x128xi1>, vector<8x128xf32>
    %434 = arith.addf %427, %433 : vector<8x128xf32>
    %435 = math.tanh %434 : vector<8x128xf32>
    %436 = arith.negf %434 : vector<8x128xf32>
    %437 = math.exp %436 : vector<8x128xf32>
    %cst_45 = arith.constant 1.000000e+00 : f32
    %438 = vector.broadcast %cst_45 : f32 to vector<8x128xf32>
    %439 = arith.addf %438, %437 : vector<8x128xf32>
    %440 = arith.divf %438, %439 : vector<8x128xf32>
    %441 = vector.shape_cast %8 : vector<1x128xi1> to vector<1x128xi1>
    %442 = vector.broadcast %441 : vector<1x128xi1> to vector<8x128xi1>
    %443 = arith.select %442, %435, %440 : vector<8x128xi1>, vector<8x128xf32>
    %444 = vector.extract_strided_slice %443 {offsets = [0, 0], sizes = [8, 32], strides = [1, 1]} : vector<8x128xf32> to vector<8x32xf32>
    %445 = vector.extract_strided_slice %443 {offsets = [0, 32], sizes = [8, 32], strides = [1, 1]} : vector<8x128xf32> to vector<8x32xf32>
    %446 = vector.extract_strided_slice %443 {offsets = [0, 64], sizes = [8, 32], strides = [1, 1]} : vector<8x128xf32> to vector<8x32xf32>
    %447 = vector.extract_strided_slice %443 {offsets = [0, 96], sizes = [8, 32], strides = [1, 1]} : vector<8x128xf32> to vector<8x32xf32>
    %448 = arith.mulf %445, %420 : vector<8x32xf32>
    %449 = arith.mulf %444, %446 : vector<8x32xf32>
    %450 = arith.addf %448, %449 : vector<8x32xf32>
    %451 = math.tanh %450 : vector<8x32xf32>
    %452 = arith.mulf %447, %451 : vector<8x32xf32>
    %453 = vector.extract_strided_slice %452 {offsets = [0, 0], sizes = [4, 32], strides = [1, 1]} : vector<8x32xf32> to vector<4x32xf32>
    %454 = vector.extract_strided_slice %452 {offsets = [4, 0], sizes = [4, 32], strides = [1, 1]} : vector<8x32xf32> to vector<4x32xf32>
    %455 = vector.extract_strided_slice %271 {offsets = [24, 0], sizes = [4, 128], strides = [1, 1]} : vector<32x256xf32> to vector<4x128xf32>
    %456 = vector.extract_strided_slice %271 {offsets = [4, 128], sizes = [4, 128], strides = [1, 1]} : vector<32x256xf32> to vector<4x128xf32>
    %457 = tpu.concatenate %455, %456 in 0 : vector<4x128xf32>, vector<4x128xf32> -> vector<8x128xf32>
    %cst_46 = arith.constant dense<0.000000e+00> : vector<8x256xf32>
    %458 = tpu.matmul %452, %272, %cst_46 {dimension_numbers = #tpu.dot_dimension_numbers<[1], [0], [0], [1], [0, 0, 1, 1], [], []>} : vector<8x32xf32>, vector<32x256xf32>, vector<8x256xf32> -> vector<8x256xf32>
    %459 = vector.extract_strided_slice %458 {offsets = [0, 0], sizes = [8, 128], strides = [1, 1]} : vector<8x256xf32> to vector<8x128xf32>
    %460 = vector.extract_strided_slice %458 {offsets = [0, 128], sizes = [8, 128], strides = [1, 1]} : vector<8x256xf32> to vector<8x128xf32>
    %461 = vector.shape_cast %2 : vector<8x1xi1> to vector<8x1xi1>
    %462 = vector.broadcast %461 : vector<8x1xi1> to vector<8x128xi1>
    %463 = arith.select %462, %459, %460 : vector<8x128xi1>, vector<8x128xf32>
    %464 = arith.addf %457, %463 : vector<8x128xf32>
    %465 = math.tanh %464 : vector<8x128xf32>
    %466 = arith.negf %464 : vector<8x128xf32>
    %467 = math.exp %466 : vector<8x128xf32>
    %cst_47 = arith.constant 1.000000e+00 : f32
    %468 = vector.broadcast %cst_47 : f32 to vector<8x128xf32>
    %469 = arith.addf %468, %467 : vector<8x128xf32>
    %470 = arith.divf %468, %469 : vector<8x128xf32>
    %471 = vector.shape_cast %8 : vector<1x128xi1> to vector<1x128xi1>
    %472 = vector.broadcast %471 : vector<1x128xi1> to vector<8x128xi1>
    %473 = arith.select %472, %465, %470 : vector<8x128xi1>, vector<8x128xf32>
    %474 = vector.extract_strided_slice %473 {offsets = [0, 0], sizes = [8, 32], strides = [1, 1]} : vector<8x128xf32> to vector<8x32xf32>
    %475 = vector.extract_strided_slice %473 {offsets = [0, 32], sizes = [8, 32], strides = [1, 1]} : vector<8x128xf32> to vector<8x32xf32>
    %476 = vector.extract_strided_slice %473 {offsets = [0, 64], sizes = [8, 32], strides = [1, 1]} : vector<8x128xf32> to vector<8x32xf32>
    %477 = vector.extract_strided_slice %473 {offsets = [0, 96], sizes = [8, 32], strides = [1, 1]} : vector<8x128xf32> to vector<8x32xf32>
    %478 = arith.mulf %475, %450 : vector<8x32xf32>
    %479 = arith.mulf %474, %476 : vector<8x32xf32>
    %480 = arith.addf %478, %479 : vector<8x32xf32>
    %481 = math.tanh %480 : vector<8x32xf32>
    %482 = arith.mulf %477, %481 : vector<8x32xf32>
    %483 = vector.extract_strided_slice %482 {offsets = [0, 0], sizes = [4, 32], strides = [1, 1]} : vector<8x32xf32> to vector<4x32xf32>
    %484 = vector.extract_strided_slice %482 {offsets = [4, 0], sizes = [4, 32], strides = [1, 1]} : vector<8x32xf32> to vector<4x32xf32>
    %485 = vector.extract_strided_slice %271 {offsets = [28, 0], sizes = [4, 128], strides = [1, 1]} : vector<32x256xf32> to vector<4x128xf32>
    %486 = vector.extract_strided_slice %271 {offsets = [0, 128], sizes = [4, 128], strides = [1, 1]} : vector<32x256xf32> to vector<4x128xf32>
    %487 = tpu.concatenate %485, %486 in 0 : vector<4x128xf32>, vector<4x128xf32> -> vector<8x128xf32>
    %cst_48 = arith.constant dense<0.000000e+00> : vector<8x256xf32>
    %488 = tpu.matmul %482, %272, %cst_48 {dimension_numbers = #tpu.dot_dimension_numbers<[1], [0], [0], [1], [0, 0, 1, 1], [], []>} : vector<8x32xf32>, vector<32x256xf32>, vector<8x256xf32> -> vector<8x256xf32>
    %489 = vector.extract_strided_slice %488 {offsets = [0, 0], sizes = [8, 128], strides = [1, 1]} : vector<8x256xf32> to vector<8x128xf32>
    %490 = vector.extract_strided_slice %488 {offsets = [0, 128], sizes = [8, 128], strides = [1, 1]} : vector<8x256xf32> to vector<8x128xf32>
    %491 = vector.shape_cast %2 : vector<8x1xi1> to vector<8x1xi1>
    %492 = vector.broadcast %491 : vector<8x1xi1> to vector<8x128xi1>
    %493 = arith.select %492, %489, %490 : vector<8x128xi1>, vector<8x128xf32>
    %494 = arith.addf %487, %493 : vector<8x128xf32>
    %495 = math.tanh %494 : vector<8x128xf32>
    %496 = arith.negf %494 : vector<8x128xf32>
    %497 = math.exp %496 : vector<8x128xf32>
    %cst_49 = arith.constant 1.000000e+00 : f32
    %498 = vector.broadcast %cst_49 : f32 to vector<8x128xf32>
    %499 = arith.addf %498, %497 : vector<8x128xf32>
    %500 = arith.divf %498, %499 : vector<8x128xf32>
    %501 = vector.shape_cast %8 : vector<1x128xi1> to vector<1x128xi1>
    %502 = vector.broadcast %501 : vector<1x128xi1> to vector<8x128xi1>
    %503 = arith.select %502, %495, %500 : vector<8x128xi1>, vector<8x128xf32>
    %504 = vector.extract_strided_slice %503 {offsets = [0, 0], sizes = [8, 32], strides = [1, 1]} : vector<8x128xf32> to vector<8x32xf32>
    %505 = vector.extract_strided_slice %503 {offsets = [0, 32], sizes = [8, 32], strides = [1, 1]} : vector<8x128xf32> to vector<8x32xf32>
    %506 = vector.extract_strided_slice %503 {offsets = [0, 64], sizes = [8, 32], strides = [1, 1]} : vector<8x128xf32> to vector<8x32xf32>
    %507 = vector.extract_strided_slice %503 {offsets = [0, 96], sizes = [8, 32], strides = [1, 1]} : vector<8x128xf32> to vector<8x32xf32>
    %508 = arith.mulf %505, %480 : vector<8x32xf32>
    %509 = arith.mulf %504, %506 : vector<8x32xf32>
    %510 = arith.addf %508, %509 : vector<8x32xf32>
    %511 = math.tanh %510 : vector<8x32xf32>
    %512 = arith.mulf %507, %511 : vector<8x32xf32>
    %513 = vector.extract_strided_slice %512 {offsets = [0, 0], sizes = [4, 32], strides = [1, 1]} : vector<8x32xf32> to vector<4x32xf32>
    %514 = vector.extract_strided_slice %512 {offsets = [4, 0], sizes = [4, 32], strides = [1, 1]} : vector<8x32xf32> to vector<4x32xf32>
    %515 = tpu.concatenate %303, %514 in 1 : vector<4x32xf32>, vector<4x32xf32> -> vector<4x64xf32>
    %516 = tpu.concatenate %333, %484 in 1 : vector<4x32xf32>, vector<4x32xf32> -> vector<4x64xf32>
    %517 = tpu.concatenate %363, %454 in 1 : vector<4x32xf32>, vector<4x32xf32> -> vector<4x64xf32>
    %518 = tpu.concatenate %393, %424 in 1 : vector<4x32xf32>, vector<4x32xf32> -> vector<4x64xf32>
    %519 = tpu.concatenate %423, %394 in 1 : vector<4x32xf32>, vector<4x32xf32> -> vector<4x64xf32>
    %520 = tpu.concatenate %453, %364 in 1 : vector<4x32xf32>, vector<4x32xf32> -> vector<4x64xf32>
    %521 = tpu.concatenate %483, %334 in 1 : vector<4x32xf32>, vector<4x32xf32> -> vector<4x64xf32>
    %522 = tpu.concatenate %513, %304 in 1 : vector<4x32xf32>, vector<4x32xf32> -> vector<4x64xf32>
    %523 = tpu.concatenate %515, %516, %517, %518, %519, %520, %521, %522 in 0 : vector<4x64xf32>, vector<4x64xf32>, vector<4x64xf32>, vector<4x64xf32>, vector<4x64xf32>, vector<4x64xf32>, vector<4x64xf32>, vector<4x64xf32> -> vector<32x64xf32>
    %c0_50 = arith.constant 0 : index
    %c0_51 = arith.constant 0 : index
    %524 = vector.load %arg7[%c0_50, %c0_51] : memref<64x64xf32, #tpu.memory_space<vmem>>, vector<64x64xf32>
    %cst_52 = arith.constant dense<0.000000e+00> : vector<4x64xf32>
    %525 = tpu.matmul %522, %524, %cst_52 {dimension_numbers = #tpu.dot_dimension_numbers<[1], [0], [0], [1], [0, 0, 1, 1], [], []>} : vector<4x64xf32>, vector<64x64xf32>, vector<4x64xf32> -> vector<4x64xf32>
    %c0_53 = arith.constant 0 : index
    %c0_54 = arith.constant 0 : index
    %526 = vector.load %arg8[%c0_53, %c0_54] : memref<1x64xf32, #tpu.memory_space<vmem>>, vector<1x64xf32>
    %527 = vector.broadcast %526 : vector<1x64xf32> to vector<4x64xf32>
    %528 = arith.addf %525, %527 : vector<4x64xf32>
    %c0_55 = arith.constant 0 : index
    %c0_56 = arith.constant 0 : index
    %529 = vector.load %arg9[%c0_55, %c0_56] : memref<64x64xf32, #tpu.memory_space<vmem>>, vector<64x64xf32>
    %cst_57 = arith.constant dense<0.000000e+00> : vector<32x64xf32>
    %530 = tpu.matmul %523, %529, %cst_57 {dimension_numbers = #tpu.dot_dimension_numbers<[1], [0], [0], [1], [0, 0, 1, 1], [], []>} : vector<32x64xf32>, vector<64x64xf32>, vector<32x64xf32> -> vector<32x64xf32>
    %c0_58 = arith.constant 0 : index
    %c0_59 = arith.constant 0 : index
    %531 = vector.load %arg10[%c0_58, %c0_59] : memref<1x64xf32, #tpu.memory_space<vmem>>, vector<1x64xf32>
    %532 = vector.broadcast %531 : vector<1x64xf32> to vector<32x64xf32>
    %533 = arith.addf %530, %532 : vector<32x64xf32>
    %c0_60 = arith.constant 0 : index
    %c0_61 = arith.constant 0 : index
    %534 = vector.load %arg11[%c0_60, %c0_61] : memref<1x64xf32, #tpu.memory_space<vmem>>, vector<1x64xf32>
    %535 = tpu.concatenate %528, %528, %528, %528, %528, %528, %528, %528 in 0 : vector<4x64xf32>, vector<4x64xf32>, vector<4x64xf32>, vector<4x64xf32>, vector<4x64xf32>, vector<4x64xf32>, vector<4x64xf32>, vector<4x64xf32> -> vector<32x64xf32>
    %536 = arith.addf %533, %535 : vector<32x64xf32>
    %537 = math.tanh %536 : vector<32x64xf32>
    %538 = vector.broadcast %534 : vector<1x64xf32> to vector<32x64xf32>
    %539 = arith.mulf %537, %538 : vector<32x64xf32>
    %cst_62 = arith.constant dense<0.000000e+00> : vector<32xf32>
    %540 = vector.multi_reduction <add>, %539, %cst_62 [1] : vector<32x64xf32> to vector<32xf32>
    %541 = vector.shape_cast %540 : vector<32xf32> to vector<32x1xf32>
    %542 = vector.extract_strided_slice %541 {offsets = [0, 0], sizes = [4, 1], strides = [1, 1]} : vector<32x1xf32> to vector<4x1xf32>
    %543 = vector.extract_strided_slice %541 {offsets = [4, 0], sizes = [4, 1], strides = [1, 1]} : vector<32x1xf32> to vector<4x1xf32>
    %544 = vector.extract_strided_slice %541 {offsets = [8, 0], sizes = [4, 1], strides = [1, 1]} : vector<32x1xf32> to vector<4x1xf32>
    %545 = vector.extract_strided_slice %541 {offsets = [12, 0], sizes = [4, 1], strides = [1, 1]} : vector<32x1xf32> to vector<4x1xf32>
    %546 = vector.extract_strided_slice %541 {offsets = [16, 0], sizes = [4, 1], strides = [1, 1]} : vector<32x1xf32> to vector<4x1xf32>
    %547 = vector.extract_strided_slice %541 {offsets = [20, 0], sizes = [4, 1], strides = [1, 1]} : vector<32x1xf32> to vector<4x1xf32>
    %548 = vector.extract_strided_slice %541 {offsets = [24, 0], sizes = [4, 1], strides = [1, 1]} : vector<32x1xf32> to vector<4x1xf32>
    %549 = vector.extract_strided_slice %541 {offsets = [28, 0], sizes = [4, 1], strides = [1, 1]} : vector<32x1xf32> to vector<4x1xf32>
    %550 = tpu.concatenate %542, %543, %544, %545, %546, %547, %548, %549 in 1 : vector<4x1xf32>, vector<4x1xf32>, vector<4x1xf32>, vector<4x1xf32>, vector<4x1xf32>, vector<4x1xf32>, vector<4x1xf32>, vector<4x1xf32> -> vector<4x8xf32>
    %cst_63 = arith.constant dense<0xFF800000> : vector<4xf32>
    %551 = vector.multi_reduction <maximumf>, %550, %cst_63 [1] : vector<4x8xf32> to vector<4xf32>
    %552 = vector.shape_cast %551 : vector<4xf32> to vector<4x1xf32>
    %553 = vector.broadcast %552 : vector<4x1xf32> to vector<4x8xf32>
    %554 = arith.subf %550, %553 : vector<4x8xf32>
    %555 = math.exp %554 : vector<4x8xf32>
    %cst_64 = arith.constant dense<0.000000e+00> : vector<4xf32>
    %556 = vector.multi_reduction <add>, %555, %cst_64 [1] : vector<4x8xf32> to vector<4xf32>
    %557 = vector.shape_cast %556 : vector<4xf32> to vector<4x1xf32>
    %558 = tpu.reciprocal %557 : vector<4x1xf32> -> vector<4x1xf32>
    %559 = vector.broadcast %558 : vector<4x1xf32> to vector<4x8xf32>
    %560 = arith.mulf %555, %559 : vector<4x8xf32>
    %cst_65 = arith.constant 0.000000e+00 : f32
    %561 = vector.broadcast %cst_65 : f32 to vector<4x64xf32>
    %562 = vector.extract_strided_slice %560 {offsets = [0, 0], sizes = [4, 1], strides = [1, 1]} : vector<4x8xf32> to vector<4x1xf32>
    %563 = vector.broadcast %562 : vector<4x1xf32> to vector<4x64xf32>
    %564 = arith.mulf %563, %515 : vector<4x64xf32>
    %565 = arith.addf %561, %564 : vector<4x64xf32>
    %566 = vector.extract_strided_slice %560 {offsets = [0, 1], sizes = [4, 1], strides = [1, 1]} : vector<4x8xf32> to vector<4x1xf32>
    %567 = vector.broadcast %566 : vector<4x1xf32> to vector<4x64xf32>
    %568 = arith.mulf %567, %516 : vector<4x64xf32>
    %569 = arith.addf %565, %568 : vector<4x64xf32>
    %570 = vector.extract_strided_slice %560 {offsets = [0, 2], sizes = [4, 1], strides = [1, 1]} : vector<4x8xf32> to vector<4x1xf32>
    %571 = vector.broadcast %570 : vector<4x1xf32> to vector<4x64xf32>
    %572 = arith.mulf %571, %517 : vector<4x64xf32>
    %573 = arith.addf %569, %572 : vector<4x64xf32>
    %574 = vector.extract_strided_slice %560 {offsets = [0, 3], sizes = [4, 1], strides = [1, 1]} : vector<4x8xf32> to vector<4x1xf32>
    %575 = vector.broadcast %574 : vector<4x1xf32> to vector<4x64xf32>
    %576 = arith.mulf %575, %518 : vector<4x64xf32>
    %577 = arith.addf %573, %576 : vector<4x64xf32>
    %578 = vector.extract_strided_slice %560 {offsets = [0, 4], sizes = [4, 1], strides = [1, 1]} : vector<4x8xf32> to vector<4x1xf32>
    %579 = vector.broadcast %578 : vector<4x1xf32> to vector<4x64xf32>
    %580 = arith.mulf %579, %519 : vector<4x64xf32>
    %581 = arith.addf %577, %580 : vector<4x64xf32>
    %582 = vector.extract_strided_slice %560 {offsets = [0, 5], sizes = [4, 1], strides = [1, 1]} : vector<4x8xf32> to vector<4x1xf32>
    %583 = vector.broadcast %582 : vector<4x1xf32> to vector<4x64xf32>
    %584 = arith.mulf %583, %520 : vector<4x64xf32>
    %585 = arith.addf %581, %584 : vector<4x64xf32>
    %586 = vector.extract_strided_slice %560 {offsets = [0, 6], sizes = [4, 1], strides = [1, 1]} : vector<4x8xf32> to vector<4x1xf32>
    %587 = vector.broadcast %586 : vector<4x1xf32> to vector<4x64xf32>
    %588 = arith.mulf %587, %521 : vector<4x64xf32>
    %589 = arith.addf %585, %588 : vector<4x64xf32>
    %590 = vector.extract_strided_slice %560 {offsets = [0, 7], sizes = [4, 1], strides = [1, 1]} : vector<4x8xf32> to vector<4x1xf32>
    %591 = vector.broadcast %590 : vector<4x1xf32> to vector<4x64xf32>
    %592 = arith.mulf %591, %522 : vector<4x64xf32>
    %593 = arith.addf %589, %592 : vector<4x64xf32>
    %c0_66 = arith.constant 0 : index
    %c0_67 = arith.constant 0 : index
    %594 = vector.load %arg12[%c0_66, %c0_67] : memref<1x64xf32, #tpu.memory_space<vmem>>, vector<1x64xf32>
    %595 = vector.broadcast %594 : vector<1x64xf32> to vector<4x64xf32>
    %596 = arith.mulf %593, %595 : vector<4x64xf32>
    %cst_68 = arith.constant dense<0.000000e+00> : vector<4xf32>
    %597 = vector.multi_reduction <add>, %596, %cst_68 [1] : vector<4x64xf32> to vector<4xf32>
    %598 = vector.shape_cast %597 : vector<4xf32> to vector<4x1xf32>
    %c0_69 = arith.constant 0 : index
    %c0_70 = arith.constant 0 : index
    %599 = vector.load %arg13[%c0_69, %c0_70] : memref<1x1xf32, #tpu.memory_space<vmem>>, vector<1x1xf32>
    %600 = vector.broadcast %599 : vector<1x1xf32> to vector<4x1xf32>
    %601 = arith.addf %598, %600 : vector<4x1xf32>
    %cst_71 = arith.constant 0.000000e+00 : f32
    %602 = vector.broadcast %cst_71 : f32 to vector<4x119xf32>
    %603 = tpu.concatenate %560, %601, %602 in 1 : vector<4x8xf32>, vector<4x1xf32>, vector<4x119xf32> -> vector<4x128xf32>
    %cst_72 = arith.constant 0.000000e+00 : f32
    %604 = vector.broadcast %cst_72 : f32 to vector<4x128xf32>
    %605 = tpu.concatenate %603, %604 in 0 : vector<4x128xf32>, vector<4x128xf32> -> vector<8x128xf32>
    %c0_73 = arith.constant 0 : index
    %c0_74 = arith.constant 0 : index
    %606 = vector.load %arg14[%c0_73, %c0_74] : memref<8x128xf32, #tpu.memory_space<vmem>>, vector<8x128xf32>
    tpu.vector_store %arg14[%c0_73, %c0_74], %605 {strides = array<i32>} : memref<8x128xf32, #tpu.memory_space<vmem>>, vector<8x128xf32>,
    return
  }
}

</mosaic_0001>

<bundles_post_ra>
// kernel: bitalstm_forward.1
= control target key start
LH: loop header
LB: loop body
LE: loop exit
PB: predicated region body
PF: predicated region fallthrough
CT: control target
= control target key end

     0   :  { %s3279_s0 = inlined_call_operand.vmem [shape: f32[32,8], index: 0, kind: input, shape index: {}]   ;;  %s3280_s1 = inlined_call_operand.hbm [shape: f32[8,256], index: 1, kind: input, shape index: {}]   ;;  %s3281_s2 = inlined_call_operand.vmem [shape: f32[1,256], index: 2, kind: input, shape index: {}]   ;;  %s3282_s3 = inlined_call_operand.vmem [shape: f32[32,256], index: 3, kind: input, shape index: {}]   ;;  %s3283_s4 = inlined_call_operand.hbm [shape: f32[64,256], index: 4, kind: input, shape index: {}]   ;;  %s3284_s5 = inlined_call_operand.vmem [shape: f32[1,256], index: 5, kind: input, shape index: {}]   ;;  %s3285_s6 = inlined_call_operand.hbm [shape: f32[32,256], index: 6, kind: input, shape index: {}]   ;;  %s3286_s7 = inlined_call_operand.hbm [shape: f32[64,64], index: 7, kind: input, shape index: {}]   ;;  %s3287_s8 = inlined_call_operand.vmem [shape: f32[1,64], index: 8, kind: input, shape index: {}]   ;;  %s3288_s9 = inlined_call_operand.hbm [shape: f32[64,64], index: 9, kind: input, shape index: {}]   ;;  %s3289_s10 = inlined_call_operand.vmem [shape: f32[1,64], index: 10, kind: input, shape index: {}]   ;;  %s3290_s11 = inlined_call_operand.vmem [shape: f32[1,64], index: 11, kind: input, shape index: {}]   ;;  %s3291_s12 = inlined_call_operand.vmem [shape: f32[1,64], index: 12, kind: input, shape index: {}]   ;;  %s3292_s13 = inlined_call_operand.<no memory space> [shape: f32[1,1], index: 13, kind: input, shape index: {}]   ;;  %s3293_s14 = inlined_call_operand.vmem [shape: f32[8,128], index: 14, kind: output, shape index: {}]  }
   0x1   :  { %v19_v0 = vstv %s3292_s13 }
   0x2   :  { %20 = vst [vmem:[#allocation2] sm:$0x1] %v19_v0 }
   0x3   :  { %21 = vsyncpa [#allocation4], 0 }
   0x4   :  { %22 = vsyncpa [#allocation6], 0  ;;  %s45_s17 = sshll.u32 %s3283_s4, 4  ;;  %s46_s17 = int_to_ptr.hbm [resolvable:$true] %s45_s17 }
   0x5   :  { %23 = vsyncpa [#allocation9], 0  ;;  %s2505_s18 = smov [#allocation5]   ;;  %s73_s22 = sshll.u32 %s3286_s7, 4  ;;  %s74_s22 = int_to_ptr.hbm [resolvable:$true] %s73_s22 }
   0x6   :  { %s47_s19 = sshll.u32 %s2505_s18, 4  ;;  %s2506_s23 = smov 256   ;;  %s48_s19 = int_to_ptr.vmem [resolvable:$true] %s47_s19 }
   0x7   :  { %s2507_s24 = smov 16   ;;  %s2508_s13 = smov [#allocation8]  }
   0x8   :  { %53 = dma.hbm_to_vmem [thread:$0]  %s46_s17, 2048, %s48_s19, [#allocation6], %s2506_s23, %s2506_s23, %s2507_s24  }
   0x9   :  { %s75_s25 = sshll.u32 %s2508_s13, 4  ;;  %s2509_s26 = smov 128   ;;  %s76_s25 = int_to_ptr.vmem [resolvable:$true] %s75_s25 }
   0xa   :  { %s2510_s27 = smov 8   ;;  %s31_s29 = sshll.u32 %s3280_s1, 4  ;;  %s32_s29 = int_to_ptr.hbm [resolvable:$true] %s31_s29 }
   0xb   :  { %81 = dma.hbm_to_vmem [thread:$0]  %s74_s22, 1024, %s76_s25, [#allocation9], %s2509_s26, %s2509_s26, %s2510_s27  }
   0xc   :  { %s2511_s30 = smov [#allocation3]   ;;  %s60_s17 = sshll.u32 %s3285_s6, 4  ;;  %s61_s17 = int_to_ptr.hbm [resolvable:$true] %s60_s17 }
   0xd   :  { %s33_s15 = sshll.u32 %s2511_s30, 4  ;;  %s2512_s18 = smov [#allocation7]   ;;  %s34_s15 = int_to_ptr.vmem [resolvable:$true] %s33_s15 }
   0xe   :  { %36 = dma.hbm_to_vmem [thread:$0]  %s32_s29, 256, %s34_s15, [#allocation4]  }
   0xf   :  { %s62_s19 = sshll.u32 %s2512_s18, 4  ;;  %s88_s22 = sshll.u32 %s3288_s9, 4  ;;  %s63_s19 = int_to_ptr.vmem [resolvable:$true] %s62_s19  ;;  %s89_s22 = int_to_ptr.hbm [resolvable:$true] %s88_s22 }
  0x10   :  { %68 = dma.hbm_to_vmem [thread:$0]  %s61_s17, 1024, %s63_s19, [#allocation6], %s2506_s23, %s2506_s23, %s2507_s24  }
  0x11   :  { %s2513_s1 = smov [#allocation10]  }
  0x12   :  { %s90_s13 = sshll.u32 %s2513_s1, 4  ;;  %s91_s13 = int_to_ptr.vmem [resolvable:$true] %s90_s13 }
  0x13   :  { %96 = dma.hbm_to_vmem [thread:$0]  %s89_s22, 1024, %s91_s13, [#allocation9], %s2509_s26, %s2509_s26, %s2510_s27  }
  0x14   :  { %2499 = dma.done.wait [#allocation4], 256  }
  0x15   :  { %2500 = vsyncadd [#allocation4], 4294967040 }
  0x16   :  { %2501 = dma.done.wait [#allocation6], 3072  }
  0x17   :  { %2502 = vsyncadd [#allocation6], 4294964224 }
  0x18   :  { %2503 = dma.done.wait [#allocation9], 2048  }
  0x19   :  { %2504 = vsyncadd [#allocation9], 4294965248  ;;  %vm145_vm0 = vcmask 64512   ;;  %v137_v1 = vld [vmem:[#allocation3] sm:$0xff]  ;;  %v136_v3 = vld [vmem:[%s3279_s0 + $0x18] sm:$0xff]  ;;  %v2514_v14 = vmov 0.0   ;;  %v125_v45 = vlaneseq }
  0x1a   :  { %v133_v2 = vld [vmem:[%s3279_s0] sm:$0xff]  ;;  %173 = vmatpush.msra.mxu0 %v137_v1  ;;  %2196 = vmatpush.msra.mxu1 %v137_v1  ;;  %v138_v4 = vld [vmem:[#allocation3 + $0x8] sm:$0xff]  ;;  %v2629_v5 = vld [vmem:[%s3282_s3 + $0x38] sm:$0xff]  ;;  %vm224_vm1 = vcmask 1043456   ;;  %s2516_s23 = smov 32   ;;  %vm226_vm10 = vcmask 261120  }
  0x1b   :  { %2131 = vmatmul.msk.f32.vlgmr.msra.gmra.mxu0 %vm145_vm0, %v133_v2  ;;  %2134 = vmatmul.msk.f32.vlgmr.msra.gmra.mxu1 %vm145_vm0, %v136_v3  ;;  %v2636_v6 = vld [vmem:[%s3282_s3 + $0x28] sm:$0xff]  ;;  %v2641_v7 = vld [vmem:[%s3282_s3 + $0x30] sm:$0xff]  ;;  %v2646_v8 = vld [vmem:[%s3282_s3 + $0x20] sm:$0xff]  ;;  %v2743_v49 = vshrl.u32 %v125_v45, 7  ;;  %v129_v61 = vand.u32 127, %v125_v45 }
  0x1c   :  { %202 = vmatpush.msrb.mxu1 %v138_v4  ;;  %358 = vmatpush.msra.mxu3 %v2629_v5  ;;  %v2653_v9 = vld [vmem:[%s3282_s3 + $0x18] sm:$0xff]  ;;  %v2659_v10 = vld [vmem:[%s3282_s3 + $0x10] sm:$0xff]  ;;  %v134_v11 = vld [vmem:[%s3279_s0 + $0x8] sm:$0xff] }
  0x1d   :  { %242 = vmatpush.msra.mxu2 %v2641_v7  ;;  %602 = vmatpush.msrb.mxu0 %v2641_v7  ;;  %v2675_v12 = vld [vmem:[%s3282_s3 + $0x8] sm:$0xff]  ;;  %v2680_v13 = vld [vmem:[%s3282_s3] sm:$0xff]  ;;  %v135_v15 = vld [vmem:[%s3279_s0 + $0x10] sm:$0xff]  ;;  %vm127_vm2 = vcmp.lt.s32.totalorder %v2743_v49, 4  ;;  %vm130_vm3 = vcmp.ge.s32.totalorder %v129_v61, 64  ;;  %vm131_vm4 = vcmp.lt.s32.totalorder %v129_v61, 96 }
  0x1e   :  { %262 = vmatpush.msra.mxu1 %v2629_v5  ;;  %359 = vmatpush.msra.mxu3 %v2636_v6  ;;  %v139_v16 = vld [vmem:[%s3281_s2] sm:$0x3]  ;;  %vm2752_vm6 = vmand %vm130_vm3, %vm131_vm4  ;;  %s2515_s2 = smov 64  }
  0x1f   :  { %243 = vmatpush.msra.mxu2 %v2646_v8  ;;  %603 = vmatpush.msrb.mxu0 %v2646_v8  ;;  %v141_v17 = vperm.slane %v139_v16, 0  ;;  %v142_v21 = vperm.slane %v139_v16, 1 }
  0x20   :  { %263 = vmatpush.msra.mxu1 %v2636_v6  ;;  %360 = vmatpush.msra.mxu3 %v2653_v9 }
  0x21   :  { %244 = vmatpush.msra.mxu2 %v2659_v10  ;;  %604 = vmatpush.msrb.mxu0 %v2659_v10 }
  0x22   :  { %264 = vmatpush.msra.mxu1 %v2653_v9  ;;  %361 = vmatpush.msra.mxu3 %v2675_v12 }
  0x23   :  { %2132 = vmatmul.msk.f32.gmra.mxu0 %vm145_vm0, %v134_v11  ;;  %2135 = vmatmul.msk.f32.vlgmr.msrb.gmra.mxu1 %vm145_vm0, %v133_v2 }
  0x24   :  { %265 = vmatpush.msra.mxu1 %v2675_v12  ;;  %245 = vmatpush.msra.mxu2 %v2680_v13 }
  0x25   :  { %246 = vmatmul.f32.vlgmr.msra.gmra.mxu2 %v2514_v14  ;;  %444 = vmatpush.msrb.mxu3 %v2629_v5 }
  0x26   :  { %338 = vmatpush.msrb.mxu2 %v2641_v7  ;;  %622 = vmatpush.msrb.mxu1 %v2629_v5 }
  0x27   :  { %445 = vmatpush.msrb.mxu3 %v2636_v6  ;;  %605 = vmatpush.msrb.mxu0 %v2680_v13 }
  0x28   :  { %339 = vmatpush.msrb.mxu2 %v2646_v8  ;;  %623 = vmatpush.msrb.mxu1 %v2636_v6 }
  0x29   :  { %446 = vmatpush.msrb.mxu3 %v2653_v9  ;;  %780 = vmatpush.msra.mxu0 %v2641_v7 }
  0x2a   :  { %340 = vmatpush.msrb.mxu2 %v2659_v10  ;;  %624 = vmatpush.msrb.mxu1 %v2653_v9 }
  0x2b   :  { %2133 = vmatmul.msk.f32.gmra.mxu0 %vm145_vm0, %v135_v15  ;;  %2136 = vmatmul.msk.f32.gmra.mxu1 %vm145_vm0, %v134_v11 }
  0x2c   :  { %341 = vmatpush.msrb.mxu2 %v2680_v13  ;;  %447 = vmatpush.msrb.mxu3 %v2675_v12 }
  0x2d   :  { %625 = vmatpush.msrb.mxu1 %v2675_v12  ;;  %781 = vmatpush.msra.mxu0 %v2646_v8 }
  0x2e   :  { %424 = vmatpush.msra.mxu2 %v2641_v7 }
  0x2f   :  { %782 = vmatpush.msra.mxu0 %v2659_v10 }
  0x30   :  { %425 = vmatpush.msra.mxu2 %v2646_v8 }
  0x31   :  { %783 = vmatpush.msra.mxu0 %v2680_v13 }
  0x32   :  { %426 = vmatpush.msra.mxu2 %v2659_v10 }
  0x33   :  { %2137 = vmatmul.msk.f32.gmra.mxu1 %vm145_vm0, %v135_v15 }
  0x34   :  { %427 = vmatpush.msra.mxu2 %v2680_v13 }
  0x3b   :  { %2138 = vmatmul.msk.f32.gmra.mxu1 %vm145_vm0, %v136_v3 }
  0x43   :  { %266 = vmatmul.f32.vlgmr.msra.gmra.mxu1 %v2514_v14 }
  0x44   :  { %800 = vmatpush.msra.mxu1 %v2629_v5 }
  0x46   :  { %801 = vmatpush.msra.mxu1 %v2636_v6 }
  0x48   :  { %802 = vmatpush.msra.mxu1 %v2653_v9 }
  0x4a   :  { %803 = vmatpush.msra.mxu1 %v2675_v12 }
  0x98   :  { %v175_v18 = vpop.f32.mrf.mxu0  ;;  %v184_v19 = vpop.f32.mrf.mxu1 }
  0x99   :  { %v185_v20 = vadd.f32 %v184_v19, %v141_v17  ;;  %v176_v43 = vadd.f32 %v175_v18, %v141_v17 }
  0x9b   :  { %v849_v25 = vrot.slane %v185_v20, 4  ;;  %v315_v47 = vrot.slane %v176_v43, 4 }
  0xa0   :  { %v178_v22 = vpop.f32.mrf.mxu0  ;;  %v204_v23 = vpop.f32.mrf.mxu1 }
  0xa1   :  { %v205_v24 = vadd.f32 %v204_v23, %v142_v21  ;;  %v179_v36 = vadd.f32 %v178_v22, %v141_v17 }
  0xa3   :  { %v852_v26 = vrot.slane %v205_v24, 4  ;;  %v2726_v27 = vsel %vm224_vm1, %v185_v20, %v205_v24  ;;  %v493_v39 = vrot.slane %v179_v36, 4 }
  0xa5   :  { %v2729_v28 = vsel %vm224_vm1, %v849_v25, %v852_v26 }
  0xa8   :  { %v181_v29 = vpop.f32.mrf.mxu0  ;;  %v207_v30 = vpop.f32.mrf.mxu1 }
  0xa9   :  { %v182_v31 = vadd.f32 %v181_v29, %v141_v17  ;;  %v208_v32 = vadd.f32 %v207_v30, %v142_v21  ;;  %v247_v52 = vpop.f32.mrf.mxu2 }
  0xab   :  { %v671_v33 = vrot.slane %v182_v31, 4  ;;  %v674_v34 = vrot.slane %v208_v32, 4  ;;  %v2732_v35 = vsel %vm224_vm1, %v182_v31, %v208_v32 }
  0xad   :  { %v2735_v37 = vsel %vm224_vm1, %v671_v33, %v674_v34 }
  0xb0   :  { %v210_v38 = vpop.f32.mrf.mxu1 }
  0xb1   :  { %v211_v40 = vadd.f32 %v210_v38, %v142_v21 }
  0xb3   :  { %v496_v41 = vrot.slane %v211_v40, 4  ;;  %v2738_v42 = vsel %vm224_vm1, %v179_v36, %v211_v40 }
  0xb5   :  { %v2741_v44 = vsel %vm224_vm1, %v493_v39, %v496_v41 }
  0xb8   :  { %v213_v46 = vpop.f32.mrf.mxu1 }
  0xb9   :  { %v214_v48 = vadd.f32 %v213_v46, %v142_v21 }
  0xbb   :  { %v318_v50 = vrot.slane %v214_v48, 4  ;;  %v225_v54 = vsel %vm224_vm1, %v176_v43, %v214_v48 }
  0xbd   :  { %v2746_v51 = vsel %vm224_vm1, %v315_v47, %v318_v50 }
  0xc0   :  { %v267_v53 = vpop.f32.mrf.mxu1 }
  0xc1   :  { %v272_v55 = vsel %vm127_vm2, %v247_v52, %v267_v53 }
  0xc2   :  { %v273_v56 = vadd.f32 %v272_v55, %v225_v54 }
  0xc4   :  { %v2139_v57 = vmul.f32 -1.442695, %v273_v56 }
  0xc6   :  { %2239 = vpow2.f32 %v2139_v57 }
  0xcc   :  { %v2240_v58 = vpop.eup %2239 }
  0xcd   :  { %v278_v59 = vadd.f32 1.0, %v2240_v58 }
  0xcf   :  { %2241 = vrcp.f32 %v278_v59  ;;  %v290_v0 = vand.u32 2147483648, %v278_v59  ;;  %v288_v2 = vand.u32 2147483647, %v278_v59  ;;  %vm284_vm7 = vweird.f32 %v278_v59 }
  0xd0   :  { %2243 = vtanh.f32 %v273_v56 }
  0xd1   :  { %v291_v11 = vor.u32 1.1754944e-38, %v290_v0  ;;  %vm289_vm9 = vcmp.eq.f32.partialorder %v288_v2, 8.507059e+37 }
  0xd5   :  { %v2242_v60 = vpop.eup %2241 }
  0xd6   :  { %v280_v62 = vmul.f32 %v2242_v60, %v278_v59  ;;  %vm285_vm5 = vweird.f32 %v2242_v60  ;;  %v2244_v16 = vpop.eup %2243 }
  0xd7   :  { %vm286_vm8 = vmor %vm284_vm7, %vm285_vm5 }
  0xd8   :  { %v281_v63 = vsub.f32 1.0, %v280_v62 }
  0xda   :  { %v282_v1 = vmul.f32 %v2242_v60, %v281_v63 }
  0xdc   :  { %v283_v4 = vadd.f32 %v2242_v60, %v282_v1 }
  0xde   :  { %v287_v15 = vsel %vm286_vm8, %v2242_v60, %v283_v4 }
  0xdf   :  { %v292_v17 = vsel %vm289_vm9, %v291_v11, %v287_v15 }
  0xe0   :  { %v296_v18 = vsel %vm2752_vm6, %v2244_v16, %v292_v17 }
  0xe1   :  { %299 = vrot.lane.b32.xlu0 %v296_v18, %s2515_s2  ;;  %v297_v21 = vmul.f32 0.0, %v296_v18 }
 0x153   :  { %v300_v19 = vpop.permute.xlu0 %299 }
 0x154   :  { %v302_v20 = vmul.f32 %v300_v19, %v296_v18 }
 0x156   :  { %304 = vrot.lane.b32.xlu0 %v302_v20, %s2516_s23 }
 0x1c8   :  { %v305_v22 = vpop.permute.xlu0 %304 }
 0x1c9   :  { %v307_v23 = vadd.f32 %v305_v22, %v297_v21 }
 0x1cb   :  { %2245 = vtanh.f32 %v307_v23 }
 0x1d1   :  { %v2246_v24 = vpop.eup %2245 }
 0x1d2   :  { %310 = vrot.lane.b32.xlu1 %v2246_v24, %s2515_s2 }
 0x244   :  { %v311_v25 = vpop.permute.xlu1 %310 }
 0x245   :  { %v2761_v26 = vmul.f32 %v311_v25, %v296_v18 }
 0x247   :  { %322 = vrot.lane.b32.xlu1 %v2761_v26, %s2516_s23 }
 0x2b9   :  { %v2765_v29 = vpop.permute.xlu1 %322 }
 0x2ba   :  { %2140 = vmatmul.msk.f32.vlgmr.msrb.gmra.mxu2 %vm226_vm10, %v2765_v29  ;;  %2141 = vmatmul.msk.f32.vlgmr.msra.gmra.mxu3 %vm226_vm10, %v2765_v29 }
 0x2bb   :  { %516 = vmatpush.msrb.mxu2 %v2641_v7  ;;  %536 = vmatpush.msra.mxu3 %v2629_v5 }
 0x2bd   :  { %517 = vmatpush.msrb.mxu2 %v2646_v8  ;;  %537 = vmatpush.msra.mxu3 %v2636_v6 }
 0x2bf   :  { %518 = vmatpush.msrb.mxu2 %v2659_v10  ;;  %538 = vmatpush.msra.mxu3 %v2653_v9 }
 0x2c1   :  { %519 = vmatpush.msrb.mxu2 %v2680_v13  ;;  %539 = vmatpush.msra.mxu3 %v2675_v12 }
 0x33d   :  { %v343_v30 = vpop.f32.mrf.mxu2  ;;  %v363_v31 = vpop.f32.mrf.mxu3 }
 0x33e   :  { %v366_v32 = vsel %vm127_vm2, %v343_v30, %v363_v31 }
 0x33f   :  { %v367_v33 = vadd.f32 %v366_v32, %v2746_v51 }
 0x341   :  { %v2142_v34 = vmul.f32 -1.442695, %v367_v33 }
 0x343   :  { %2247 = vpow2.f32 %v2142_v34 }
 0x349   :  { %v2248_v36 = vpop.eup %2247 }
 0x34a   :  { %v372_v38 = vadd.f32 1.0, %v2248_v36 }
 0x34c   :  { %2249 = vrcp.f32 %v372_v38  ;;  %v384_v43 = vand.u32 2147483648, %v372_v38  ;;  %v382_v46 = vand.u32 2147483647, %v372_v38  ;;  %vm378_vm12 = vweird.f32 %v372_v38 }
 0x34d   :  { %2251 = vtanh.f32 %v367_v33 }
 0x34e   :  { %v385_v48 = vor.u32 1.1754944e-38, %v384_v43  ;;  %vm383_vm14 = vcmp.eq.f32.partialorder %v382_v46, 8.507059e+37 }
 0x352   :  { %v2250_v39 = vpop.eup %2249 }
 0x353   :  { %v374_v40 = vmul.f32 %v2250_v39, %v372_v38  ;;  %vm379_vm11 = vweird.f32 %v2250_v39  ;;  %v2252_v51 = vpop.eup %2251 }
 0x354   :  { %vm380_vm13 = vmor %vm378_vm12, %vm379_vm11 }
 0x355   :  { %v375_v41 = vsub.f32 1.0, %v374_v40 }
 0x357   :  { %v376_v45 = vmul.f32 %v2250_v39, %v375_v41 }
 0x359   :  { %v377_v47 = vadd.f32 %v2250_v39, %v376_v45 }
 0x35b   :  { %v381_v50 = vsel %vm380_vm13, %v2250_v39, %v377_v47 }
 0x35c   :  { %v386_v52 = vsel %vm383_vm14, %v385_v48, %v381_v50 }
 0x35d   :  { %v388_v53 = vsel %vm2752_vm6, %v2252_v51, %v386_v52 }
 0x35e   :  { %391 = vrot.lane.b32.xlu2 %v388_v53, %s2515_s2  ;;  %v389_v56 = vmul.f32 %v388_v53, %v307_v23 }
 0x3b8   :  { %v392_v54 = vpop.permute.xlu2 %391 }
 0x3b9   :  { %v394_v55 = vmul.f32 %v392_v54, %v388_v53 }
 0x3bb   :  { %396 = vrot.lane.b32.xlu2 %v394_v55, %s2516_s23 }
 0x415   :  { %v397_v57 = vpop.permute.xlu2 %396 }
 0x416   :  { %v399_v58 = vadd.f32 %v397_v57, %v389_v56 }
 0x418   :  { %2253 = vtanh.f32 %v399_v58 }
 0x41e   :  { %v2254_v59 = vpop.eup %2253 }
 0x41f   :  { %402 = vrot.lane.b32.xlu0 %v2254_v59, %s2515_s2 }
 0x491   :  { %v403_v60 = vpop.permute.xlu0 %402 }
 0x492   :  { %v2787_v61 = vmul.f32 %v403_v60, %v388_v53 }
 0x494   :  { %408 = vrot.lane.b32.xlu1 %v2787_v61, %s2516_s23 }
 0x506   :  { %v2791_v62 = vpop.permute.xlu1 %408 }
 0x507   :  { %2143 = vmatmul.msk.f32.vlgmr.msra.gmra.mxu2 %vm226_vm10, %v2791_v62  ;;  %2144 = vmatmul.msk.f32.vlgmr.msrb.gmra.mxu3 %vm226_vm10, %v2791_v62 }
 0x508   :  { %694 = vmatpush.msra.mxu2 %v2641_v7  ;;  %714 = vmatpush.msrb.mxu3 %v2629_v5 }
 0x50a   :  { %695 = vmatpush.msra.mxu2 %v2646_v8  ;;  %715 = vmatpush.msrb.mxu3 %v2636_v6 }
 0x50c   :  { %696 = vmatpush.msra.mxu2 %v2659_v10  ;;  %716 = vmatpush.msrb.mxu3 %v2653_v9 }
 0x50e   :  { %697 = vmatpush.msra.mxu2 %v2680_v13  ;;  %717 = vmatpush.msrb.mxu3 %v2675_v12 }
 0x58a   :  { %v429_v63 = vpop.f32.mrf.mxu2  ;;  %v449_v0 = vpop.f32.mrf.mxu3 }
 0x58b   :  { %v452_v1 = vsel %vm127_vm2, %v429_v63, %v449_v0 }
 0x58c   :  { %v453_v2 = vadd.f32 %v452_v1, %v2738_v42 }
 0x58e   :  { %v2145_v4 = vmul.f32 -1.442695, %v453_v2 }
 0x590   :  { %2255 = vpow2.f32 %v2145_v4 }
 0x596   :  { %v2256_v11 = vpop.eup %2255 }
 0x597   :  { %v458_v15 = vadd.f32 1.0, %v2256_v11 }
 0x599   :  { %2257 = vrcp.f32 %v458_v15  ;;  %v470_v19 = vand.u32 2147483648, %v458_v15  ;;  %v468_v21 = vand.u32 2147483647, %v458_v15  ;;  %vm464_vm3 = vweird.f32 %v458_v15 }
 0x59a   :  { %2259 = vtanh.f32 %v453_v2 }
 0x59b   :  { %v471_v23 = vor.u32 1.1754944e-38, %v470_v19  ;;  %vm469_vm5 = vcmp.eq.f32.partialorder %v468_v21, 8.507059e+37 }
 0x59f   :  { %v2258_v16 = vpop.eup %2257 }
 0x5a0   :  { %v460_v17 = vmul.f32 %v2258_v16, %v458_v15  ;;  %vm465_vm15 = vweird.f32 %v2258_v16  ;;  %v2260_v42 = vpop.eup %2259 }
 0x5a1   :  { %vm466_vm4 = vmor %vm464_vm3, %vm465_vm15 }
 0x5a2   :  { %v461_v18 = vsub.f32 1.0, %v460_v17 }
 0x5a4   :  { %v462_v20 = vmul.f32 %v2258_v16, %v461_v18 }
 0x5a6   :  { %v463_v22 = vadd.f32 %v2258_v16, %v462_v20 }
 0x5a8   :  { %v467_v24 = vsel %vm466_vm4, %v2258_v16, %v463_v22 }
 0x5a9   :  { %v472_v25 = vsel %vm469_vm5, %v471_v23, %v467_v24 }
 0x5aa   :  { %v474_v30 = vsel %vm2752_vm6, %v2260_v42, %v472_v25 }
 0x5ab   :  { %477 = vrot.lane.b32.xlu2 %v474_v30, %s2515_s2  ;;  %v475_v33 = vmul.f32 %v474_v30, %v399_v58 }
 0x605   :  { %v478_v31 = vpop.permute.xlu2 %477 }
 0x606   :  { %v480_v32 = vmul.f32 %v478_v31, %v474_v30 }
 0x608   :  { %482 = vrot.lane.b32.xlu0 %v480_v32, %s2516_s23 }
 0x67a   :  { %v483_v34 = vpop.permute.xlu0 %482 }
 0x67b   :  { %v485_v36 = vadd.f32 %v483_v34, %v475_v33 }
 0x67d   :  { %2261 = vtanh.f32 %v485_v36 }
 0x683   :  { %v2262_v38 = vpop.eup %2261 }
 0x684   :  { %488 = vrot.lane.b32.xlu1 %v2262_v38, %s2515_s2 }
 0x6f6   :  { %v489_v39 = vpop.permute.xlu1 %488 }
 0x6f7   :  { %v2813_v40 = vmul.f32 %v489_v39, %v474_v30 }
 0x6f9   :  { %500 = vrot.lane.b32.xlu2 %v2813_v40, %s2516_s23 }
 0x753   :  { %v2817_v41 = vpop.permute.xlu2 %500 }
 0x754   :  { %2146 = vmatmul.msk.f32.vlgmr.msrb.gmra.mxu2 %vm226_vm10, %v2817_v41  ;;  %2147 = vmatmul.msk.f32.vlgmr.msra.gmra.mxu3 %vm226_vm10, %v2817_v41 }
 0x755   :  { %872 = vmatpush.msrb.mxu2 %v2641_v7  ;;  %892 = vmatpush.msra.mxu3 %v2629_v5 }
 0x757   :  { %873 = vmatpush.msrb.mxu2 %v2646_v8  ;;  %893 = vmatpush.msra.mxu3 %v2636_v6 }
 0x759   :  { %874 = vmatpush.msrb.mxu2 %v2659_v10  ;;  %894 = vmatpush.msra.mxu3 %v2653_v9 }
 0x75b   :  { %875 = vmatpush.msrb.mxu2 %v2680_v13  ;;  %895 = vmatpush.msra.mxu3 %v2675_v12 }
 0x7d7   :  { %v521_v43 = vpop.f32.mrf.mxu2  ;;  %v541_v45 = vpop.f32.mrf.mxu3 }
 0x7d8   :  { %v544_v46 = vsel %vm127_vm2, %v521_v43, %v541_v45 }
 0x7d9   :  { %v545_v7 = vadd.f32 %v544_v46, %v2741_v44 }
 0x7db   :  { %v2148_v5 = vmul.f32 -1.442695, %v545_v7 }
 0x7dd   :  { %2263 = vpow2.f32 %v2148_v5 }
 0x7e3   :  { %v2264_v8 = vpop.eup %2263 }
 0x7e4   :  { %v550_v47 = vadd.f32 1.0, %v2264_v8 }
 0x7e6   :  { %2265 = vrcp.f32 %v550_v47  ;;  %v562_v9 = vand.u32 2147483648, %v550_v47  ;;  %v560_v12 = vand.u32 2147483647, %v550_v47  ;;  %vm556_vm8 = vweird.f32 %v550_v47 }
 0x7e7   :  { %2267 = vtanh.f32 %v545_v7 }
 0x7e8   :  { %v563_v51 = vor.u32 1.1754944e-38, %v562_v9  ;;  %vm561_vm11 = vcmp.eq.f32.partialorder %v560_v12, 8.507059e+37 }
 0x7ec   :  { %v2266_v6 = vpop.eup %2265 }
 0x7ed   :  { %v552_v10 = vmul.f32 %v2266_v6, %v550_v47  ;;  %vm557_vm7 = vweird.f32 %v2266_v6  ;;  %v2268_v44 = vpop.eup %2267 }
 0x7ee   :  { %vm558_vm9 = vmor %vm556_vm8, %vm557_vm7 }
 0x7ef   :  { %v553_v48 = vsub.f32 1.0, %v552_v10 }
 0x7f1   :  { %v554_v13 = vmul.f32 %v2266_v6, %v553_v48 }
 0x7f3   :  { %v555_v50 = vadd.f32 %v2266_v6, %v554_v13 }
 0x7f5   :  { %v559_v52 = vsel %vm558_vm9, %v2266_v6, %v555_v50 }
 0x7f6   :  { %v564_v53 = vsel %vm561_vm11, %v563_v51, %v559_v52 }
 0x7f7   :  { %v566_v54 = vsel %vm2752_vm6, %v2268_v44, %v564_v53 }
 0x7f8   :  { %569 = vrot.lane.b32.xlu0 %v566_v54, %s2515_s2  ;;  %v567_v57 = vmul.f32 %v566_v54, %v485_v36 }
 0x86a   :  { %v570_v55 = vpop.permute.xlu0 %569 }
 0x86b   :  { %v572_v56 = vmul.f32 %v570_v55, %v566_v54 }
 0x86d   :  { %574 = vrot.lane.b32.xlu1 %v572_v56, %s2516_s23 }
 0x8df   :  { %v575_v58 = vpop.permute.xlu1 %574 }
 0x8e0   :  { %v577_v59 = vadd.f32 %v575_v58, %v567_v57 }
 0x8e2   :  { %2269 = vtanh.f32 %v577_v59 }
 0x8e8   :  { %v2270_v60 = vpop.eup %2269 }
 0x8e9   :  { %580 = vrot.lane.b32.xlu2 %v2270_v60, %s2515_s2 }
 0x943   :  { %v581_v63 = vpop.permute.xlu2 %580 }
 0x944   :  { %v2839_v0 = vmul.f32 %v581_v63, %v566_v54 }
 0x946   :  { %586 = vrot.lane.b32.xlu0 %v2839_v0, %s2516_s23 }
 0x9b8   :  { %v2843_v1 = vpop.permute.xlu0 %586 }
 0x9b9   :  { %2149 = vmatmul.msk.f32.vlgmr.msrb.gmra.mxu0 %vm226_vm10, %v2843_v1  ;;  %2150 = vmatmul.msk.f32.vlgmr.msrb.gmra.mxu1 %vm226_vm10, %v2843_v1 }
 0xa36   :  { %v607_v2 = vpop.f32.mrf.mxu0  ;;  %v627_v4 = vpop.f32.mrf.mxu1 }
 0xa37   :  { %v630_v11 = vsel %vm127_vm2, %v607_v2, %v627_v4 }
 0xa38   :  { %v631_v15 = vadd.f32 %v630_v11, %v2732_v35 }
 0xa3a   :  { %v2151_v16 = vmul.f32 -1.442695, %v631_v15 }
 0xa3c   :  { %2271 = vpow2.f32 %v2151_v16 }
 0xa42   :  { %v2272_v17 = vpop.eup %2271 }
 0xa43   :  { %v636_v18 = vadd.f32 1.0, %v2272_v17 }
 0xa45   :  { %2273 = vrcp.f32 %v636_v18  ;;  %v648_v22 = vand.u32 2147483648, %v636_v18  ;;  %v646_v24 = vand.u32 2147483647, %v636_v18  ;;  %vm642_vm13 = vweird.f32 %v636_v18 }
 0xa46   :  { %2275 = vtanh.f32 %v631_v15 }
 0xa47   :  { %v649_v25 = vor.u32 1.1754944e-38, %v648_v22  ;;  %vm647_vm15 = vcmp.eq.f32.partialorder %v646_v24, 8.507059e+37 }
 0xa4b   :  { %v2274_v19 = vpop.eup %2273 }
 0xa4c   :  { %v638_v20 = vmul.f32 %v2274_v19, %v636_v18  ;;  %vm643_vm12 = vweird.f32 %v2274_v19  ;;  %v2276_v35 = vpop.eup %2275 }
 0xa4d   :  { %vm644_vm14 = vmor %vm642_vm13, %vm643_vm12 }
 0xa4e   :  { %v639_v21 = vsub.f32 1.0, %v638_v20 }
 0xa50   :  { %v640_v23 = vmul.f32 %v2274_v19, %v639_v21 }
 0xa52   :  { %v641_v42 = vadd.f32 %v2274_v19, %v640_v23 }
 0xa54   :  { %v645_v30 = vsel %vm644_vm14, %v2274_v19, %v641_v42 }
 0xa55   :  { %v650_v31 = vsel %vm647_vm15, %v649_v25, %v645_v30 }
 0xa56   :  { %v652_v32 = vsel %vm2752_vm6, %v2276_v35, %v650_v31 }
 0xa57   :  { %655 = vrot.lane.b32.xlu1 %v652_v32, %s2515_s2  ;;  %v653_v36 = vmul.f32 %v652_v32, %v577_v59 }
 0xac9   :  { %v656_v33 = vpop.permute.xlu1 %655 }
 0xaca   :  { %v658_v34 = vmul.f32 %v656_v33, %v652_v32 }
 0xacc   :  { %660 = vrot.lane.b32.xlu2 %v658_v34, %s2516_s23 }
 0xb26   :  { %v661_v38 = vpop.permute.xlu2 %660 }
 0xb27   :  { %v663_v39 = vadd.f32 %v661_v38, %v653_v36 }
 0xb29   :  { %2277 = vtanh.f32 %v663_v39 }
 0xb2f   :  { %v2278_v43 = vpop.eup %2277 }
 0xb30   :  { %666 = vrot.lane.b32.xlu0 %v2278_v43, %s2515_s2 }
 0xba2   :  { %v667_v45 = vpop.permute.xlu0 %666 }
 0xba3   :  { %v2857_v46 = vmul.f32 %v667_v45, %v652_v32 }
 0xba5   :  { %678 = vrot.lane.b32.xlu1 %v2857_v46, %s2516_s23 }
 0xc17   :  { %v2861_v7 = vpop.permute.xlu1 %678 }
 0xc18   :  { %2152 = vmatmul.msk.f32.vlgmr.msra.gmra.mxu2 %vm226_vm10, %v2861_v7  ;;  %2153 = vmatmul.msk.f32.vlgmr.msrb.gmra.mxu3 %vm226_vm10, %v2861_v7 }
 0xc9b   :  { %v699_v5 = vpop.f32.mrf.mxu2  ;;  %v719_v8 = vpop.f32.mrf.mxu3 }
 0xc9c   :  { %v722_v47 = vsel %vm127_vm2, %v699_v5, %v719_v8 }
 0xc9d   :  { %v723_v6 = vadd.f32 %v722_v47, %v2735_v37 }
 0xc9f   :  { %v2154_v10 = vmul.f32 -1.442695, %v723_v6 }
 0xca1   :  { %2279 = vpow2.f32 %v2154_v10 }
 0xca7   :  { %v2280_v48 = vpop.eup %2279 }
 0xca8   :  { %v728_v9 = vadd.f32 1.0, %v2280_v48 }
 0xcaa   :  { %2281 = vrcp.f32 %v728_v9  ;;  %v740_v51 = vand.u32 2147483648, %v728_v9  ;;  %v738_v44 = vand.u32 2147483647, %v728_v9  ;;  %vm734_vm4 = vweird.f32 %v728_v9 }
 0xcab   :  { %2283 = vtanh.f32 %v723_v6 }
 0xcac   :  { %v741_v54 = vor.u32 1.1754944e-38, %v740_v51  ;;  %vm739_vm7 = vcmp.eq.f32.partialorder %v738_v44, 8.507059e+37 }
 0xcb0   :  { %v2282_v13 = vpop.eup %2281 }
 0xcb1   :  { %v730_v12 = vmul.f32 %v2282_v13, %v728_v9  ;;  %vm735_vm3 = vweird.f32 %v2282_v13  ;;  %v2284_v37 = vpop.eup %2283 }
 0xcb2   :  { %vm736_vm5 = vmor %vm734_vm4, %vm735_vm3  ;;  %vm1029_vm4 = vcmask 523264  }
 0xcb3   :  { %v731_v50 = vsub.f32 1.0, %v730_v12 }
 0xcb5   :  { %v732_v52 = vmul.f32 %v2282_v13, %v731_v50 }
 0xcb7   :  { %v733_v53 = vadd.f32 %v2282_v13, %v732_v52 }
 0xcb9   :  { %v737_v55 = vsel %vm736_vm5, %v2282_v13, %v733_v53 }
 0xcba   :  { %v742_v56 = vsel %vm739_vm7, %v741_v54, %v737_v55 }
 0xcbb   :  { %v744_v57 = vsel %vm2752_vm6, %v2284_v37, %v742_v56 }
 0xcbc   :  { %747 = vrot.lane.b32.xlu2 %v744_v57, %s2515_s2  ;;  %v745_v60 = vmul.f32 %v744_v57, %v663_v39 }
 0xd16   :  { %v748_v58 = vpop.permute.xlu2 %747 }
 0xd17   :  { %v750_v59 = vmul.f32 %v748_v58, %v744_v57 }
 0xd19   :  { %752 = vrot.lane.b32.xlu0 %v750_v59, %s2516_s23 }
 0xd8b   :  { %v753_v63 = vpop.permute.xlu0 %752 }
 0xd8c   :  { %v755_v2 = vadd.f32 %v753_v63, %v745_v60 }
 0xd8e   :  { %2285 = vtanh.f32 %v755_v2 }
 0xd94   :  { %v2286_v4 = vpop.eup %2285 }
 0xd95   :  { %758 = vrot.lane.b32.xlu1 %v2286_v4, %s2515_s2 }
 0xe07   :  { %v759_v11 = vpop.permute.xlu1 %758 }
 0xe08   :  { %v2875_v15 = vmul.f32 %v759_v11, %v744_v57 }
 0xe0a   :  { %764 = vrot.lane.b32.xlu2 %v2875_v15, %s2516_s23  ;;  %v954_v11 = vrot.slane %v2875_v15, 4  ;;  %v978_v15 = vrot.slane %v2787_v61, 4 }
 0xe64   :  { %v2879_v16 = vpop.permute.xlu2 %764 }
 0xe65   :  { %2155 = vmatmul.msk.f32.vlgmr.msra.gmra.mxu0 %vm226_vm10, %v2879_v16  ;;  %2156 = vmatmul.msk.f32.vlgmr.msra.gmra.mxu1 %vm226_vm10, %v2879_v16 }
 0xee2   :  { %v785_v17 = vpop.f32.mrf.mxu0  ;;  %v805_v18 = vpop.f32.mrf.mxu1 }
 0xee3   :  { %v808_v19 = vsel %vm127_vm2, %v785_v17, %v805_v18 }
 0xee4   :  { %v809_v20 = vadd.f32 %v808_v19, %v2726_v27 }
 0xee6   :  { %v2157_v21 = vmul.f32 -1.442695, %v809_v20 }
 0xee8   :  { %2287 = vpow2.f32 %v2157_v21 }
 0xeee   :  { %v2288_v22 = vpop.eup %2287 }
 0xeef   :  { %v814_v23 = vadd.f32 1.0, %v2288_v22 }
 0xef1   :  { %2289 = vrcp.f32 %v814_v23  ;;  %v826_v30 = vand.u32 2147483648, %v814_v23  ;;  %v824_v31 = vand.u32 2147483647, %v814_v23  ;;  %vm820_vm9 = vweird.f32 %v814_v23 }
 0xef2   :  { %2291 = vtanh.f32 %v809_v20 }
 0xef3   :  { %v827_v33 = vor.u32 1.1754944e-38, %v826_v30  ;;  %vm825_vm12 = vcmp.eq.f32.partialorder %v824_v31, 8.507059e+37  ;;  %v1019_v30 = vld [vmem:[#allocation5 + $0x60] sm:$0xff]  ;;  %v1017_v31 = vld [vmem:[#allocation5 + $0x50] sm:$0xff] }
 0xef7   :  { %v2290_v24 = vpop.eup %2289 }
 0xef8   :  { %v816_v42 = vmul.f32 %v2290_v24, %v814_v23  ;;  %vm821_vm8 = vweird.f32 %v2290_v24  ;;  %v2292_v27 = vpop.eup %2291  ;;  %v960_v23 = vrot.slane %v2857_v46, 4  ;;  %v1015_v46 = vld [vmem:[#allocation5 + $0x40] sm:$0xff] }
 0xef9   :  { %vm822_vm11 = vmor %vm820_vm9, %vm821_vm8 }
 0xefa   :  { %v817_v25 = vsub.f32 1.0, %v816_v42  ;;  %v1021_v42 = vld [vmem:[#allocation5 + $0x70] sm:$0xff] }
 0xefb   :  { %1050 = vmatpush.msrb.mxu0 %v1021_v42 }
 0xefc   :  { %v818_v35 = vmul.f32 %v2290_v24, %v817_v25  ;;  %v1022_v25 = vld [vmem:[#allocation5 + $0x78] sm:$0xff] }
 0xefd   :  { %1079 = vmatpush.msrb.mxu1 %v1022_v25  ;;  %1051 = vmatpush.msrb.mxu0 %v1019_v30 }
 0xefe   :  { %v819_v32 = vadd.f32 %v2290_v24, %v818_v35  ;;  %v1020_v35 = vld [vmem:[#allocation5 + $0x68] sm:$0xff] }
 0xeff   :  { %1080 = vmatpush.msrb.mxu1 %v1020_v35  ;;  %1052 = vmatpush.msrb.mxu0 %v1017_v31 }
 0xf00   :  { %v823_v34 = vsel %vm822_vm11, %v2290_v24, %v819_v32  ;;  %v966_v24 = vrot.slane %v2839_v0, 4  ;;  %v1018_v32 = vld [vmem:[#allocation5 + $0x58] sm:$0xff]  ;;  %v1013_v0 = vld [vmem:[#allocation5 + $0x30] sm:$0xff] }
 0xf01   :  { %v828_v36 = vsel %vm825_vm12, %v827_v33, %v823_v34  ;;  %v1016_v33 = vld [vmem:[#allocation5 + $0x48] sm:$0xff]  ;;  %1081 = vmatpush.msrb.mxu1 %v1018_v32  ;;  %v1014_v34 = vld [vmem:[#allocation5 + $0x38] sm:$0xff]  ;;  %1053 = vmatpush.msrb.mxu0 %v1015_v46 }
 0xf02   :  { %v830_v38 = vsel %vm2752_vm6, %v2292_v27, %v828_v36  ;;  %v1011_v36 = vld [vmem:[#allocation5 + $0x20] sm:$0xff] }
 0xf03   :  { %833 = vrot.lane.b32.xlu0 %v830_v38, %s2515_s2  ;;  %v831_v45 = vmul.f32 %v830_v38, %v755_v2  ;;  %1082 = vmatpush.msrb.mxu1 %v1016_v33 }
 0xf04   :  { %1054 = vmatpush.msrb.mxu0 %v1013_v0 }
 0xf05   :  { %1083 = vmatpush.msrb.mxu1 %v1014_v34 }
 0xf06   :  { %1055 = vmatpush.msrb.mxu0 %v1011_v36 }
 0xf75   :  { %v834_v39 = vpop.permute.xlu0 %833 }
 0xf76   :  { %v836_v43 = vmul.f32 %v834_v39, %v830_v38 }
 0xf78   :  { %838 = vrot.lane.b32.xlu1 %v836_v43, %s2516_s23  ;;  %v1009_v43 = vld [vmem:[#allocation5 + $0x10] sm:$0xff] }
 0xf79   :  { %1056 = vmatpush.msrb.mxu0 %v1009_v43 }
 0xfea   :  { %v839_v5 = vpop.permute.xlu1 %838 }
 0xfeb   :  { %v841_v8 = vadd.f32 %v839_v5, %v831_v45  ;;  %v1010_v45 = vld [vmem:[#allocation5 + $0x18] sm:$0xff]  ;;  %v972_v5 = vrot.slane %v2813_v40, 4  ;;  %v2931_v40 = vld [vmem:[#allocation7 + $0x20] sm:$0xff] }
 0xfed   :  { %2293 = vtanh.f32 %v841_v8 }
 0xff3   :  { %v2294_v47 = vpop.eup %2293 }
 0xff4   :  { %844 = vrot.lane.b32.xlu2 %v2294_v47, %s2515_s2  ;;  %v1007_v47 = vld [vmem:[#allocation5] sm:$0xff] }
 0xff5   :  { %1057 = vmatpush.msrb.mxu0 %v1007_v47 }
0x104e   :  { %v845_v6 = vpop.permute.xlu2 %844 }
0x104f   :  { %v847_v10 = vmul.f32 %v845_v6, %v830_v38  ;;  %v1012_v38 = vld [vmem:[#allocation5 + $0x28] sm:$0xff] }
0x1050   :  { %1084 = vmatpush.msrb.mxu1 %v1012_v38  ;;  %v1008_v6 = vld [vmem:[#allocation5 + $0x8] sm:$0xff] }
0x1051   :  { %856 = vrot.lane.b32.xlu0 %v847_v10, %s2516_s23  ;;  %v948_v4 = vrot.slane %v847_v10, 4  ;;  %v2923_v10 = vld [vmem:[#allocation7 + $0x30] sm:$0xff] }
0x1052   :  { %1085 = vmatpush.msrb.mxu1 %v1010_v45  ;;  %1121 = vmatpush.msra.mxu2 %v2923_v10 }
0x1053   :  { %1569 = vmatpush.msra.mxu0 %v2923_v10 }
0x1054   :  { %1086 = vmatpush.msrb.mxu1 %v1008_v6  ;;  %1122 = vmatpush.msra.mxu2 %v2931_v40 }
0x1055   :  { %1570 = vmatpush.msra.mxu0 %v2931_v40 }
0x10c3   :  { %v2894_v48 = vpop.permute.xlu0 %856 }
0x10c4   :  { %2158 = vmatmul.msk.f32.vlgmr.msrb.gmra.mxu2 %vm226_vm10, %v2894_v48  ;;  %2159 = vmatmul.msk.f32.vlgmr.msra.gmra.mxu3 %vm226_vm10, %v2894_v48 }
0x1147   :  { %v877_v9 = vpop.f32.mrf.mxu2  ;;  %v897_v13 = vpop.f32.mrf.mxu3 }
0x1148   :  { %v900_v12 = vsel %vm127_vm2, %v877_v9, %v897_v13  ;;  %v2925_v9 = vld [vmem:[#allocation7 + $0x38] sm:$0xff]  ;;  %v2939_v13 = vld [vmem:[#allocation7 + $0x10] sm:$0xff] }
0x1149   :  { %v901_v50 = vadd.f32 %v900_v12, %v2729_v28  ;;  %1141 = vmatpush.msrb.mxu3 %v2925_v9  ;;  %1589 = vmatpush.msra.mxu1 %v2925_v9  ;;  %v2941_v12 = vld [vmem:[#allocation7 + $0x18] sm:$0xff] }
0x114a   :  { %1123 = vmatpush.msra.mxu2 %v2939_v13  ;;  %1571 = vmatpush.msra.mxu0 %v2939_v13 }
0x114b   :  { %v2160_v51 = vmul.f32 -1.442695, %v901_v50 }
0x114d   :  { %2295 = vpow2.f32 %v2160_v51  ;;  %v2947_v51 = vld [vmem:[#allocation7 + $0x8] sm:$0xff] }
0x1153   :  { %v2296_v52 = vpop.eup %2295 }
0x1154   :  { %v906_v44 = vadd.f32 1.0, %v2296_v52 }
0x1156   :  { %2297 = vrcp.f32 %v906_v44  ;;  %v918_v37 = vand.u32 2147483648, %v906_v44  ;;  %v916_v57 = vand.u32 2147483647, %v906_v44  ;;  %vm912_vm14 = vweird.f32 %v906_v44 }
0x1157   :  { %2299 = vtanh.f32 %v901_v50  ;;  %v2943_v50 = vld [vmem:[#allocation7] sm:$0xff] }
0x1158   :  { %v919_v59 = vor.u32 1.1754944e-38, %v918_v37  ;;  %vm917_vm3 = vcmp.eq.f32.partialorder %v916_v57, 8.507059e+37  ;;  %1124 = vmatpush.msra.mxu2 %v2943_v50  ;;  %1572 = vmatpush.msra.mxu0 %v2943_v50 }
0x1159   :  { %1125 = vmatmul.f32.vlgmr.msra.gmra.mxu2 %v2514_v14 }
0x115a   :  { %1213 = vmatpush.msrb.mxu2 %v2923_v10 }
0x115c   :  { %v2298_v53 = vpop.eup %2297  ;;  %1214 = vmatpush.msrb.mxu2 %v2931_v40 }
0x115d   :  { %v908_v54 = vmul.f32 %v2298_v53, %v906_v44  ;;  %vm913_vm13 = vweird.f32 %v2298_v53  ;;  %v2300_v28 = vpop.eup %2299 }
0x115e   :  { %vm914_vm15 = vmor %vm912_vm14, %vm913_vm13  ;;  %1215 = vmatpush.msrb.mxu2 %v2939_v13 }
0x115f   :  { %v909_v55 = vsub.f32 1.0, %v908_v54 }
0x1160   :  { %1216 = vmatpush.msrb.mxu2 %v2943_v50 }
0x1161   :  { %v910_v56 = vmul.f32 %v2298_v53, %v909_v55 }
0x1162   :  { %1299 = vmatpush.msra.mxu2 %v2923_v10 }
0x1163   :  { %v911_v58 = vadd.f32 %v2298_v53, %v910_v56 }
0x1164   :  { %1300 = vmatpush.msra.mxu2 %v2931_v40 }
0x1165   :  { %v915_v60 = vsel %vm914_vm15, %v2298_v53, %v911_v58 }
0x1166   :  { %v920_v63 = vsel %vm917_vm3, %v919_v59, %v915_v60  ;;  %1301 = vmatpush.msra.mxu2 %v2939_v13 }
0x1167   :  { %v922_v2 = vsel %vm2752_vm6, %v2300_v28, %v920_v63 }
0x1168   :  { %925 = vrot.lane.b32.xlu1 %v922_v2, %s2515_s2  ;;  %v923_v19 = vmul.f32 %v922_v2, %v841_v8  ;;  %v986_v8 = vrot.slane %v2761_v26, 4  ;;  %v2933_v26 = vld [vmem:[#allocation7 + $0x28] sm:$0xff]  ;;  %1302 = vmatpush.msra.mxu2 %v2943_v50 }
0x1169   :  { %1142 = vmatpush.msrb.mxu3 %v2933_v26  ;;  %1590 = vmatpush.msra.mxu1 %v2933_v26 }
0x116b   :  { %1143 = vmatpush.msrb.mxu3 %v2941_v12  ;;  %1591 = vmatpush.msra.mxu1 %v2941_v12 }
0x116d   :  { %1144 = vmatpush.msrb.mxu3 %v2947_v51  ;;  %1592 = vmatpush.msra.mxu1 %v2947_v51 }
0x116e   :  { %1145 = vmatmul.f32.vlgmr.msrb.gmra.mxu3 %v2514_v14 }
0x116f   :  { %1233 = vmatpush.msra.mxu3 %v2925_v9 }
0x1170   :  { %949 = vrot.lane.b32.xlu1 %v948_v4, %s2515_s2 }
0x1171   :  { %1234 = vmatpush.msra.mxu3 %v2933_v26 }
0x1173   :  { %1235 = vmatpush.msra.mxu3 %v2941_v12 }
0x1175   :  { %1236 = vmatpush.msra.mxu3 %v2947_v51 }
0x1177   :  { %1319 = vmatpush.msrb.mxu3 %v2925_v9 }
0x1178   :  { %955 = vrot.lane.b32.xlu1 %v954_v11, %s2515_s2 }
0x1179   :  { %1320 = vmatpush.msrb.mxu3 %v2933_v26 }
0x117b   :  { %1321 = vmatpush.msrb.mxu3 %v2941_v12 }
0x117d   :  { %1322 = vmatpush.msrb.mxu3 %v2947_v51 }
0x11da   :  { %v926_v17 = vpop.permute.xlu1 %925 }
0x11db   :  { %v928_v18 = vmul.f32 %v926_v17, %v922_v2 }
0x11dc   :  { %v1126_v43 = vpop.f32.mrf.mxu2 }
0x11dd   :  { %930 = vrot.lane.b32.xlu2 %v928_v18, %s2516_s23 }
0x11e2   :  { %v950_v52 = vpop.permute.xlu1 %949 }
0x11e3   :  { %v952_v14 = vsel %vm226_vm10, %v2791_v62, %v950_v52 }
0x11e4   :  { %v992_v44 = vrot.slane %v952_v14, 4 }
0x11f1   :  { %v1146_v45 = vpop.f32.mrf.mxu3 }
0x11f2   :  { %v1149_v52 = vsel %vm127_vm2, %v1126_v43, %v1146_v45 }
0x1237   :  { %v931_v20 = vpop.permute.xlu2 %930 }
0x1238   :  { %v933_v21 = vadd.f32 %v931_v20, %v923_v19 }
0x123a   :  { %2301 = vtanh.f32 %v933_v21 }
0x1240   :  { %v2302_v22 = vpop.eup %2301 }
0x1241   :  { %936 = vrot.lane.b32.xlu0 %v2302_v22, %s2515_s2 }
0x1249   :  { %961 = vrot.lane.b32.xlu0 %v960_v23, %s2515_s2 }
0x1251   :  { %967 = vrot.lane.b32.xlu0 %v966_v24, %s2515_s2 }
0x1259   :  { %979 = vrot.lane.b32.xlu0 %v978_v15, %s2515_s2 }
0x12b3   :  { %v937_v27 = vpop.permute.xlu0 %936 }
0x12b4   :  { %v939_v61 = vmul.f32 %v937_v27, %v922_v2 }
0x12b6   :  { %v942_v39 = vrot.slane %v939_v61, 4  ;;  %983 = vrot.lane.b32.xlu1 %v939_v61, %s2516_s23 }
0x12b8   :  { %943 = vrot.lane.b32.xlu2 %v942_v39, %s2515_s2 }
0x12bb   :  { %v962_v53 = vpop.permute.xlu0 %961 }
0x12bc   :  { %v964_v37 = vsel %vm226_vm10, %v2843_v1, %v962_v53 }
0x12bd   :  { %v995_v56 = vrot.slane %v964_v37, 4 }
0x12c0   :  { %973 = vrot.lane.b32.xlu2 %v972_v5, %s2515_s2 }
0x12c3   :  { %v968_v59 = vpop.permute.xlu0 %967 }
0x12c8   :  { %987 = vrot.lane.b32.xlu2 %v986_v8, %s2515_s2 }
0x12cb   :  { %v980_v2 = vpop.permute.xlu0 %979 }
0x12cc   :  { %v982_v18 = vsel %vm226_vm10, %v2894_v48, %v980_v2 }
0x1312   :  { %v944_v54 = vpop.permute.xlu2 %943 }
0x1313   :  { %v946_v55 = vsel %vm226_vm10, %v2765_v29, %v944_v54  ;;  %v956_v29 = vpop.permute.xlu1 %955 }
0x1314   :  { %v1003_v62 = vsel %vm224_vm1, %v946_v55, %v992_v44  ;;  %v958_v57 = vsel %vm226_vm10, %v2817_v41, %v956_v29  ;;  %v970_v41 = vsel %vm226_vm10, %v2861_v7, %v968_v59  ;;  %v1023_v7 = vld [vmem:[%s3284_s5] sm:$0x3] }
0x1315   :  { %2161 = vmatmul.msk.f32.vlgmr.msrb.gmra.mxu0 %vm1029_vm4, %v1003_v62  ;;  %2165 = vmatmul.msk.f32.vlgmr.msrb.gmra.mxu1 %vm1029_vm4, %v1003_v62  ;;  %v1004_v58 = vsel %vm224_vm1, %v958_v57, %v995_v56  ;;  %v1026_v20 = vperm.slane %v1023_v7, 1  ;;  %v1025_v25 = vperm.slane %v1023_v7, 0 }
0x1316   :  { %1747 = vmatpush.msrb.mxu0 %v2923_v10  ;;  %1767 = vmatpush.msrb.mxu1 %v2925_v9 }
0x1318   :  { %1748 = vmatpush.msrb.mxu0 %v2931_v40  ;;  %1768 = vmatpush.msrb.mxu1 %v2933_v26 }
0x131a   :  { %v974_v1 = vpop.permute.xlu2 %973  ;;  %1749 = vmatpush.msrb.mxu0 %v2939_v13  ;;  %1769 = vmatpush.msrb.mxu1 %v2941_v12 }
0x131b   :  { %v976_v60 = vsel %vm226_vm10, %v2879_v16, %v974_v1 }
0x131c   :  { %1750 = vmatpush.msrb.mxu0 %v2943_v50  ;;  %1770 = vmatpush.msrb.mxu1 %v2947_v51  ;;  %v998_v28 = vrot.slane %v976_v60, 4 }
0x131d   :  { %2162 = vmatmul.msk.f32.gmra.mxu0 %vm1029_vm4, %v1004_v58  ;;  %2166 = vmatmul.msk.f32.gmra.mxu1 %vm1029_vm4, %v1004_v58 }
0x131e   :  { %v1005_v63 = vsel %vm224_vm1, %v970_v41, %v998_v28 }
0x1322   :  { %v988_v16 = vpop.permute.xlu2 %987 }
0x1325   :  { %2163 = vmatmul.msk.f32.gmra.mxu0 %vm1029_vm4, %v1005_v63  ;;  %2167 = vmatmul.msk.f32.gmra.mxu1 %vm1029_vm4, %v1005_v63 }
0x1328   :  { %v984_v4 = vpop.permute.xlu1 %983 }
0x1329   :  { %v990_v11 = vsel %vm226_vm10, %v984_v4, %v988_v16 }
0x132a   :  { %v1001_v17 = vrot.slane %v990_v11, 4 }
0x132c   :  { %v1006_v19 = vsel %vm224_vm1, %v982_v18, %v1001_v17 }
0x132d   :  { %2164 = vmatmul.msk.f32.gmra.mxu0 %vm1029_vm4, %v1006_v19  ;;  %2168 = vmatmul.msk.f32.gmra.mxu1 %vm1029_vm4, %v1006_v19 }
0x1392   :  { %v1059_v21 = vpop.f32.mrf.mxu0  ;;  %v1088_v22 = vpop.f32.mrf.mxu1 }
0x1393   :  { %v1089_v23 = vadd.f32 %v1088_v22, %v1026_v20  ;;  %v1060_v39 = vadd.f32 %v1059_v21, %v1025_v25 }
0x1395   :  { %v1190_v14 = vrot.slane %v1060_v39, 4  ;;  %v1727_v44 = vrot.slane %v1089_v23, 4 }
0x139a   :  { %v1062_v24 = vpop.f32.mrf.mxu0  ;;  %v1091_v15 = vpop.f32.mrf.mxu1 }
0x139b   :  { %v1092_v42 = vadd.f32 %v1091_v15, %v1026_v20  ;;  %v1063_v30 = vadd.f32 %v1062_v24, %v1025_v25 }
0x139d   :  { %v1368_v46 = vrot.slane %v1063_v30, 4  ;;  %v1549_v33 = vrot.slane %v1092_v42, 4 }
0x13a2   :  { %v1065_v48 = vpop.f32.mrf.mxu0  ;;  %v1094_v35 = vpop.f32.mrf.mxu1 }
0x13a3   :  { %v1066_v31 = vadd.f32 %v1065_v48, %v1025_v25  ;;  %v1095_v32 = vadd.f32 %v1094_v35, %v1026_v20 }
0x13a5   :  { %v1546_v0 = vrot.slane %v1066_v31, 4  ;;  %v1371_v34 = vrot.slane %v1095_v32, 4  ;;  %v3012_v27 = vsel %vm224_vm1, %v1063_v30, %v1095_v32  ;;  %v3015_v61 = vsel %vm224_vm1, %v1066_v31, %v1092_v42 }
0x13a7   :  { %v3018_v36 = vsel %vm224_vm1, %v1368_v46, %v1371_v34  ;;  %v3021_v38 = vsel %vm224_vm1, %v1546_v0, %v1549_v33 }
0x13aa   :  { %v1068_v5 = vpop.f32.mrf.mxu0  ;;  %v1097_v8 = vpop.f32.mrf.mxu1 }
0x13ab   :  { %v1069_v47 = vadd.f32 %v1068_v5, %v1025_v25  ;;  %v1098_v6 = vadd.f32 %v1097_v8, %v1026_v20 }
0x13ad   :  { %v1724_v53 = vrot.slane %v1069_v47, 4  ;;  %v1193_v54 = vrot.slane %v1098_v6, 4  ;;  %v1108_v55 = vsel %vm224_vm1, %v1060_v39, %v1098_v6  ;;  %v3027_v62 = vsel %vm224_vm1, %v1069_v47, %v1089_v23 }
0x13ae   :  { %v1150_v37 = vadd.f32 %v1149_v52, %v1108_v55 }
0x13af   :  { %v1195_v29 = vsel %vm224_vm1, %v1190_v14, %v1193_v54  ;;  %v3031_v56 = vsel %vm224_vm1, %v1724_v53, %v1727_v44 }
0x13b0   :  { %v2169_v1 = vmul.f32 -1.442695, %v1150_v37 }
0x13b2   :  { %2303 = vpow2.f32 %v2169_v1 }
0x13b8   :  { %v2304_v57 = vpop.eup %2303 }
0x13b9   :  { %v1155_v58 = vadd.f32 1.0, %v2304_v57 }
0x13bb   :  { %2305 = vrcp.f32 %v1155_v58  ;;  %v1167_v41 = vand.u32 2147483648, %v1155_v58  ;;  %v1165_v2 = vand.u32 2147483647, %v1155_v58  ;;  %vm1161_vm7 = vweird.f32 %v1155_v58 }
0x13bc   :  { %2307 = vtanh.f32 %v1150_v37 }
0x13bd   :  { %v1168_v4 = vor.u32 1.1754944e-38, %v1167_v41  ;;  %vm1166_vm9 = vcmp.eq.f32.partialorder %v1165_v2, 8.507059e+37 }
0x13c1   :  { %v2306_v59 = vpop.eup %2305 }
0x13c2   :  { %v1157_v60 = vmul.f32 %v2306_v59, %v1155_v58  ;;  %vm1162_vm5 = vweird.f32 %v2306_v59  ;;  %v2308_v17 = vpop.eup %2307 }
0x13c3   :  { %vm1163_vm8 = vmor %vm1161_vm7, %vm1162_vm5 }
0x13c4   :  { %v1158_v28 = vsub.f32 1.0, %v1157_v60 }
0x13c6   :  { %v1159_v63 = vmul.f32 %v2306_v59, %v1158_v28 }
0x13c8   :  { %v1160_v16 = vadd.f32 %v2306_v59, %v1159_v63 }
0x13ca   :  { %v1164_v11 = vsel %vm1163_vm8, %v2306_v59, %v1160_v16 }
0x13cb   :  { %v1169_v18 = vsel %vm1166_vm9, %v1168_v4, %v1164_v11 }
0x13cc   :  { %v1171_v19 = vsel %vm2752_vm6, %v2308_v17, %v1169_v18 }
0x13cd   :  { %1174 = vrot.lane.b32.xlu1 %v1171_v19, %s2515_s2  ;;  %v1172_v21 = vmul.f32 0.0, %v1171_v19 }
0x143f   :  { %v1175_v7 = vpop.permute.xlu1 %1174 }
0x1440   :  { %v1177_v20 = vmul.f32 %v1175_v7, %v1171_v19 }
0x1442   :  { %1179 = vrot.lane.b32.xlu2 %v1177_v20, %s2516_s23 }
0x149c   :  { %v1180_v22 = vpop.permute.xlu2 %1179 }
0x149d   :  { %v1182_v23 = vadd.f32 %v1180_v22, %v1172_v21 }
0x149f   :  { %2309 = vtanh.f32 %v1182_v23 }
0x14a5   :  { %v2310_v24 = vpop.eup %2309 }
0x14a6   :  { %1185 = vrot.lane.b32.xlu0 %v2310_v24, %s2515_s2 }
0x1518   :  { %v1186_v15 = vpop.permute.xlu0 %1185 }
0x1519   :  { %v3038_v42 = vmul.f32 %v1186_v15, %v1171_v19 }
0x151b   :  { %1197 = vrot.lane.b32.xlu1 %v3038_v42, %s2516_s23 }
0x158d   :  { %v3042_v25 = vpop.permute.xlu1 %1197 }
0x158e   :  { %2170 = vmatmul.msk.f32.vlgmr.msrb.gmra.mxu2 %vm226_vm10, %v3042_v25  ;;  %2171 = vmatmul.msk.f32.vlgmr.msra.gmra.mxu3 %vm226_vm10, %v3042_v25 }
0x158f   :  { %1391 = vmatpush.msrb.mxu2 %v2923_v10  ;;  %1411 = vmatpush.msra.mxu3 %v2925_v9 }
0x1591   :  { %1392 = vmatpush.msrb.mxu2 %v2931_v40  ;;  %1412 = vmatpush.msra.mxu3 %v2933_v26 }
0x1593   :  { %1393 = vmatpush.msrb.mxu2 %v2939_v13  ;;  %1413 = vmatpush.msra.mxu3 %v2941_v12 }
0x1595   :  { %1394 = vmatpush.msrb.mxu2 %v2943_v50  ;;  %1414 = vmatpush.msra.mxu3 %v2947_v51 }
0x1611   :  { %v1218_v30 = vpop.f32.mrf.mxu2  ;;  %v1238_v48 = vpop.f32.mrf.mxu3 }
0x1612   :  { %v1241_v35 = vsel %vm127_vm2, %v1218_v30, %v1238_v48 }
0x1613   :  { %v1242_v31 = vadd.f32 %v1241_v35, %v1195_v29 }
0x1615   :  { %v2172_v32 = vmul.f32 -1.442695, %v1242_v31 }
0x1617   :  { %2311 = vpow2.f32 %v2172_v32 }
0x161d   :  { %v2312_v46 = vpop.eup %2311 }
0x161e   :  { %v1247_v33 = vadd.f32 1.0, %v2312_v46 }
0x1620   :  { %2313 = vrcp.f32 %v1247_v33  ;;  %v1259_v43 = vand.u32 2147483648, %v1247_v33  ;;  %v1257_v5 = vand.u32 2147483647, %v1247_v33  ;;  %vm1253_vm12 = vweird.f32 %v1247_v33 }
0x1621   :  { %2315 = vtanh.f32 %v1242_v31 }
0x1622   :  { %v1260_v47 = vor.u32 1.1754944e-38, %v1259_v43  ;;  %vm1258_vm14 = vcmp.eq.f32.partialorder %v1257_v5, 8.507059e+37 }
0x1626   :  { %v2314_v0 = vpop.eup %2313 }
0x1627   :  { %v1249_v34 = vmul.f32 %v2314_v0, %v1247_v33  ;;  %vm1254_vm11 = vweird.f32 %v2314_v0  ;;  %v2316_v52 = vpop.eup %2315 }
0x1628   :  { %vm1255_vm13 = vmor %vm1253_vm12, %vm1254_vm11 }
0x1629   :  { %v1250_v39 = vsub.f32 1.0, %v1249_v34 }
0x162b   :  { %v1251_v45 = vmul.f32 %v2314_v0, %v1250_v39 }
0x162d   :  { %v1252_v8 = vadd.f32 %v2314_v0, %v1251_v45 }
0x162f   :  { %v1256_v6 = vsel %vm1255_vm13, %v2314_v0, %v1252_v8 }
0x1630   :  { %v1261_v14 = vsel %vm1258_vm14, %v1260_v47, %v1256_v6 }
0x1631   :  { %v1263_v44 = vsel %vm2752_vm6, %v2316_v52, %v1261_v14 }
0x1632   :  { %1266 = vrot.lane.b32.xlu2 %v1263_v44, %s2515_s2  ;;  %v1264_v55 = vmul.f32 %v1263_v44, %v1182_v23 }
0x168c   :  { %v1267_v53 = vpop.permute.xlu2 %1266 }
0x168d   :  { %v1269_v54 = vmul.f32 %v1267_v53, %v1263_v44 }
0x168f   :  { %1271 = vrot.lane.b32.xlu0 %v1269_v54, %s2516_s23 }
0x1701   :  { %v1272_v37 = vpop.permute.xlu0 %1271 }
0x1702   :  { %v1274_v29 = vadd.f32 %v1272_v37, %v1264_v55 }
0x1704   :  { %2317 = vtanh.f32 %v1274_v29 }
0x170a   :  { %v2318_v1 = vpop.eup %2317 }
0x170b   :  { %1277 = vrot.lane.b32.xlu1 %v2318_v1, %s2515_s2 }
0x177d   :  { %v1278_v57 = vpop.permute.xlu1 %1277 }
0x177e   :  { %v3063_v58 = vmul.f32 %v1278_v57, %v1263_v44 }
0x1780   :  { %1283 = vrot.lane.b32.xlu2 %v3063_v58, %s2516_s23  ;;  %v1853_v3 = vrot.slane %v3063_v58, 4 }
0x17da   :  { %v3067_v59 = vpop.permute.xlu2 %1283 }
0x17db   :  { %2173 = vmatmul.msk.f32.vlgmr.msra.gmra.mxu2 %vm226_vm10, %v3067_v59  ;;  %2174 = vmatmul.msk.f32.vlgmr.msrb.gmra.mxu3 %vm226_vm10, %v3067_v59 }
0x17dc   :  { %1477 = vmatpush.msra.mxu2 %v2923_v10  ;;  %1497 = vmatpush.msrb.mxu3 %v2925_v9 }
0x17de   :  { %1478 = vmatpush.msra.mxu2 %v2931_v40  ;;  %1498 = vmatpush.msrb.mxu3 %v2933_v26 }
0x17e0   :  { %1479 = vmatpush.msra.mxu2 %v2939_v13  ;;  %1499 = vmatpush.msrb.mxu3 %v2941_v12 }
0x17e2   :  { %1480 = vmatpush.msra.mxu2 %v2943_v50  ;;  %1500 = vmatpush.msrb.mxu3 %v2947_v51 }
0x185e   :  { %v1304_v60 = vpop.f32.mrf.mxu2  ;;  %v1324_v28 = vpop.f32.mrf.mxu3 }
0x185f   :  { %v1327_v41 = vsel %vm127_vm2, %v1304_v60, %v1324_v28 }
0x1860   :  { %v1328_v63 = vadd.f32 %v1327_v41, %v3012_v27 }
0x1862   :  { %v2175_v2 = vmul.f32 -1.442695, %v1328_v63 }
0x1864   :  { %2319 = vpow2.f32 %v2175_v2 }
0x186a   :  { %v2320_v16 = vpop.eup %2319 }
0x186b   :  { %v1333_v4 = vadd.f32 1.0, %v2320_v16 }
0x186d   :  { %2321 = vrcp.f32 %v1333_v4  ;;  %v1345_v19 = vand.u32 2147483648, %v1333_v4  ;;  %v1343_v20 = vand.u32 2147483647, %v1333_v4  ;;  %vm1339_vm3 = vweird.f32 %v1333_v4 }
0x186e   :  { %2323 = vtanh.f32 %v1328_v63 }
0x186f   :  { %v1346_v22 = vor.u32 1.1754944e-38, %v1345_v19  ;;  %vm1344_vm7 = vcmp.eq.f32.partialorder %v1343_v20, 8.507059e+37 }
0x1873   :  { %v2322_v11 = vpop.eup %2321 }
0x1874   :  { %v1335_v17 = vmul.f32 %v2322_v11, %v1333_v4  ;;  %vm1340_vm15 = vweird.f32 %v2322_v11  ;;  %v2324_v27 = vpop.eup %2323 }
0x1875   :  { %vm1341_vm5 = vmor %vm1339_vm3, %vm1340_vm15 }
0x1876   :  { %v1336_v18 = vsub.f32 1.0, %v1335_v17 }
0x1878   :  { %v1337_v7 = vmul.f32 %v2322_v11, %v1336_v18 }
0x187a   :  { %v1338_v21 = vadd.f32 %v2322_v11, %v1337_v7 }
0x187c   :  { %v1342_v23 = vsel %vm1341_vm5, %v2322_v11, %v1338_v21 }
0x187d   :  { %v1347_v24 = vsel %vm1344_vm7, %v1346_v22, %v1342_v23 }
0x187e   :  { %v1349_v15 = vsel %vm2752_vm6, %v2324_v27, %v1347_v24 }
0x187f   :  { %1352 = vrot.lane.b32.xlu0 %v1349_v15, %s2515_s2  ;;  %v1350_v35 = vmul.f32 %v1349_v15, %v1274_v29 }
0x18f1   :  { %v1353_v30 = vpop.permute.xlu0 %1352 }
0x18f2   :  { %v1355_v48 = vmul.f32 %v1353_v30, %v1349_v15 }
0x18f4   :  { %1357 = vrot.lane.b32.xlu1 %v1355_v48, %s2516_s23 }
0x1966   :  { %v1358_v31 = vpop.permute.xlu1 %1357 }
0x1967   :  { %v1360_v32 = vadd.f32 %v1358_v31, %v1350_v35 }
0x1969   :  { %2325 = vtanh.f32 %v1360_v32 }
0x196f   :  { %v2326_v46 = vpop.eup %2325 }
0x1970   :  { %1363 = vrot.lane.b32.xlu2 %v2326_v46, %s2515_s2 }
0x19ca   :  { %v1364_v33 = vpop.permute.xlu2 %1363 }
0x19cb   :  { %v3089_v0 = vmul.f32 %v1364_v33, %v1349_v15 }
0x19cd   :  { %1375 = vrot.lane.b32.xlu0 %v3089_v0, %s2516_s23 }
0x1a3f   :  { %v3093_v34 = vpop.permute.xlu0 %1375 }
0x1a40   :  { %2176 = vmatmul.msk.f32.vlgmr.msrb.gmra.mxu2 %vm226_vm10, %v3093_v34  ;;  %2177 = vmatmul.msk.f32.vlgmr.msra.gmra.mxu3 %vm226_vm10, %v3093_v34 }
0x1a41   :  { %1655 = vmatpush.msrb.mxu2 %v2923_v10  ;;  %1675 = vmatpush.msra.mxu3 %v2925_v9 }
0x1a43   :  { %1656 = vmatpush.msrb.mxu2 %v2931_v40  ;;  %1676 = vmatpush.msra.mxu3 %v2933_v26 }
0x1a45   :  { %1657 = vmatpush.msrb.mxu2 %v2939_v13  ;;  %1677 = vmatpush.msra.mxu3 %v2941_v12 }
0x1a47   :  { %1658 = vmatpush.msrb.mxu2 %v2943_v50  ;;  %1678 = vmatpush.msra.mxu3 %v2947_v51 }
0x1ac3   :  { %v1396_v39 = vpop.f32.mrf.mxu2  ;;  %v1416_v43 = vpop.f32.mrf.mxu3 }
0x1ac4   :  { %v1419_v45 = vsel %vm127_vm2, %v1396_v39, %v1416_v43 }
0x1ac5   :  { %v1420_v10 = vadd.f32 %v1419_v45, %v3018_v36 }
0x1ac7   :  { %v2178_v9 = vmul.f32 -1.442695, %v1420_v10 }
0x1ac9   :  { %2327 = vpow2.f32 %v2178_v9 }
0x1acf   :  { %v2328_v40 = vpop.eup %2327 }
0x1ad0   :  { %v1425_v5 = vadd.f32 1.0, %v2328_v40 }
0x1ad2   :  { %2329 = vrcp.f32 %v1425_v5  ;;  %v1437_v12 = vand.u32 2147483648, %v1425_v5  ;;  %v1435_v51 = vand.u32 2147483647, %v1425_v5  ;;  %vm1431_vm9 = vweird.f32 %v1425_v5 }
0x1ad3   :  { %2331 = vtanh.f32 %v1420_v10 }
0x1ad4   :  { %v1438_v6 = vor.u32 1.1754944e-38, %v1437_v12  ;;  %vm1436_vm12 = vcmp.eq.f32.partialorder %v1435_v51, 8.507059e+37 }
0x1ad8   :  { %v2330_v26 = vpop.eup %2329 }
0x1ad9   :  { %v1427_v13 = vmul.f32 %v2330_v26, %v1425_v5  ;;  %vm1432_vm8 = vweird.f32 %v2330_v26  ;;  %v2332_v36 = vpop.eup %2331 }
0x1ada   :  { %vm1433_vm11 = vmor %vm1431_vm9, %vm1432_vm8 }
0x1adb   :  { %v1428_v8 = vsub.f32 1.0, %v1427_v13 }
0x1add   :  { %v1429_v50 = vmul.f32 %v2330_v26, %v1428_v8 }
0x1adf   :  { %v1430_v47 = vadd.f32 %v2330_v26, %v1429_v50 }
0x1ae1   :  { %v1434_v52 = vsel %vm1433_vm11, %v2330_v26, %v1430_v47 }
0x1ae2   :  { %v1439_v14 = vsel %vm1436_vm12, %v1438_v6, %v1434_v52 }
0x1ae3   :  { %v1441_v44 = vsel %vm2752_vm6, %v2332_v36, %v1439_v14 }
0x1ae4   :  { %1444 = vrot.lane.b32.xlu1 %v1441_v44, %s2515_s2  ;;  %v1442_v55 = vmul.f32 %v1441_v44, %v1360_v32 }
0x1b56   :  { %v1445_v53 = vpop.permute.xlu1 %1444 }
0x1b57   :  { %v1447_v54 = vmul.f32 %v1445_v53, %v1441_v44 }
0x1b59   :  { %1449 = vrot.lane.b32.xlu2 %v1447_v54, %s2516_s23 }
0x1bb3   :  { %v1450_v37 = vpop.permute.xlu2 %1449 }
0x1bb4   :  { %v1452_v29 = vadd.f32 %v1450_v37, %v1442_v55 }
0x1bb6   :  { %2333 = vtanh.f32 %v1452_v29 }
0x1bbc   :  { %v2334_v1 = vpop.eup %2333 }
0x1bbd   :  { %1455 = vrot.lane.b32.xlu0 %v2334_v1, %s2515_s2 }
0x1c2f   :  { %v1456_v57 = vpop.permute.xlu0 %1455 }
0x1c30   :  { %v3115_v60 = vmul.f32 %v1456_v57, %v1441_v44 }
0x1c32   :  { %1461 = vrot.lane.b32.xlu1 %v3115_v60, %s2516_s23  ;;  %v1841_v58 = vrot.slane %v3115_v60, 4  ;;  %v1887_v60 = vld [vmem:[#allocation8 + $0x28] sm:$0xff] }
0x1ca4   :  { %v3119_v28 = vpop.permute.xlu1 %1461 }
0x1ca5   :  { %2179 = vmatmul.msk.f32.vlgmr.msra.gmra.mxu2 %vm226_vm10, %v3119_v28  ;;  %2180 = vmatmul.msk.f32.vlgmr.msrb.gmra.mxu3 %vm226_vm10, %v3119_v28 }
0x1d28   :  { %v1482_v41 = vpop.f32.mrf.mxu2  ;;  %v1502_v63 = vpop.f32.mrf.mxu3 }
0x1d29   :  { %v1505_v2 = vsel %vm127_vm2, %v1482_v41, %v1502_v63 }
0x1d2a   :  { %v1506_v16 = vadd.f32 %v1505_v2, %v3015_v61 }
0x1d2c   :  { %v2181_v4 = vmul.f32 -1.442695, %v1506_v16 }
0x1d2e   :  { %2335 = vpow2.f32 %v2181_v4 }
0x1d34   :  { %v2336_v11 = vpop.eup %2335 }
0x1d35   :  { %v1511_v17 = vadd.f32 1.0, %v2336_v11 }
0x1d37   :  { %2337 = vrcp.f32 %v1511_v17  ;;  %v1523_v20 = vand.u32 2147483648, %v1511_v17  ;;  %v1521_v22 = vand.u32 2147483647, %v1511_v17  ;;  %vm1517_vm14 = vweird.f32 %v1511_v17 }
0x1d38   :  { %2339 = vtanh.f32 %v1506_v16 }
0x1d39   :  { %v1524_v27 = vor.u32 1.1754944e-38, %v1523_v20  ;;  %vm1522_vm3 = vcmp.eq.f32.partialorder %v1521_v22, 8.507059e+37 }
0x1d3d   :  { %v2338_v18 = vpop.eup %2337 }
0x1d3e   :  { %v1513_v19 = vmul.f32 %v2338_v18, %v1511_v17  ;;  %vm1518_vm13 = vweird.f32 %v2338_v18  ;;  %v2340_v61 = vpop.eup %2339 }
0x1d3f   :  { %vm1519_vm15 = vmor %vm1517_vm14, %vm1518_vm13 }
0x1d40   :  { %v1514_v7 = vsub.f32 1.0, %v1513_v19 }
0x1d42   :  { %v1515_v21 = vmul.f32 %v2338_v18, %v1514_v7 }
0x1d44   :  { %v1516_v23 = vadd.f32 %v2338_v18, %v1515_v21 }
0x1d46   :  { %v1520_v24 = vsel %vm1519_vm15, %v2338_v18, %v1516_v23 }
0x1d47   :  { %v1525_v15 = vsel %vm1522_vm3, %v1524_v27, %v1520_v24 }
0x1d48   :  { %v1527_v30 = vsel %vm2752_vm6, %v2340_v61, %v1525_v15 }
0x1d49   :  { %1530 = vrot.lane.b32.xlu2 %v1527_v30, %s2515_s2  ;;  %v1528_v31 = vmul.f32 %v1527_v30, %v1452_v29 }
0x1da3   :  { %v1531_v48 = vpop.permute.xlu2 %1530 }
0x1da4   :  { %v1533_v35 = vmul.f32 %v1531_v48, %v1527_v30 }
0x1da6   :  { %1535 = vrot.lane.b32.xlu0 %v1533_v35, %s2516_s23 }
0x1e18   :  { %v1536_v32 = vpop.permute.xlu0 %1535 }
0x1e19   :  { %v1538_v46 = vadd.f32 %v1536_v32, %v1528_v31 }
0x1e1b   :  { %2341 = vtanh.f32 %v1538_v46 }
0x1e21   :  { %v2342_v33 = vpop.eup %2341 }
0x1e22   :  { %1541 = vrot.lane.b32.xlu1 %v2342_v33, %s2515_s2 }
0x1e94   :  { %v1542_v39 = vpop.permute.xlu1 %1541 }
0x1e95   :  { %v3133_v43 = vmul.f32 %v1542_v39, %v1527_v30 }
0x1e97   :  { %1553 = vrot.lane.b32.xlu2 %v3133_v43, %s2516_s23 }
0x1ef1   :  { %v3137_v45 = vpop.permute.xlu2 %1553 }
0x1ef2   :  { %2182 = vmatmul.msk.f32.vlgmr.msra.gmra.mxu0 %vm226_vm10, %v3137_v45  ;;  %2183 = vmatmul.msk.f32.vlgmr.msra.gmra.mxu1 %vm226_vm10, %v3137_v45 }
0x1f6f   :  { %v1574_v10 = vpop.f32.mrf.mxu0  ;;  %v1594_v9 = vpop.f32.mrf.mxu1 }
0x1f70   :  { %v1597_v40 = vsel %vm127_vm2, %v1574_v10, %v1594_v9 }
0x1f71   :  { %v1598_v5 = vadd.f32 %v1597_v40, %v3021_v38 }
0x1f73   :  { %v2184_v26 = vmul.f32 -1.442695, %v1598_v5 }
0x1f75   :  { %2343 = vpow2.f32 %v2184_v26 }
0x1f7b   :  { %v2344_v13 = vpop.eup %2343 }
0x1f7c   :  { %v1603_v8 = vadd.f32 1.0, %v2344_v13 }
0x1f7e   :  { %2345 = vrcp.f32 %v1603_v8  ;;  %v1615_v47 = vand.u32 2147483648, %v1603_v8  ;;  %v1613_v52 = vand.u32 2147483647, %v1603_v8  ;;  %vm1609_vm7 = vweird.f32 %v1603_v8 }
0x1f7f   :  { %2347 = vtanh.f32 %v1598_v5 }
0x1f80   :  { %v1616_v14 = vor.u32 1.1754944e-38, %v1615_v47  ;;  %vm1614_vm9 = vcmp.eq.f32.partialorder %v1613_v52, 8.507059e+37 }
0x1f84   :  { %v2346_v12 = vpop.eup %2345 }
0x1f85   :  { %v1605_v50 = vmul.f32 %v2346_v12, %v1603_v8  ;;  %vm1610_vm5 = vweird.f32 %v2346_v12  ;;  %v2348_v38 = vpop.eup %2347 }
0x1f86   :  { %vm1611_vm8 = vmor %vm1609_vm7, %vm1610_vm5  ;;  %vm2017_vm7 = vcmask 23552  }
0x1f87   :  { %v1606_v51 = vsub.f32 1.0, %v1605_v50 }
0x1f89   :  { %v1607_v6 = vmul.f32 %v2346_v12, %v1606_v51 }
0x1f8b   :  { %v1608_v36 = vadd.f32 %v2346_v12, %v1607_v6 }
0x1f8d   :  { %v1612_v44 = vsel %vm1611_vm8, %v2346_v12, %v1608_v36  ;;  %vm2019_vm8 = vcmask 31744  }
0x1f8e   :  { %v1617_v53 = vsel %vm1614_vm9, %v1616_v14, %v1612_v44  ;;  %vm2021_vm9 = vcmask 39936  }
0x1f8f   :  { %v1619_v54 = vsel %vm2752_vm6, %v2348_v38, %v1617_v53 }
0x1f90   :  { %1622 = vrot.lane.b32.xlu0 %v1619_v54, %s2515_s2  ;;  %v1620_v29 = vmul.f32 %v1619_v54, %v1538_v46 }
0x2002   :  { %v1623_v55 = vpop.permute.xlu0 %1622 }
0x2003   :  { %v1625_v37 = vmul.f32 %v1623_v55, %v1619_v54 }
0x2005   :  { %1627 = vrot.lane.b32.xlu1 %v1625_v37, %s2516_s23 }
0x2077   :  { %v1628_v1 = vpop.permute.xlu1 %1627 }
0x2078   :  { %v1630_v57 = vadd.f32 %v1628_v1, %v1620_v29  ;;  %v1847_v1 = vrot.slane %v3089_v0, 4  ;;  %v1921_v0 = vld [vmem:[#allocation10 + $0x28] sm:$0xff] }
0x207a   :  { %2349 = vtanh.f32 %v1630_v57 }
0x2080   :  { %v2350_v41 = vpop.eup %2349 }
0x2081   :  { %1633 = vrot.lane.b32.xlu2 %v2350_v41, %s2515_s2 }
0x20db   :  { %v1634_v63 = vpop.permute.xlu2 %1633 }
0x20dc   :  { %v3151_v2 = vmul.f32 %v1634_v63, %v1619_v54 }
0x20de   :  { %1639 = vrot.lane.b32.xlu0 %v3151_v2, %s2516_s23 }
0x2150   :  { %v3155_v16 = vpop.permute.xlu0 %1639 }
0x2151   :  { %2185 = vmatmul.msk.f32.vlgmr.msrb.gmra.mxu2 %vm226_vm10, %v3155_v16  ;;  %2186 = vmatmul.msk.f32.vlgmr.msra.gmra.mxu3 %vm226_vm10, %v3155_v16 }
0x21d4   :  { %v1660_v4 = vpop.f32.mrf.mxu2  ;;  %v1680_v11 = vpop.f32.mrf.mxu3 }
0x21d5   :  { %v1683_v17 = vsel %vm127_vm2, %v1660_v4, %v1680_v11  ;;  %v1861_v4 = vrot.slane %v3038_v42, 4  ;;  %v1923_v11 = vld [vmem:[#allocation10 + $0x38] sm:$0xff] }
0x21d6   :  { %v1684_v18 = vadd.f32 %v1683_v17, %v3027_v62  ;;  %v1922_v17 = vld [vmem:[#allocation10 + $0x30] sm:$0xff]  ;;  %2197 = vmatpush.msrb.mxu3 %v1923_v11  ;;  %1948 = vmatpush.msra.mxu0 %v1923_v11 }
0x21d8   :  { %v2187_v19 = vmul.f32 -1.442695, %v1684_v18  ;;  %2198 = vmatpush.msrb.mxu3 %v1922_v17  ;;  %1949 = vmatpush.msra.mxu0 %v1922_v17 }
0x21da   :  { %2351 = vpow2.f32 %v2187_v19  ;;  %2199 = vmatpush.msrb.mxu3 %v1921_v0  ;;  %1950 = vmatpush.msra.mxu0 %v1921_v0 }
0x21e0   :  { %v2352_v7 = vpop.eup %2351 }
0x21e1   :  { %v1689_v20 = vadd.f32 1.0, %v2352_v7 }
0x21e3   :  { %2353 = vrcp.f32 %v1689_v20  ;;  %v1701_v27 = vand.u32 2147483648, %v1689_v20  ;;  %v1699_v61 = vand.u32 2147483647, %v1689_v20  ;;  %vm1695_vm12 = vweird.f32 %v1689_v20 }
0x21e4   :  { %2355 = vtanh.f32 %v1684_v18 }
0x21e5   :  { %v1702_v30 = vor.u32 1.1754944e-38, %v1701_v27  ;;  %vm1700_vm14 = vcmp.eq.f32.partialorder %v1699_v61, 8.507059e+37  ;;  %v1916_v27 = vld [vmem:[#allocation10] sm:$0xff]  ;;  %v1888_v61 = vld [vmem:[#allocation8 + $0x30] sm:$0xff] }
0x21e9   :  { %v2354_v21 = vpop.eup %2353 }
0x21ea   :  { %v1691_v22 = vmul.f32 %v2354_v21, %v1689_v20  ;;  %vm1696_vm11 = vweird.f32 %v2354_v21  ;;  %v2356_v62 = vpop.eup %2355  ;;  %v1920_v20 = vld [vmem:[#allocation10 + $0x20] sm:$0xff] }
0x21eb   :  { %vm1697_vm13 = vmor %vm1695_vm12, %vm1696_vm11  ;;  %2200 = vmatpush.msrb.mxu3 %v1920_v20  ;;  %1951 = vmatpush.msra.mxu0 %v1920_v20  ;;  %vm2023_vm11 = vcmask 48128   ;;  %vm2027_vm12 = vcmask 60416  }
0x21ec   :  { %v1692_v23 = vsub.f32 1.0, %v1691_v22  ;;  %v1918_v22 = vld [vmem:[#allocation10 + $0x10] sm:$0xff] }
0x21ee   :  { %v1693_v24 = vmul.f32 %v2354_v21, %v1692_v23  ;;  %v1917_v23 = vld [vmem:[#allocation10 + $0x8] sm:$0xff] }
0x21f0   :  { %v1694_v15 = vadd.f32 %v2354_v21, %v1693_v24  ;;  %v1889_v24 = vld [vmem:[#allocation8 + $0x38] sm:$0xff] }
0x21f1   :  { %1904 = vmatpush.msra.mxu2 %v1889_v24 }
0x21f2   :  { %v1698_v48 = vsel %vm1697_vm13, %v2354_v21, %v1694_v15  ;;  %v1919_v21 = vld [vmem:[#allocation10 + $0x18] sm:$0xff]  ;;  %v1886_v15 = vld [vmem:[#allocation8 + $0x20] sm:$0xff] }
0x21f3   :  { %v1703_v35 = vsel %vm1700_vm14, %v1702_v30, %v1698_v48  ;;  %2201 = vmatpush.msrb.mxu3 %v1919_v21  ;;  %1952 = vmatpush.msra.mxu0 %v1919_v21  ;;  %v1885_v30 = vld [vmem:[#allocation8 + $0x18] sm:$0xff]  ;;  %v1884_v48 = vld [vmem:[#allocation8 + $0x10] sm:$0xff] }
0x21f4   :  { %v1705_v31 = vsel %vm2752_vm6, %v2356_v62, %v1703_v35  ;;  %1905 = vmatpush.msra.mxu2 %v1888_v61  ;;  %v1883_v62 = vld [vmem:[#allocation8 + $0x8] sm:$0xff] }
0x21f5   :  { %1708 = vrot.lane.b32.xlu1 %v1705_v31, %s2515_s2  ;;  %v1706_v33 = vmul.f32 %v1705_v31, %v1630_v57  ;;  %2202 = vmatpush.msrb.mxu3 %v1918_v22 }
0x21f6   :  { %1953 = vmatpush.msra.mxu0 %v1918_v22  ;;  %1906 = vmatpush.msra.mxu2 %v1887_v60 }
0x21f7   :  { %2203 = vmatpush.msrb.mxu3 %v1917_v23 }
0x21f8   :  { %1954 = vmatpush.msra.mxu0 %v1917_v23  ;;  %1907 = vmatpush.msra.mxu2 %v1886_v15 }
0x21f9   :  { %2204 = vmatpush.msrb.mxu3 %v1916_v27 }
0x21fa   :  { %1955 = vmatpush.msra.mxu0 %v1916_v27  ;;  %1908 = vmatpush.msra.mxu2 %v1885_v30 }
0x21fc   :  { %1909 = vmatpush.msra.mxu2 %v1884_v48 }
0x21fe   :  { %1910 = vmatpush.msra.mxu2 %v1883_v62 }
0x2267   :  { %v1709_v32 = vpop.permute.xlu1 %1708 }
0x2268   :  { %v1711_v46 = vmul.f32 %v1709_v32, %v1705_v31 }
0x226a   :  { %1713 = vrot.lane.b32.xlu2 %v1711_v46, %s2516_s23 }
0x22c4   :  { %v1714_v39 = vpop.permute.xlu2 %1713 }
0x22c5   :  { %v1716_v10 = vadd.f32 %v1714_v39, %v1706_v33 }
0x22c7   :  { %2357 = vtanh.f32 %v1716_v10 }
0x22cd   :  { %v2358_v9 = vpop.eup %2357 }
0x22ce   :  { %1719 = vrot.lane.b32.xlu0 %v2358_v9, %s2515_s2  ;;  %v1835_v9 = vrot.slane %v3133_v43, 4 }
0x2340   :  { %v1720_v40 = vpop.permute.xlu0 %1719 }
0x2341   :  { %v1722_v5 = vmul.f32 %v1720_v40, %v1705_v31 }
0x2343   :  { %1731 = vrot.lane.b32.xlu1 %v1722_v5, %s2516_s23  ;;  %v1823_v63 = vrot.slane %v1722_v5, 4 }
0x23b5   :  { %v3170_v26 = vpop.permute.xlu1 %1731 }
0x23b6   :  { %2188 = vmatmul.msk.f32.vlgmr.msrb.gmra.mxu0 %vm226_vm10, %v3170_v26  ;;  %2189 = vmatmul.msk.f32.vlgmr.msrb.gmra.mxu1 %vm226_vm10, %v3170_v26 }
0x2433   :  { %v1752_v13 = vpop.f32.mrf.mxu0  ;;  %v1772_v8 = vpop.f32.mrf.mxu1 }
0x2434   :  { %v1775_v12 = vsel %vm127_vm2, %v1752_v13, %v1772_v8  ;;  %v1829_v13 = vrot.slane %v3151_v2, 4 }
0x2435   :  { %v1776_v50 = vadd.f32 %v1775_v12, %v3031_v56 }
0x2437   :  { %v2190_v51 = vmul.f32 -1.442695, %v1776_v50 }
0x2439   :  { %2359 = vpow2.f32 %v2190_v51 }
0x243f   :  { %v2360_v47 = vpop.eup %2359 }
0x2440   :  { %v1781_v6 = vadd.f32 1.0, %v2360_v47 }
0x2442   :  { %2361 = vrcp.f32 %v1781_v6  ;;  %v1793_v44 = vand.u32 2147483648, %v1781_v6  ;;  %v1791_v53 = vand.u32 2147483647, %v1781_v6  ;;  %vm1787_vm3 = vweird.f32 %v1781_v6 }
0x2443   :  { %2363 = vtanh.f32 %v1776_v50 }
0x2444   :  { %v1794_v49 = vor.u32 1.1754944e-38, %v1793_v44  ;;  %vm1792_vm2 = vcmp.eq.f32.partialorder %v1791_v53, 8.507059e+37 }
0x2448   :  { %v2362_v52 = vpop.eup %2361 }
0x2449   :  { %v1783_v36 = vmul.f32 %v2362_v52, %v1781_v6  ;;  %vm1788_vm15 = vweird.f32 %v2362_v52  ;;  %v2364_v56 = vpop.eup %2363 }
0x244a   :  { %vm1789_vm5 = vmor %vm1787_vm3, %vm1788_vm15 }
0x244b   :  { %v1784_v14 = vsub.f32 1.0, %v1783_v36 }
0x244d   :  { %v1785_v38 = vmul.f32 %v2362_v52, %v1784_v14 }
0x244f   :  { %v1786_v54 = vadd.f32 %v2362_v52, %v1785_v38 }
0x2451   :  { %v1790_v55 = vsel %vm1789_vm5, %v2362_v52, %v1786_v54  ;;  %vm2106_vm5 = vcmask 519168  }
0x2452   :  { %v1795_v37 = vsel %vm1792_vm2, %v1794_v49, %v1790_v55  ;;  %v2235_v49 = vld [vmem:[%s3287_s8] ss:$0 sm:$0xff]  ;;  %vm2120_vm2 = vcmask 72704  }
0x2453   :  { %v1797_v29 = vsel %vm2752_vm6, %v2364_v56, %v1795_v37  ;;  %vm2013_vm6 = vcmask 7168  }
0x2454   :  { %1800 = vrot.lane.b32.xlu2 %v1797_v29, %s2515_s2  ;;  %v1798_v18 = vmul.f32 %v1797_v29, %v1716_v10 }
0x245c   :  { %1848 = vrot.lane.b32.xlu2 %v1847_v1, %s2515_s2 }
0x24ae   :  { %v1801_v57 = vpop.permute.xlu2 %1800 }
0x24af   :  { %v1803_v41 = vmul.f32 %v1801_v57, %v1797_v29 }
0x24b1   :  { %1805 = vrot.lane.b32.xlu0 %v1803_v41, %s2516_s23  ;;  %v2236_v41 = vld [vmem:[%s3290_s11] ss:$0 sm:$0xff] }
0x24b6   :  { %v1849_v32 = vpop.permute.xlu2 %1848 }
0x24b7   :  { %v3196_v33 = vsel %vm226_vm10, %v3155_v16, %v1849_v32  ;;  %v1882_v16 = vld [vmem:[#allocation8] sm:$0xff] }
0x24b8   :  { %v1873_v39 = vrot.slane %v3196_v33, 4  ;;  %1911 = vmatpush.msra.mxu2 %v1882_v16 }
0x24b9   :  { %1824 = vrot.lane.b32.xlu0 %v1823_v63, %s2515_s2 }
0x24c1   :  { %1862 = vrot.lane.b32.xlu0 %v1861_v4, %s2515_s2 }
0x24c9   :  { %1854 = vrot.lane.b32.xlu0 %v1853_v3, %s2515_s2 }
0x2523   :  { %v1806_v19 = vpop.permute.xlu0 %1805 }
0x2524   :  { %v1808_v7 = vadd.f32 %v1806_v19, %v1798_v18 }
0x2526   :  { %2365 = vtanh.f32 %v1808_v7 }
0x252b   :  { %v1825_v8 = vpop.permute.xlu0 %1824 }
0x252c   :  { %v2366_v42 = vpop.eup %2365  ;;  %v3226_v6 = vsel %vm226_vm10, %v3067_v59, %v1825_v8 }
0x252d   :  { %1811 = vrot.lane.b32.xlu1 %v2366_v42, %s2515_s2  ;;  %v1867_v52 = vrot.slane %v3226_v6, 4 }
0x2533   :  { %v1863_v12 = vpop.permute.xlu0 %1862 }
0x2535   :  { %1842 = vrot.lane.b32.xlu1 %v1841_v58, %s2515_s2 }
0x253b   :  { %v1855_v43 = vpop.permute.xlu0 %1854 }
0x253c   :  { %v3219_v2 = vsel %vm226_vm10, %v3170_v26, %v1855_v43 }
0x259f   :  { %v1812_v35 = vpop.permute.xlu1 %1811 }
0x25a0   :  { %v1814_v31 = vmul.f32 %v1812_v35, %v1797_v29 }
0x25a2   :  { %v1817_v46 = vrot.slane %v1814_v31, 4  ;;  %1858 = vrot.lane.b32.xlu2 %v1814_v31, %s2516_s23 }
0x25a4   :  { %1818 = vrot.lane.b32.xlu1 %v1817_v46, %s2515_s2 }
0x25a7   :  { %v1843_v10 = vpop.permute.xlu1 %1842 }
0x25a8   :  { %v3203_v40 = vsel %vm226_vm10, %v3137_v45, %v1843_v10 }
0x25a9   :  { %v1880_v5 = vsel %vm224_vm1, %v3203_v40, %v1873_v39 }
0x25aa   :  { %1836 = vrot.lane.b32.xlu2 %v1835_v9, %s2515_s2  ;;  %2194 = vmatmul.msk.f32.vlgmr.msrb.gmra.mxu3 %vm1029_vm4, %v1880_v5 }
0x25ac   :  { %1830 = vrot.lane.b32.xlu1 %v1829_v13, %s2515_s2 }
0x25fc   :  { %v1859_v50 = vpop.permute.xlu2 %1858 }
0x25fd   :  { %v3212_v45 = vsel %vm226_vm10, %v1859_v50, %v1863_v12 }
0x25fe   :  { %v1876_v51 = vrot.slane %v3212_v45, 4  ;;  %2191 = vmatmul.msk.f32.vlgmr.msra.gmra.mxu2 %vm1029_vm4, %v3212_v45 }
0x2600   :  { %v1881_v47 = vsel %vm224_vm1, %v3219_v2, %v1876_v51 }
0x2601   :  { %2195 = vmatmul.msk.f32.gmra.mxu3 %vm1029_vm4, %v1881_v47 }
0x2604   :  { %v1837_v44 = vpop.permute.xlu2 %1836 }
0x2605   :  { %v3238_v38 = vsel %vm226_vm10, %v3119_v28, %v1837_v44  ;;  %v2234_v28 = vld [vmem:[%s3289_s10] ss:$0 sm:$0xff] }
0x2606   :  { %v1870_v59 = vrot.slane %v3238_v38, 4 }
0x2616   :  { %v1819_v36 = vpop.permute.xlu1 %1818 }
0x2617   :  { %v3231_v14 = vsel %vm226_vm10, %v3042_v25, %v1819_v36 }
0x2618   :  { %v1878_v26 = vsel %vm224_vm1, %v3231_v14, %v1867_v52 }
0x2619   :  { %2192 = vmatmul.msk.f32.vlgmr.msra.gmra.mxu0 %vm1029_vm4, %v1878_v26  ;;  %v2517_v26 = vmov 2  }
0x261a   :  { %2227 = vset.pattern.permute.xlu0 %v2517_v26 }
0x261e   :  { %v1831_v53 = vpop.permute.xlu1 %1830 }
0x261f   :  { %v3243_v54 = vsel %vm226_vm10, %v3093_v34, %v1831_v53  ;;  %vm2015_vm10 = vcmask 15360   ;;  %v2519_v53 = vmov 0  }
0x2620   :  { %v1879_v25 = vsel %vm224_vm1, %v3243_v54, %v1870_v59  ;;  %v2518_v59 = vmov 1   ;;  %2225 = vset.pattern.permute.xlu1 %v2519_v53 }
0x2621   :  { %2193 = vmatmul.msk.f32.gmra.mxu0 %vm1029_vm4, %v1879_v25  ;;  %2226 = vset.pattern.permute.xlu2 %v2518_v59 }
0x262d   :  { %v1963_v56 = vpop.f32.mrf.mxu3 }
0x262e   :  { %v1964_v1 = vadd.f32 %v2234_v28, %v1963_v56 }
0x2681   :  { %v1913_v55 = vpop.f32.mrf.mxu2 }
0x2682   :  { %v1914_v37 = vadd.f32 %v2235_v49, %v1913_v55 }
0x2684   :  { %v1971_v29 = vrot.slane %v1914_v37, 4  ;;  %v1966_v11 = vpop.f32.mrf.mxu3 }
0x2685   :  { %v1967_v0 = vadd.f32 %v2234_v28, %v1966_v11  ;;  %v2522_v11 = vmov 3  }
0x2686   :  { %v1973_v34 = vsel %vm224_vm1, %v1914_v37, %v1971_v29 }
0x2687   :  { %v1976_v57 = vadd.f32 %v1973_v34, %v1964_v1  ;;  %v1977_v7 = vadd.f32 %v1973_v34, %v1967_v0  ;;  %v2524_v0 = vmov 5  }
0x2689   :  { %2367 = vtanh.f32 %v1976_v57 }
0x268f   :  { %v2368_v63 = vpop.eup %2367 }
0x2690   :  { %v1987_v4 = vmul.f32 %v2368_v63, %v2236_v41 }
0x2692   :  { %v1995_v3 = vsel %vm1029_vm4, %v1987_v4, 0.0  ;;  %v2520_v4 = vmov 4  }
0x2693   :  { %1996 = vadd.xlane.f32.xlu1 %v1995_v3  ;;  %v2521_v3 = vmov 7  }
0x2696   :  { %v1957_v17 = vpop.f32.mrf.mxu0 }
0x2697   :  { %v1958_v18 = vadd.f32 %v2234_v28, %v1957_v17  ;;  %v2523_v17 = vmov 6  }
0x2699   :  { %v1974_v19 = vadd.f32 %v1973_v34, %v1958_v18 }
0x269b   :  { %2369 = vtanh.f32 %v1974_v19 }
0x269c   :  { %2371 = vtanh.f32 %v1977_v7 }
0x269e   :  { %v1960_v42 = vpop.f32.mrf.mxu0 }
0x269f   :  { %v1961_v58 = vadd.f32 %v2234_v28, %v1960_v42 }
0x26a1   :  { %v2370_v20 = vpop.eup %2369  ;;  %v1975_v21 = vadd.f32 %v1973_v34, %v1961_v58 }
0x26a2   :  { %v1985_v22 = vmul.f32 %v2370_v20, %v2236_v41  ;;  %v2372_v27 = vpop.eup %2371 }
0x26a3   :  { %2373 = vtanh.f32 %v1975_v21  ;;  %v1988_v24 = vmul.f32 %v2372_v27, %v2236_v41 }
0x26a4   :  { %v1989_v23 = vsel %vm1029_vm4, %v1985_v22, 0.0 }
0x26a5   :  { %1990 = vadd.xlane.f32.xlu2 %v1989_v23  ;;  %v1998_v30 = vsel %vm1029_vm4, %v1988_v24, 0.0 }
0x26a9   :  { %v2374_v61 = vpop.eup %2373 }
0x26aa   :  { %v1986_v60 = vmul.f32 %v2374_v61, %v2236_v41 }
0x26ac   :  { %v1992_v15 = vsel %vm1029_vm4, %v1986_v60, 0.0  ;;  %vm2025_vm4 = vcmask 56320  }
0x26ad   :  { %1993 = vadd.xlane.f32.xlu0 %v1992_v15  ;;  %1999 = vadd.xlane.f32.xlu2 %v1998_v30 }
0x2706   :  { %v1997_v35 = vpop.xlane.xlu1 %1996 }
0x2707   :  { %v2008_v9 = vrot.slane %v1997_v35, 4 }
0x2718   :  { %v1991_v48 = vpop.xlane.xlu2 %1990 }
0x2719   :  { %v2002_v62 = vrot.slane %v1991_v48, 4 }
0x271b   :  { %v2014_v31 = vsel %vm2013_vm6, %v1991_v48, %v2002_v62 }
0x2720   :  { %v1994_v32 = vpop.xlane.xlu0 %1993  ;;  %v2000_v10 = vpop.xlane.xlu2 %1999 }
0x2721   :  { %v2005_v46 = vrot.slane %v1994_v32, 4  ;;  %v2016_v39 = vsel %vm2015_vm10, %v2014_v31, %v1994_v32  ;;  %v2011_v16 = vrot.slane %v2000_v10, 4 }
0x2723   :  { %v2018_v5 = vsel %vm2017_vm7, %v2016_v39, %v2005_v46 }
0x2724   :  { %v2020_v13 = vsel %vm2019_vm8, %v2018_v5, %v1997_v35 }
0x2725   :  { %v2022_v8 = vsel %vm2021_vm9, %v2020_v13, %v2008_v9 }
0x2726   :  { %v2024_v12 = vsel %vm2023_vm11, %v2022_v8, %v2000_v10 }
0x2727   :  { %v2026_v43 = vsel %vm2025_vm4, %v2024_v12, %v2011_v16 }
0x2728   :  { %v2028_v50 = vsel %vm2027_vm12, %v2026_v43, -inf }
0x2729   :  { %2029 = vmax.xlane.f32.xlu2 %v2028_v50 }
0x279c   :  { %v2030_v51 = vpop.xlane.xlu2 %2029 }
0x279d   :  { %v2031_v47 = vsub.f32 %v2026_v43, %v2030_v51 }
0x279f   :  { %v2032_v52 = vmul.f32 1.442695, %v2031_v47 }
0x27a1   :  { %2375 = vpow2.f32 %v2032_v52 }
0x27a7   :  { %v2376_v36 = vpop.eup %2375 }
0x27a8   :  { %v2034_v44 = vsel %vm2027_vm12, %v2376_v36, 0.0 }
0x27a9   :  { %2035 = vadd.xlane.f32.xlu0 %v2034_v44 }
0x281c   :  { %v2036_v25 = vpop.xlane.xlu0 %2035 }
0x281d   :  { %2377 = vrcp.f32 %v2036_v25  ;;  %v2048_v56 = vand.u32 2147483648, %v2036_v25  ;;  %v2046_v29 = vand.u32 2147483647, %v2036_v25  ;;  %vm2042_vm14 = vweird.f32 %v2036_v25 }
0x281f   :  { %v2049_v34 = vor.u32 1.1754944e-38, %v2048_v56  ;;  %vm2047_vm3 = vcmp.eq.f32.partialorder %v2046_v29, 8.507059e+37 }
0x2823   :  { %v2378_v49 = vpop.eup %2377 }
0x2824   :  { %v2038_v28 = vmul.f32 %v2378_v49, %v2036_v25  ;;  %vm2043_vm13 = vweird.f32 %v2378_v49 }
0x2825   :  { %vm2044_vm15 = vmor %vm2042_vm14, %vm2043_vm13 }
0x2826   :  { %v2039_v55 = vsub.f32 1.0, %v2038_v28 }
0x2828   :  { %v2040_v37 = vmul.f32 %v2378_v49, %v2039_v55 }
0x282a   :  { %v2041_v1 = vadd.f32 %v2378_v49, %v2040_v37 }
0x282c   :  { %v2045_v57 = vsel %vm2044_vm15, %v2378_v49, %v2041_v1 }
0x282d   :  { %v2050_v41 = vsel %vm2047_vm3, %v2049_v34, %v2045_v57 }
0x282e   :  { %v2051_v63 = vmul.f32 %v2376_v36, %v2050_v41 }
0x2830   :  { %2066 = vperm.xlu0 %2227, %v2051_v63   ;;  %2060 = vperm.xlu2 %2226, %v2051_v63  }
0x2831   :  { %2054 = vperm.xlu1 %2225, %v2051_v63  }
0x2838   :  { %2229 = vset.pattern.permute.xlu2 %v2520_v4  ;;  %2233 = vset.pattern.permute.xlu0 %v2521_v3 }
0x2839   :  { %2228 = vset.pattern.permute.xlu1 %v2522_v11  ;;  %2078 = vperm.xlu2 %2229, %v2051_v63  }
0x283a   :  { %2072 = vperm.xlu1 %2228, %v2051_v63  }
0x2841   :  { %2231 = vset.pattern.permute.xlu2 %v2523_v17 }
0x2842   :  { %2230 = vset.pattern.permute.xlu1 %v2524_v0  ;;  %2090 = vperm.xlu2 %2231, %v2051_v63  }
0x2843   :  { %2084 = vperm.xlu1 %2230, %v2051_v63  }
0x284b   :  { %2232 = vset.pattern.permute.xlu1 %v2521_v3 }
0x284c   :  { %2096 = vperm.xlu1 %2232, %v2051_v63  }
0x288a   :  { %v2061_v19 = vpop.permute.xlu2 %2060 }
0x288b   :  { %v2063_v58 = vmul.f32 %v2061_v19, %v3226_v6 }
0x2893   :  { %v2079_v22 = vpop.permute.xlu2 %2078 }
0x2894   :  { %v2081_v15 = vmul.f32 %v2079_v22, %v3203_v40  ;;  %v2238_v40 = vld [vmem:[#allocation2] ss:$0 sm:$0xff] }
0x289c   :  { %v2091_v62 = vpop.permute.xlu2 %2090 }
0x289d   :  { %v2093_v35 = vmul.f32 %v2091_v62, %v3219_v2 }
0x28a2   :  { %v2067_v20 = vpop.permute.xlu0 %2066 }
0x28a3   :  { %v2055_v18 = vpop.permute.xlu1 %2054  ;;  %v2069_v23 = vmul.f32 %v2067_v20, %v3243_v54 }
0x28a4   :  { %v2057_v7 = vmul.f32 %v2055_v18, %v3231_v14 }
0x28a6   :  { %v2064_v21 = vadd.f32 %v2063_v58, %v2057_v7 }
0x28a8   :  { %v2070_v24 = vadd.f32 %v2069_v23, %v2064_v21 }
0x28ac   :  { %v2073_v42 = vpop.permute.xlu1 %2072 }
0x28ad   :  { %v2075_v27 = vmul.f32 %v2073_v42, %v3238_v38  ;;  %v2237_v38 = vld [vmem:[%s3291_s12] ss:$0 sm:$0xff] }
0x28af   :  { %v2076_v61 = vadd.f32 %v2075_v27, %v2070_v24 }
0x28b1   :  { %v2082_v48 = vadd.f32 %v2081_v15, %v2076_v61 }
0x28b5   :  { %v2085_v60 = vpop.permute.xlu1 %2084 }
0x28b6   :  { %v2087_v30 = vmul.f32 %v2085_v60, %v3196_v33 }
0x28b8   :  { %v2088_v14 = vadd.f32 %v2087_v30, %v2082_v48 }
0x28ba   :  { %v2094_v31 = vadd.f32 %v2093_v35, %v2088_v14 }
0x28be   :  { %v2097_v6 = vpop.permute.xlu1 %2096 }
0x28bf   :  { %v2099_v32 = vmul.f32 %v2097_v6, %v3212_v45 }
0x28c1   :  { %v2100_v54 = vadd.f32 %v2099_v32, %v2094_v31 }
0x28c3   :  { %v2105_v46 = vmul.f32 %v2237_v38, %v2100_v54 }
0x28c5   :  { %v2107_v39 = vsel %vm2106_vm5, %v2105_v46, 0.0 }
0x28c6   :  { %2108 = vadd.xlane.f32.xlu2 %v2107_v39 }
0x2939   :  { %v2109_v33 = vpop.xlane.xlu2 %2108 }
0x293a   :  { %v2114_v10 = vadd.f32 %v2238_v40, %v2109_v33 }
0x293c   :  { %2116 = vrot.lane.b32.xlu0 %v2114_v10, %s2510_s27 }
0x29ae   :  { %v2117_v2 = vpop.permute.xlu0 %2116 }
0x29af   :  { %v2119_v9 = vsel %vm145_vm0, %v2051_v63, %v2117_v2 }
0x29b0   :  { %v2121_v5 = vsel %vm2120_vm2, %v2119_v9, 0.0 }
0x29b1   :  { %v2122_v45 = vsel %vm224_vm1, %v2121_v5, 0.0 }
0x29b2   :  { %2123 = vst [vmem:[%s3293_s14] sm:$0xff] %v2122_v45 }
0x29b3   :  { %2128 = vsyncpa [#allocation4], 1 }
0x29b4   :  { %2129 = vsyncpa [#allocation6], 1 }
0x29b5   :  { %2130 = vsyncpa [#allocation9], 1 }

</bundles_post_ra>
